<compile_context>
chip_gen: v7x
topology: tpu7x:2x2x1
jax: 0.10.0
libtpu: 0.0.40
codegen_flags: <defaults>
</compile_context>

<pallas_src>
import functools

import jax
import jax.numpy as jnp
from jax.experimental import pallas as pl
from jax.experimental.pallas import tpu as pltpu

MODEL_DIM = 256          # module default
NUM_HEADS = 4            # module default
DIM_PER_HEAD = MODEL_DIM // NUM_HEADS
SEQ_LEN = 16             # small "part_nums" sequence length
LN_EPS = 1e-5            # torch.nn.LayerNorm default
SCALE = float((DIM_PER_HEAD // NUM_HEADS) ** (-0.5))   # as in MHA.forward (v2) -> 0.25


def mha_kernel(key_ref, value_ref, query_ref,
               wk_ref, bk_ref, wv_ref, bv_ref, wq_ref, bq_ref,
               wf_ref, bf_ref, gamma_ref, beta_ref,
               out_ref, attn_ref):
    # key/value blocks: (BT, L, D) bf16; query block: (BT, L, D) f32
    # w*_ref: (D, D) bf16 (already w.T); b*/gamma/beta: (1, D) f32
    BT, L, D = key_ref.shape
    M = BT * L
    H = NUM_HEADS
    Dh = DIM_PER_HEAD

    # Flatten the batch tile into the matmul M dimension (sublane-only reshape).
    k2 = key_ref[...].reshape(M, D)                          # bf16
    v2 = value_ref[...].reshape(M, D)                        # bf16
    q2 = query_ref[...].reshape(M, D).astype(jnp.bfloat16)   # bf16 copy for the matmul

    # --- full-width QKV projections: (M,256) x (256,256), bf16 in, f32 accumulate ---
    kp = jnp.dot(k2, wk_ref[...], preferred_element_type=jnp.float32) + bk_ref[...]
    vp = jnp.dot(v2, wv_ref[...], preferred_element_type=jnp.float32) + bv_ref[...]
    qp = jnp.dot(q2, wq_ref[...], preferred_element_type=jnp.float32) + bq_ref[...]

    # --- per-head scaled dot-product attention (H = 4, fully unrolled) ---
    ctx_parts = []
    for h in range(H):
        sl = slice(h * Dh, (h + 1) * Dh)     # 64-lane head view, only for tiny einsums
        qh = qp[:, sl].reshape(BT, L, Dh).astype(jnp.bfloat16)
        kh = kp[:, sl].reshape(BT, L, Dh).astype(jnp.bfloat16)
        vh = vp[:, sl].reshape(BT, L, Dh).astype(jnp.bfloat16)

        s = jnp.einsum('bld,bmd->blm', qh, kh,
                       preferred_element_type=jnp.float32) * SCALE
        s = s - jnp.max(s, axis=-1, keepdims=True)
        e = jnp.exp(s)
        a = e * pl.reciprocal(jnp.sum(e, axis=-1, keepdims=True), approx=True)

        attn_ref[:, h, :, :] = a             # dense (BT, L, L) tile store per head

        c = jnp.einsum('blm,bmd->bld', a.astype(jnp.bfloat16), vh,
                       preferred_element_type=jnp.float32)   # (BT, L, Dh)
        ctx_parts.append(c.reshape(M, Dh))

    # --- final linear: heads concatenated along lanes -> one (M,256)x(256,256) matmul ---
    ctx = jnp.concatenate(ctx_parts, axis=-1).astype(jnp.bfloat16)   # (M, H*Dh)
    out_lin = jnp.dot(ctx, wf_ref[...], preferred_element_type=jnp.float32) + bf_ref[...]

    # --- residual (re-read f32 query from the resident VMEM block) + LayerNorm ---
    x = query_ref[...].reshape(M, D) + out_lin
    mean = jnp.mean(x, axis=-1, keepdims=True)
    var = jnp.mean((x - mean) ** 2, axis=-1, keepdims=True)
    xn = (x - mean) * jax.lax.rsqrt(var + LN_EPS)
    y = xn * gamma_ref[...] + beta_ref[...]
    out_ref[...] = y.reshape(BT, L, D)


def _full_spec(arr):
    nd = arr.ndim
    return pl.BlockSpec(arr.shape, lambda b, _nd=nd: (0,) * _nd)


@functools.partial(jax.jit, static_argnames=("b_tile",))
def multi_head_attention(key, value, query, prepped, b_tile=8):
    """key/value/query: (B, L, MODEL_DIM) f32 (B independent sequences).
    Returns ((B, L, MODEL_DIM) f32, (B, H, L, L) f32)."""
    (wk_t, bk, wv_t, bv, wq_t, bq, wf_t, bf, gamma, beta) = prepped
    B, L, D = query.shape
    H = NUM_HEADS
    b_tile = min(b_tile, B)
    assert B % b_tile == 0, "batch must be divisible by b_tile"

    # bf16 for the projection-only streams (halves their DMA); query stays f32.
    key_bf = key.astype(jnp.bfloat16)
    value_bf = value.astype(jnp.bfloat16)

    seq_spec = pl.BlockSpec((b_tile, L, D), lambda b: (b, 0, 0))
    weights = (wk_t, bk, wv_t, bv, wq_t, bq, wf_t, bf, gamma, beta)

    out, attn = pl.pallas_call(
        mha_kernel,
        grid=(B // b_tile,),
        out_shape=(
            jax.ShapeDtypeStruct((B, L, D), jnp.float32),
            jax.ShapeDtypeStruct((B, H, L, L), jnp.float32),
        ),
        in_specs=[seq_spec, seq_spec, seq_spec] + [_full_spec(w) for w in weights],
        out_specs=(
            pl.BlockSpec((b_tile, L, D), lambda b: (b, 0, 0)),
            pl.BlockSpec((b_tile, H, L, L), lambda b: (b, 0, 0, 0)),
        ),
        compiler_params=pltpu.CompilerParams(
            dimension_semantics=("parallel",),   # >=2 grid steps -> both TCs on v7x
        ),
    )(key_bf, value_bf, query, *weights)
    return out, attn


def init_params(seed=0):
    """Torch-layout params: linear weights (out, in), biases (out,), LN gamma/beta (D,)."""
    ks = jax.random.split(jax.random.PRNGKey(seed), 4)

    def linear(k):
        w = 0.02 * jax.random.normal(k, (MODEL_DIM, MODEL_DIM), jnp.float32)
        b = jnp.zeros((MODEL_DIM,), jnp.float32)
        return w, b

    wk, bk = linear(ks[0])
    wv, bv = linear(ks[1])
    wq, bq = linear(ks[2])
    wf, bf = linear(ks[3])
    gamma = jnp.ones((MODEL_DIM,), jnp.float32)
    beta = jnp.zeros((MODEL_DIM,), jnp.float32)
    return (wk, bk, wv, bv, wq, bq, wf, bf, gamma, beta)


def prepare_params(params):
    """One-time (outside jit) re-layout: w.T bf16 slabs, (1, D) f32 biases / LN params."""
    wk, bk, wv, bv, wq, bq, wf, bf, gamma, beta = params
    t = lambda w: w.T.astype(jnp.bfloat16)                  # torch (out,in) -> (in,out)
    row = lambda v: v.reshape(1, MODEL_DIM).astype(jnp.float32)
    return (t(wk), row(bk), t(wv), row(bv), t(wq), row(bq), t(wf), row(bf),
            row(gamma), row(beta))


def reference(key, value, query, params):
    """Pure-JAX f32 reference mirroring the torch forward (v2) semantics, per sequence."""
    wk, bk, wv, bv, wq, bq, wf, bf, gamma, beta = params
    k = key @ wk.T + bk
    v = value @ wv.T + bv
    q = query @ wq.T + bq

    def split(x):  # (L, D) -> (H, L, Dh)
        return x.reshape(SEQ_LEN, NUM_HEADS, DIM_PER_HEAD).transpose(1, 0, 2)

    kh, vh, qh = split(k), split(v), split(q)
    scores = jnp.einsum('hld,hmd->hlm', qh, kh) * SCALE
    attn = jax.nn.softmax(scores, axis=-1)
    ctx = jnp.einsum('hlm,hmd->hld', attn, vh)
    ctx = ctx.transpose(1, 0, 2).reshape(SEQ_LEN, MODEL_DIM)
    out_lin = ctx @ wf.T + bf
    x = query + out_lin
    mean = x.mean(-1, keepdims=True)
    var = ((x - mean) ** 2).mean(-1, keepdims=True)
    xn = (x - mean) / jnp.sqrt(var + LN_EPS)
    return xn * gamma + beta, attn


if __name__ == "__main__":
    B = 16                       # 2 grid steps of b_tile=8 sequences (M = 128 rows/step)
    root = jax.random.PRNGKey(0)
    k1, k2, k3 = jax.random.split(root, 3)
    key = jax.random.normal(k1, (B, SEQ_LEN, MODEL_DIM), jnp.float32)
    value = jax.random.normal(k2, (B, SEQ_LEN, MODEL_DIM), jnp.float32)
    query = jax.random.normal(k3, (B, SEQ_LEN, MODEL_DIM), jnp.float32)

    params = init_params(0)
    prepped = prepare_params(params)

    out, attn = multi_head_attention(key, value, query, prepped, b_tile=8)
    jax.block_until_ready((out, attn))

    ref_out, ref_attn = jax.vmap(lambda k, v, q: reference(k, v, q, params))(key, value, query)
    assert out.shape == (B, SEQ_LEN, MODEL_DIM)
    assert attn.shape == (B, NUM_HEADS, SEQ_LEN, SEQ_LEN)
    assert jnp.allclose(out, ref_out, atol=2e-2, rtol=2e-2)
    assert jnp.allclose(attn, ref_attn, atol=2e-2, rtol=2e-2)

    print("KERNEL_OK")
</pallas_src>

<mosaic_0001>
module attributes {stable_mosaic.version = 11 : i64} {
  func.func @mha_kernel(%arg0: i32, %arg1: memref<8x16x256xbf16, #tpu.memory_space<vmem>>, %arg2: memref<8x16x256xbf16, #tpu.memory_space<vmem>>, %arg3: memref<8x16x256xf32, #tpu.memory_space<vmem>>, %arg4: memref<256x256xbf16, #tpu.memory_space<vmem>>, %arg5: memref<1x256xf32, #tpu.memory_space<vmem>>, %arg6: memref<256x256xbf16, #tpu.memory_space<vmem>>, %arg7: memref<1x256xf32, #tpu.memory_space<vmem>>, %arg8: memref<256x256xbf16, #tpu.memory_space<vmem>>, %arg9: memref<1x256xf32, #tpu.memory_space<vmem>>, %arg10: memref<256x256xbf16, #tpu.memory_space<vmem>>, %arg11: memref<1x256xf32, #tpu.memory_space<vmem>>, %arg12: memref<1x256xf32, #tpu.memory_space<vmem>>, %arg13: memref<1x256xf32, #tpu.memory_space<vmem>>, %arg14: memref<8x16x256xf32, #tpu.memory_space<vmem>>, %arg15: memref<8x4x16x16xf32, #tpu.memory_space<vmem>>) attributes {dimension_semantics = [#tpu.dimension_semantics<parallel>], iteration_bounds = array<i64: 2>, scalar_prefetch = 0 : i64, scratch_operands = 0 : i64, tpu.core_type = #tpu.core_type<tc>, window_params = [{transform_indices = @transform_0, window_bounds = array<i64: 8, 16, 256>}, {transform_indices = @transform_1, window_bounds = array<i64: 8, 16, 256>}, {transform_indices = @transform_2, window_bounds = array<i64: 8, 16, 256>}, {pipeline_mode = #tpu.pipeline_mode<synchronous>, transform_indices = @transform_3, window_bounds = array<i64: 256, 256>}, {pipeline_mode = #tpu.pipeline_mode<synchronous>, transform_indices = @transform_4, window_bounds = array<i64: 1, 256>}, {pipeline_mode = #tpu.pipeline_mode<synchronous>, transform_indices = @transform_5, window_bounds = array<i64: 256, 256>}, {pipeline_mode = #tpu.pipeline_mode<synchronous>, transform_indices = @transform_6, window_bounds = array<i64: 1, 256>}, {pipeline_mode = #tpu.pipeline_mode<synchronous>, transform_indices = @transform_7, window_bounds = array<i64: 256, 256>}, {pipeline_mode = #tpu.pipeline_mode<synchronous>, transform_indices = @transform_8, window_bounds = array<i64: 1, 256>}, {pipeline_mode = #tpu.pipeline_mode<synchronous>, transform_indices = @transform_9, window_bounds = array<i64: 256, 256>}, {pipeline_mode = #tpu.pipeline_mode<synchronous>, transform_indices = @transform_10, window_bounds = array<i64: 1, 256>}, {pipeline_mode = #tpu.pipeline_mode<synchronous>, transform_indices = @transform_11, window_bounds = array<i64: 1, 256>}, {pipeline_mode = #tpu.pipeline_mode<synchronous>, transform_indices = @transform_12, window_bounds = array<i64: 1, 256>}, {transform_indices = @transform_13, window_bounds = array<i64: 8, 16, 256>}, {transform_indices = @transform_14, window_bounds = array<i64: 8, 4, 16, 16>}]} {
    %c0 = arith.constant 0 : index
    %c0_0 = arith.constant 0 : index
    %c0_1 = arith.constant 0 : index
    %0 = vector.load %arg1[%c0, %c0_0, %c0_1] : memref<8x16x256xbf16, #tpu.memory_space<vmem>>, vector<8x16x256xbf16>
    %1 = vector.shape_cast %0 : vector<8x16x256xbf16> to vector<128x256xbf16>
    %c0_2 = arith.constant 0 : index
    %c0_3 = arith.constant 0 : index
    %c0_4 = arith.constant 0 : index
    %2 = vector.load %arg2[%c0_2, %c0_3, %c0_4] : memref<8x16x256xbf16, #tpu.memory_space<vmem>>, vector<8x16x256xbf16>
    %3 = vector.shape_cast %2 : vector<8x16x256xbf16> to vector<128x256xbf16>
    %c0_5 = arith.constant 0 : index
    %c0_6 = arith.constant 0 : index
    %c0_7 = arith.constant 0 : index
    %4 = vector.load %arg3[%c0_5, %c0_6, %c0_7] : memref<8x16x256xf32, #tpu.memory_space<vmem>>, vector<8x16x256xf32>
    %5 = vector.shape_cast %4 : vector<8x16x256xf32> to vector<128x256xf32>
    %6 = arith.truncf %5 : vector<128x256xf32> to vector<128x256xbf16>
    %c0_8 = arith.constant 0 : index
    %c0_9 = arith.constant 0 : index
    %7 = vector.load %arg4[%c0_8, %c0_9] : memref<256x256xbf16, #tpu.memory_space<vmem>>, vector<256x256xbf16>
    %cst = arith.constant dense<0.000000e+00> : vector<128x256xf32>
    %8 = tpu.matmul %1, %7, %cst {dimension_numbers = #tpu.dot_dimension_numbers<[1], [0], [0], [1], [0, 0, 1, 1], [], []>} : vector<128x256xbf16>, vector<256x256xbf16>, vector<128x256xf32> -> vector<128x256xf32>
    %c0_10 = arith.constant 0 : index
    %c0_11 = arith.constant 0 : index
    %9 = vector.load %arg5[%c0_10, %c0_11] : memref<1x256xf32, #tpu.memory_space<vmem>>, vector<1x256xf32>
    %10 = vector.broadcast %9 : vector<1x256xf32> to vector<128x256xf32>
    %11 = arith.addf %8, %10 : vector<128x256xf32>
    %c0_12 = arith.constant 0 : index
    %c0_13 = arith.constant 0 : index
    %12 = vector.load %arg6[%c0_12, %c0_13] : memref<256x256xbf16, #tpu.memory_space<vmem>>, vector<256x256xbf16>
    %cst_14 = arith.constant dense<0.000000e+00> : vector<128x256xf32>
    %13 = tpu.matmul %3, %12, %cst_14 {dimension_numbers = #tpu.dot_dimension_numbers<[1], [0], [0], [1], [0, 0, 1, 1], [], []>} : vector<128x256xbf16>, vector<256x256xbf16>, vector<128x256xf32> -> vector<128x256xf32>
    %c0_15 = arith.constant 0 : index
    %c0_16 = arith.constant 0 : index
    %14 = vector.load %arg7[%c0_15, %c0_16] : memref<1x256xf32, #tpu.memory_space<vmem>>, vector<1x256xf32>
    %15 = vector.broadcast %14 : vector<1x256xf32> to vector<128x256xf32>
    %16 = arith.addf %13, %15 : vector<128x256xf32>
    %c0_17 = arith.constant 0 : index
    %c0_18 = arith.constant 0 : index
    %17 = vector.load %arg8[%c0_17, %c0_18] : memref<256x256xbf16, #tpu.memory_space<vmem>>, vector<256x256xbf16>
    %cst_19 = arith.constant dense<0.000000e+00> : vector<128x256xf32>
    %18 = tpu.matmul %6, %17, %cst_19 {dimension_numbers = #tpu.dot_dimension_numbers<[1], [0], [0], [1], [0, 0, 1, 1], [], []>} : vector<128x256xbf16>, vector<256x256xbf16>, vector<128x256xf32> -> vector<128x256xf32>
    %c0_20 = arith.constant 0 : index
    %c0_21 = arith.constant 0 : index
    %19 = vector.load %arg9[%c0_20, %c0_21] : memref<1x256xf32, #tpu.memory_space<vmem>>, vector<1x256xf32>
    %20 = vector.broadcast %19 : vector<1x256xf32> to vector<128x256xf32>
    %21 = arith.addf %18, %20 : vector<128x256xf32>
    %22 = vector.extract_strided_slice %21 {offsets = [0, 0], sizes = [128, 64], strides = [1, 1]} : vector<128x256xf32> to vector<128x64xf32>
    %23 = vector.shape_cast %22 : vector<128x64xf32> to vector<8x16x64xf32>
    %24 = arith.truncf %23 : vector<8x16x64xf32> to vector<8x16x64xbf16>
    %25 = vector.extract_strided_slice %11 {offsets = [0, 0], sizes = [128, 64], strides = [1, 1]} : vector<128x256xf32> to vector<128x64xf32>
    %26 = vector.shape_cast %25 : vector<128x64xf32> to vector<8x16x64xf32>
    %27 = arith.truncf %26 : vector<8x16x64xf32> to vector<8x16x64xbf16>
    %28 = vector.extract_strided_slice %16 {offsets = [0, 0], sizes = [128, 64], strides = [1, 1]} : vector<128x256xf32> to vector<128x64xf32>
    %29 = vector.shape_cast %28 : vector<128x64xf32> to vector<8x16x64xf32>
    %30 = arith.truncf %29 : vector<8x16x64xf32> to vector<8x16x64xbf16>
    "tpu.trace_start"() <{level = 10 : i32, message = "bld,bmd->blm"}> : () -> ()
    %cst_22 = arith.constant dense<0.000000e+00> : vector<8x16x16xf32>
    %31 = tpu.matmul %24, %27, %cst_22 {dimension_numbers = #tpu.dot_dimension_numbers<[2], [2], [1], [1], [0, 0, 0, 1, 1, 1], [0], [0]>} : vector<8x16x64xbf16>, vector<8x16x64xbf16>, vector<8x16x16xf32> -> vector<8x16x16xf32>
    "tpu.trace_stop"() : () -> ()
    %cst_23 = arith.constant 2.500000e-01 : f32
    %32 = vector.broadcast %cst_23 : f32 to vector<8x16x16xf32>
    %33 = arith.mulf %31, %32 : vector<8x16x16xf32>
    %cst_24 = arith.constant dense<0xFF800000> : vector<8x16xf32>
    %34 = vector.multi_reduction <maximumf>, %33, %cst_24 [2] : vector<8x16x16xf32> to vector<8x16xf32>
    %35 = vector.shape_cast %34 : vector<8x16xf32> to vector<8x16x1xf32>
    %36 = vector.broadcast %35 : vector<8x16x1xf32> to vector<8x16x16xf32>
    %37 = arith.subf %33, %36 : vector<8x16x16xf32>
    %38 = math.exp %37 : vector<8x16x16xf32>
    %cst_25 = arith.constant dense<0.000000e+00> : vector<8x16xf32>
    %39 = vector.multi_reduction <add>, %38, %cst_25 [2] : vector<8x16x16xf32> to vector<8x16xf32>
    %40 = vector.shape_cast %39 : vector<8x16xf32> to vector<8x16x1xf32>
    %41 = tpu.reciprocal %40 {approx = true} : vector<8x16x1xf32> -> vector<8x16x1xf32>
    %42 = vector.broadcast %41 : vector<8x16x1xf32> to vector<8x16x16xf32>
    %43 = arith.mulf %38, %42 : vector<8x16x16xf32>
    %c0_26 = arith.constant 0 : index
    %c0_27 = arith.constant 0 : index
    %c0_28 = arith.constant 0 : index
    %c0_29 = arith.constant 0 : index
    %44 = vector.load %arg15[%c0_26, %c0_27, %c0_28, %c0_29] : memref<8x4x16x16xf32, #tpu.memory_space<vmem>>, vector<8x1x16x16xf32>
    %45 = vector.shape_cast %44 : vector<8x1x16x16xf32> to vector<8x16x16xf32>
    %46 = vector.shape_cast %43 : vector<8x16x16xf32> to vector<8x1x16x16xf32>
    tpu.vector_store %arg15[%c0_26, %c0_27, %c0_28, %c0_29], %46 {strides = array<i32>} : memref<8x4x16x16xf32, #tpu.memory_space<vmem>>, vector<8x1x16x16xf32>,
    %47 = arith.truncf %43 : vector<8x16x16xf32> to vector<8x16x16xbf16>
    "tpu.trace_start"() <{level = 10 : i32, message = "blm,bmd->bld"}> : () -> ()
    %cst_30 = arith.constant dense<0.000000e+00> : vector<8x16x64xf32>
    %48 = tpu.matmul %47, %30, %cst_30 {dimension_numbers = #tpu.dot_dimension_numbers<[2], [1], [1], [2], [0, 0, 0, 1, 1, 2], [0], [0]>} : vector<8x16x16xbf16>, vector<8x16x64xbf16>, vector<8x16x64xf32> -> vector<8x16x64xf32>
    "tpu.trace_stop"() : () -> ()
    %49 = vector.shape_cast %48 : vector<8x16x64xf32> to vector<128x64xf32>
    %50 = vector.extract_strided_slice %21 {offsets = [0, 64], sizes = [128, 64], strides = [1, 1]} : vector<128x256xf32> to vector<128x64xf32>
    %51 = vector.shape_cast %50 : vector<128x64xf32> to vector<8x16x64xf32>
    %52 = arith.truncf %51 : vector<8x16x64xf32> to vector<8x16x64xbf16>
    %53 = vector.extract_strided_slice %11 {offsets = [0, 64], sizes = [128, 64], strides = [1, 1]} : vector<128x256xf32> to vector<128x64xf32>
    %54 = vector.shape_cast %53 : vector<128x64xf32> to vector<8x16x64xf32>
    %55 = arith.truncf %54 : vector<8x16x64xf32> to vector<8x16x64xbf16>
    %56 = vector.extract_strided_slice %16 {offsets = [0, 64], sizes = [128, 64], strides = [1, 1]} : vector<128x256xf32> to vector<128x64xf32>
    %57 = vector.shape_cast %56 : vector<128x64xf32> to vector<8x16x64xf32>
    %58 = arith.truncf %57 : vector<8x16x64xf32> to vector<8x16x64xbf16>
    "tpu.trace_start"() <{level = 10 : i32, message = "bld,bmd->blm"}> : () -> ()
    %cst_31 = arith.constant dense<0.000000e+00> : vector<8x16x16xf32>
    %59 = tpu.matmul %52, %55, %cst_31 {dimension_numbers = #tpu.dot_dimension_numbers<[2], [2], [1], [1], [0, 0, 0, 1, 1, 1], [0], [0]>} : vector<8x16x64xbf16>, vector<8x16x64xbf16>, vector<8x16x16xf32> -> vector<8x16x16xf32>
    "tpu.trace_stop"() : () -> ()
    %cst_32 = arith.constant 2.500000e-01 : f32
    %60 = vector.broadcast %cst_32 : f32 to vector<8x16x16xf32>
    %61 = arith.mulf %59, %60 : vector<8x16x16xf32>
    %cst_33 = arith.constant dense<0xFF800000> : vector<8x16xf32>
    %62 = vector.multi_reduction <maximumf>, %61, %cst_33 [2] : vector<8x16x16xf32> to vector<8x16xf32>
    %63 = vector.shape_cast %62 : vector<8x16xf32> to vector<8x16x1xf32>
    %64 = vector.broadcast %63 : vector<8x16x1xf32> to vector<8x16x16xf32>
    %65 = arith.subf %61, %64 : vector<8x16x16xf32>
    %66 = math.exp %65 : vector<8x16x16xf32>
    %cst_34 = arith.constant dense<0.000000e+00> : vector<8x16xf32>
    %67 = vector.multi_reduction <add>, %66, %cst_34 [2] : vector<8x16x16xf32> to vector<8x16xf32>
    %68 = vector.shape_cast %67 : vector<8x16xf32> to vector<8x16x1xf32>
    %69 = tpu.reciprocal %68 {approx = true} : vector<8x16x1xf32> -> vector<8x16x1xf32>
    %70 = vector.broadcast %69 : vector<8x16x1xf32> to vector<8x16x16xf32>
    %71 = arith.mulf %66, %70 : vector<8x16x16xf32>
    %c0_35 = arith.constant 0 : index
    %c1 = arith.constant 1 : index
    %c0_36 = arith.constant 0 : index
    %c0_37 = arith.constant 0 : index
    %72 = vector.load %arg15[%c0_35, %c1, %c0_36, %c0_37] : memref<8x4x16x16xf32, #tpu.memory_space<vmem>>, vector<8x1x16x16xf32>
    %73 = vector.shape_cast %72 : vector<8x1x16x16xf32> to vector<8x16x16xf32>
    %74 = vector.shape_cast %71 : vector<8x16x16xf32> to vector<8x1x16x16xf32>
    tpu.vector_store %arg15[%c0_35, %c1, %c0_36, %c0_37], %74 {strides = array<i32>} : memref<8x4x16x16xf32, #tpu.memory_space<vmem>>, vector<8x1x16x16xf32>,
    %75 = arith.truncf %71 : vector<8x16x16xf32> to vector<8x16x16xbf16>
    "tpu.trace_start"() <{level = 10 : i32, message = "blm,bmd->bld"}> : () -> ()
    %cst_38 = arith.constant dense<0.000000e+00> : vector<8x16x64xf32>
    %76 = tpu.matmul %75, %58, %cst_38 {dimension_numbers = #tpu.dot_dimension_numbers<[2], [1], [1], [2], [0, 0, 0, 1, 1, 2], [0], [0]>} : vector<8x16x16xbf16>, vector<8x16x64xbf16>, vector<8x16x64xf32> -> vector<8x16x64xf32>
    "tpu.trace_stop"() : () -> ()
    %77 = vector.shape_cast %76 : vector<8x16x64xf32> to vector<128x64xf32>
    %78 = vector.extract_strided_slice %21 {offsets = [0, 128], sizes = [128, 64], strides = [1, 1]} : vector<128x256xf32> to vector<128x64xf32>
    %79 = vector.shape_cast %78 : vector<128x64xf32> to vector<8x16x64xf32>
    %80 = arith.truncf %79 : vector<8x16x64xf32> to vector<8x16x64xbf16>
    %81 = vector.extract_strided_slice %11 {offsets = [0, 128], sizes = [128, 64], strides = [1, 1]} : vector<128x256xf32> to vector<128x64xf32>
    %82 = vector.shape_cast %81 : vector<128x64xf32> to vector<8x16x64xf32>
    %83 = arith.truncf %82 : vector<8x16x64xf32> to vector<8x16x64xbf16>
    %84 = vector.extract_strided_slice %16 {offsets = [0, 128], sizes = [128, 64], strides = [1, 1]} : vector<128x256xf32> to vector<128x64xf32>
    %85 = vector.shape_cast %84 : vector<128x64xf32> to vector<8x16x64xf32>
    %86 = arith.truncf %85 : vector<8x16x64xf32> to vector<8x16x64xbf16>
    "tpu.trace_start"() <{level = 10 : i32, message = "bld,bmd->blm"}> : () -> ()
    %cst_39 = arith.constant dense<0.000000e+00> : vector<8x16x16xf32>
    %87 = tpu.matmul %80, %83, %cst_39 {dimension_numbers = #tpu.dot_dimension_numbers<[2], [2], [1], [1], [0, 0, 0, 1, 1, 1], [0], [0]>} : vector<8x16x64xbf16>, vector<8x16x64xbf16>, vector<8x16x16xf32> -> vector<8x16x16xf32>
    "tpu.trace_stop"() : () -> ()
    %cst_40 = arith.constant 2.500000e-01 : f32
    %88 = vector.broadcast %cst_40 : f32 to vector<8x16x16xf32>
    %89 = arith.mulf %87, %88 : vector<8x16x16xf32>
    %cst_41 = arith.constant dense<0xFF800000> : vector<8x16xf32>
    %90 = vector.multi_reduction <maximumf>, %89, %cst_41 [2] : vector<8x16x16xf32> to vector<8x16xf32>
    %91 = vector.shape_cast %90 : vector<8x16xf32> to vector<8x16x1xf32>
    %92 = vector.broadcast %91 : vector<8x16x1xf32> to vector<8x16x16xf32>
    %93 = arith.subf %89, %92 : vector<8x16x16xf32>
    %94 = math.exp %93 : vector<8x16x16xf32>
    %cst_42 = arith.constant dense<0.000000e+00> : vector<8x16xf32>
    %95 = vector.multi_reduction <add>, %94, %cst_42 [2] : vector<8x16x16xf32> to vector<8x16xf32>
    %96 = vector.shape_cast %95 : vector<8x16xf32> to vector<8x16x1xf32>
    %97 = tpu.reciprocal %96 {approx = true} : vector<8x16x1xf32> -> vector<8x16x1xf32>
    %98 = vector.broadcast %97 : vector<8x16x1xf32> to vector<8x16x16xf32>
    %99 = arith.mulf %94, %98 : vector<8x16x16xf32>
    %c0_43 = arith.constant 0 : index
    %c2 = arith.constant 2 : index
    %c0_44 = arith.constant 0 : index
    %c0_45 = arith.constant 0 : index
    %100 = vector.load %arg15[%c0_43, %c2, %c0_44, %c0_45] : memref<8x4x16x16xf32, #tpu.memory_space<vmem>>, vector<8x1x16x16xf32>
    %101 = vector.shape_cast %100 : vector<8x1x16x16xf32> to vector<8x16x16xf32>
    %102 = vector.shape_cast %99 : vector<8x16x16xf32> to vector<8x1x16x16xf32>
    tpu.vector_store %arg15[%c0_43, %c2, %c0_44, %c0_45], %102 {strides = array<i32>} : memref<8x4x16x16xf32, #tpu.memory_space<vmem>>, vector<8x1x16x16xf32>,
    %103 = arith.truncf %99 : vector<8x16x16xf32> to vector<8x16x16xbf16>
    "tpu.trace_start"() <{level = 10 : i32, message = "blm,bmd->bld"}> : () -> ()
    %cst_46 = arith.constant dense<0.000000e+00> : vector<8x16x64xf32>
    %104 = tpu.matmul %103, %86, %cst_46 {dimension_numbers = #tpu.dot_dimension_numbers<[2], [1], [1], [2], [0, 0, 0, 1, 1, 2], [0], [0]>} : vector<8x16x16xbf16>, vector<8x16x64xbf16>, vector<8x16x64xf32> -> vector<8x16x64xf32>
    "tpu.trace_stop"() : () -> ()
    %105 = vector.shape_cast %104 : vector<8x16x64xf32> to vector<128x64xf32>
    %106 = vector.extract_strided_slice %21 {offsets = [0, 192], sizes = [128, 64], strides = [1, 1]} : vector<128x256xf32> to vector<128x64xf32>
    %107 = vector.shape_cast %106 : vector<128x64xf32> to vector<8x16x64xf32>
    %108 = arith.truncf %107 : vector<8x16x64xf32> to vector<8x16x64xbf16>
    %109 = vector.extract_strided_slice %11 {offsets = [0, 192], sizes = [128, 64], strides = [1, 1]} : vector<128x256xf32> to vector<128x64xf32>
    %110 = vector.shape_cast %109 : vector<128x64xf32> to vector<8x16x64xf32>
    %111 = arith.truncf %110 : vector<8x16x64xf32> to vector<8x16x64xbf16>
    %112 = vector.extract_strided_slice %16 {offsets = [0, 192], sizes = [128, 64], strides = [1, 1]} : vector<128x256xf32> to vector<128x64xf32>
    %113 = vector.shape_cast %112 : vector<128x64xf32> to vector<8x16x64xf32>
    %114 = arith.truncf %113 : vector<8x16x64xf32> to vector<8x16x64xbf16>
    "tpu.trace_start"() <{level = 10 : i32, message = "bld,bmd->blm"}> : () -> ()
    %cst_47 = arith.constant dense<0.000000e+00> : vector<8x16x16xf32>
    %115 = tpu.matmul %108, %111, %cst_47 {dimension_numbers = #tpu.dot_dimension_numbers<[2], [2], [1], [1], [0, 0, 0, 1, 1, 1], [0], [0]>} : vector<8x16x64xbf16>, vector<8x16x64xbf16>, vector<8x16x16xf32> -> vector<8x16x16xf32>
    "tpu.trace_stop"() : () -> ()
    %cst_48 = arith.constant 2.500000e-01 : f32
    %116 = vector.broadcast %cst_48 : f32 to vector<8x16x16xf32>
    %117 = arith.mulf %115, %116 : vector<8x16x16xf32>
    %cst_49 = arith.constant dense<0xFF800000> : vector<8x16xf32>
    %118 = vector.multi_reduction <maximumf>, %117, %cst_49 [2] : vector<8x16x16xf32> to vector<8x16xf32>
    %119 = vector.shape_cast %118 : vector<8x16xf32> to vector<8x16x1xf32>
    %120 = vector.broadcast %119 : vector<8x16x1xf32> to vector<8x16x16xf32>
    %121 = arith.subf %117, %120 : vector<8x16x16xf32>
    %122 = math.exp %121 : vector<8x16x16xf32>
    %cst_50 = arith.constant dense<0.000000e+00> : vector<8x16xf32>
    %123 = vector.multi_reduction <add>, %122, %cst_50 [2] : vector<8x16x16xf32> to vector<8x16xf32>
    %124 = vector.shape_cast %123 : vector<8x16xf32> to vector<8x16x1xf32>
    %125 = tpu.reciprocal %124 {approx = true} : vector<8x16x1xf32> -> vector<8x16x1xf32>
    %126 = vector.broadcast %125 : vector<8x16x1xf32> to vector<8x16x16xf32>
    %127 = arith.mulf %122, %126 : vector<8x16x16xf32>
    %c0_51 = arith.constant 0 : index
    %c3 = arith.constant 3 : index
    %c0_52 = arith.constant 0 : index
    %c0_53 = arith.constant 0 : index
    %128 = vector.load %arg15[%c0_51, %c3, %c0_52, %c0_53] : memref<8x4x16x16xf32, #tpu.memory_space<vmem>>, vector<8x1x16x16xf32>
    %129 = vector.shape_cast %128 : vector<8x1x16x16xf32> to vector<8x16x16xf32>
    %130 = vector.shape_cast %127 : vector<8x16x16xf32> to vector<8x1x16x16xf32>
    tpu.vector_store %arg15[%c0_51, %c3, %c0_52, %c0_53], %130 {strides = array<i32>} : memref<8x4x16x16xf32, #tpu.memory_space<vmem>>, vector<8x1x16x16xf32>,
    %131 = arith.truncf %127 : vector<8x16x16xf32> to vector<8x16x16xbf16>
    "tpu.trace_start"() <{level = 10 : i32, message = "blm,bmd->bld"}> : () -> ()
    %cst_54 = arith.constant dense<0.000000e+00> : vector<8x16x64xf32>
    %132 = tpu.matmul %131, %114, %cst_54 {dimension_numbers = #tpu.dot_dimension_numbers<[2], [1], [1], [2], [0, 0, 0, 1, 1, 2], [0], [0]>} : vector<8x16x16xbf16>, vector<8x16x64xbf16>, vector<8x16x64xf32> -> vector<8x16x64xf32>
    "tpu.trace_stop"() : () -> ()
    %133 = vector.shape_cast %132 : vector<8x16x64xf32> to vector<128x64xf32>
    %134 = tpu.concatenate %49, %77, %105, %133 in 1 : vector<128x64xf32>, vector<128x64xf32>, vector<128x64xf32>, vector<128x64xf32> -> vector<128x256xf32>
    %135 = arith.truncf %134 : vector<128x256xf32> to vector<128x256xbf16>
    %c0_55 = arith.constant 0 : index
    %c0_56 = arith.constant 0 : index
    %136 = vector.load %arg10[%c0_55, %c0_56] : memref<256x256xbf16, #tpu.memory_space<vmem>>, vector<256x256xbf16>
    %cst_57 = arith.constant dense<0.000000e+00> : vector<128x256xf32>
    %137 = tpu.matmul %135, %136, %cst_57 {dimension_numbers = #tpu.dot_dimension_numbers<[1], [0], [0], [1], [0, 0, 1, 1], [], []>} : vector<128x256xbf16>, vector<256x256xbf16>, vector<128x256xf32> -> vector<128x256xf32>
    %c0_58 = arith.constant 0 : index
    %c0_59 = arith.constant 0 : index
    %138 = vector.load %arg11[%c0_58, %c0_59] : memref<1x256xf32, #tpu.memory_space<vmem>>, vector<1x256xf32>
    %139 = vector.broadcast %138 : vector<1x256xf32> to vector<128x256xf32>
    %140 = arith.addf %137, %139 : vector<128x256xf32>
    %c0_60 = arith.constant 0 : index
    %c0_61 = arith.constant 0 : index
    %c0_62 = arith.constant 0 : index
    %141 = vector.load %arg3[%c0_60, %c0_61, %c0_62] : memref<8x16x256xf32, #tpu.memory_space<vmem>>, vector<8x16x256xf32>
    %142 = vector.shape_cast %141 : vector<8x16x256xf32> to vector<128x256xf32>
    %143 = arith.addf %142, %140 : vector<128x256xf32>
    %cst_63 = arith.constant dense<0.000000e+00> : vector<128xf32>
    %144 = vector.multi_reduction <add>, %143, %cst_63 [1] : vector<128x256xf32> to vector<128xf32>
    %145 = vector.shape_cast %144 : vector<128xf32> to vector<128x1xf32>
    %cst_64 = arith.constant 2.560000e+02 : f32
    %146 = vector.broadcast %cst_64 : f32 to vector<128x1xf32>
    %147 = arith.divf %145, %146 : vector<128x1xf32>
    %148 = vector.broadcast %147 : vector<128x1xf32> to vector<128x256xf32>
    %149 = arith.subf %143, %148 : vector<128x256xf32>
    %150 = arith.mulf %149, %149 : vector<128x256xf32>
    %cst_65 = arith.constant dense<0.000000e+00> : vector<128xf32>
    %151 = vector.multi_reduction <add>, %150, %cst_65 [1] : vector<128x256xf32> to vector<128xf32>
    %152 = vector.shape_cast %151 : vector<128xf32> to vector<128x1xf32>
    %cst_66 = arith.constant 2.560000e+02 : f32
    %153 = vector.broadcast %cst_66 : f32 to vector<128x1xf32>
    %154 = arith.divf %152, %153 : vector<128x1xf32>
    %155 = vector.broadcast %147 : vector<128x1xf32> to vector<128x256xf32>
    %156 = arith.subf %143, %155 : vector<128x256xf32>
    %cst_67 = arith.constant 9.99999974E-6 : f32
    %157 = vector.broadcast %cst_67 : f32 to vector<128x1xf32>
    %158 = arith.addf %154, %157 : vector<128x1xf32>
    %159 = math.rsqrt %158 : vector<128x1xf32>
    %160 = vector.broadcast %159 : vector<128x1xf32> to vector<128x256xf32>
    %161 = arith.mulf %156, %160 : vector<128x256xf32>
    %c0_68 = arith.constant 0 : index
    %c0_69 = arith.constant 0 : index
    %162 = vector.load %arg12[%c0_68, %c0_69] : memref<1x256xf32, #tpu.memory_space<vmem>>, vector<1x256xf32>
    %163 = vector.broadcast %162 : vector<1x256xf32> to vector<128x256xf32>
    %164 = arith.mulf %161, %163 : vector<128x256xf32>
    %c0_70 = arith.constant 0 : index
    %c0_71 = arith.constant 0 : index
    %165 = vector.load %arg13[%c0_70, %c0_71] : memref<1x256xf32, #tpu.memory_space<vmem>>, vector<1x256xf32>
    %166 = vector.broadcast %165 : vector<1x256xf32> to vector<128x256xf32>
    %167 = arith.addf %164, %166 : vector<128x256xf32>
    %168 = vector.shape_cast %167 : vector<128x256xf32> to vector<8x16x256xf32>
    %c0_72 = arith.constant 0 : index
    %c0_73 = arith.constant 0 : index
    %c0_74 = arith.constant 0 : index
    %169 = vector.load %arg14[%c0_72, %c0_73, %c0_74] : memref<8x16x256xf32, #tpu.memory_space<vmem>>, vector<8x16x256xf32>
    tpu.vector_store %arg14[%c0_72, %c0_73, %c0_74], %168 {strides = array<i32>} : memref<8x16x256xf32, #tpu.memory_space<vmem>>, vector<8x16x256xf32>,
    return
  }
  func.func @transform_0(%arg0: i32) -> (i32, i32, i32) {
    %c0_i32 = arith.constant 0 : i32
    %c0_i32_0 = arith.constant 0 : i32
    %c0_i32_1 = arith.constant 0 : i32
    return %arg0, %c0_i32, %c0_i32_0 : i32, i32, i32
  }
  func.func @transform_1(%arg0: i32) -> (i32, i32, i32) {
    %c0_i32 = arith.constant 0 : i32
    %c0_i32_0 = arith.constant 0 : i32
    %c0_i32_1 = arith.constant 0 : i32
    return %arg0, %c0_i32, %c0_i32_0 : i32, i32, i32
  }
  func.func @transform_2(%arg0: i32) -> (i32, i32, i32) {
    %c0_i32 = arith.constant 0 : i32
    %c0_i32_0 = arith.constant 0 : i32
    %c0_i32_1 = arith.constant 0 : i32
    return %arg0, %c0_i32, %c0_i32_0 : i32, i32, i32
  }
  func.func @transform_3(%arg0: i32) -> (i32, i32) {
    %c0_i32 = arith.constant 0 : i32
    %c0_i32_0 = arith.constant 0 : i32
    %c0_i32_1 = arith.constant 0 : i32
    return %c0_i32, %c0_i32_0 : i32, i32
  }
  func.func @transform_4(%arg0: i32) -> (i32, i32) {
    %c0_i32 = arith.constant 0 : i32
    %c0_i32_0 = arith.constant 0 : i32
    %c0_i32_1 = arith.constant 0 : i32
    return %c0_i32, %c0_i32_0 : i32, i32
  }
  func.func @transform_5(%arg0: i32) -> (i32, i32) {
    %c0_i32 = arith.constant 0 : i32
    %c0_i32_0 = arith.constant 0 : i32
    %c0_i32_1 = arith.constant 0 : i32
    return %c0_i32, %c0_i32_0 : i32, i32
  }
  func.func @transform_6(%arg0: i32) -> (i32, i32) {
    %c0_i32 = arith.constant 0 : i32
    %c0_i32_0 = arith.constant 0 : i32
    %c0_i32_1 = arith.constant 0 : i32
    return %c0_i32, %c0_i32_0 : i32, i32
  }
  func.func @transform_7(%arg0: i32) -> (i32, i32) {
    %c0_i32 = arith.constant 0 : i32
    %c0_i32_0 = arith.constant 0 : i32
    %c0_i32_1 = arith.constant 0 : i32
    return %c0_i32, %c0_i32_0 : i32, i32
  }
  func.func @transform_8(%arg0: i32) -> (i32, i32) {
    %c0_i32 = arith.constant 0 : i32
    %c0_i32_0 = arith.constant 0 : i32
    %c0_i32_1 = arith.constant 0 : i32
    return %c0_i32, %c0_i32_0 : i32, i32
  }
  func.func @transform_9(%arg0: i32) -> (i32, i32) {
    %c0_i32 = arith.constant 0 : i32
    %c0_i32_0 = arith.constant 0 : i32
    %c0_i32_1 = arith.constant 0 : i32
    return %c0_i32, %c0_i32_0 : i32, i32
  }
  func.func @transform_10(%arg0: i32) -> (i32, i32) {
    %c0_i32 = arith.constant 0 : i32
    %c0_i32_0 = arith.constant 0 : i32
    %c0_i32_1 = arith.constant 0 : i32
    return %c0_i32, %c0_i32_0 : i32, i32
  }
  func.func @transform_11(%arg0: i32) -> (i32, i32) {
    %c0_i32 = arith.constant 0 : i32
    %c0_i32_0 = arith.constant 0 : i32
    %c0_i32_1 = arith.constant 0 : i32
    return %c0_i32, %c0_i32_0 : i32, i32
  }
  func.func @transform_12(%arg0: i32) -> (i32, i32) {
    %c0_i32 = arith.constant 0 : i32
    %c0_i32_0 = arith.constant 0 : i32
    %c0_i32_1 = arith.constant 0 : i32
    return %c0_i32, %c0_i32_0 : i32, i32
  }
  func.func @transform_13(%arg0: i32) -> (i32, i32, i32) {
    %c0_i32 = arith.constant 0 : i32
    %c0_i32_0 = arith.constant 0 : i32
    %c0_i32_1 = arith.constant 0 : i32
    return %arg0, %c0_i32, %c0_i32_0 : i32, i32, i32
  }
  func.func @transform_14(%arg0: i32) -> (i32, i32, i32, i32) {
    %c0_i32 = arith.constant 0 : i32
    %c0_i32_0 = arith.constant 0 : i32
    %c0_i32_1 = arith.constant 0 : i32
    %c0_i32_2 = arith.constant 0 : i32
    return %arg0, %c0_i32, %c0_i32_0, %c0_i32_1 : i32, i32, i32, i32
  }
}

</mosaic_0001>

<bundles_post_ra>
// kernel: multi_head_attention.1
= control target key start
LH: loop header
LB: loop body
LE: loop exit
PB: predicated region body
PF: predicated region fallthrough
CT: control target
= control target key end

     0   :  { %s11302_s0 = inlined_call_operand.vmem [shape: bf16[16,16,256], index: 0, kind: input, shape index: {}]   ;;  %s11303_s1 = inlined_call_operand.vmem [shape: bf16[16,16,256], index: 1, kind: input, shape index: {}]   ;;  %s11304_s2 = inlined_call_operand.vmem [shape: f32[16,16,256], index: 2, kind: input, shape index: {}]   ;;  %s11305_s3 = inlined_call_operand.vmem [shape: bf16[256,256], index: 3, kind: input, shape index: {}]   ;;  %s11306_s4 = inlined_call_operand.vmem [shape: f32[1,256], index: 4, kind: input, shape index: {}]   ;;  %s11307_s5 = inlined_call_operand.vmem [shape: bf16[256,256], index: 5, kind: input, shape index: {}]   ;;  %s11308_s6 = inlined_call_operand.vmem [shape: f32[1,256], index: 6, kind: input, shape index: {}]   ;;  %s11309_s7 = inlined_call_operand.hbm [shape: bf16[256,256], index: 7, kind: input, shape index: {}]   ;;  %s11310_s8 = inlined_call_operand.vmem [shape: f32[1,256], index: 8, kind: input, shape index: {}]   ;;  %s11311_s9 = inlined_call_operand.hbm [shape: bf16[256,256], index: 9, kind: input, shape index: {}]   ;;  %s11312_s10 = inlined_call_operand.vmem [shape: f32[1,256], index: 10, kind: input, shape index: {}]   ;;  %s11313_s11 = inlined_call_operand.vmem [shape: f32[1,256], index: 11, kind: input, shape index: {}]   ;;  %s11314_s12 = inlined_call_operand.vmem [shape: f32[1,256], index: 12, kind: input, shape index: {}]   ;;  %s11315_s13 = inlined_call_operand.hbm [shape: f32[16,16,256], index: 13, kind: output, shape index: {0}]   ;;  %s11316_s14 = inlined_call_operand.hbm [shape: f32[16,4,16,16], index: 14, kind: output, shape index: {1}]  }
   0x1   :  { %11348 = sst [smem:[#allocation52_spill]] %s11315_s13 }
   0x2   :  { %11349 = sst [smem:[#allocation53_spill]] %s11316_s14 }
   0x3   :  { %20 = vsyncpa [#allocation3], 0 }
   0x4   :  { %21 = vsyncpa [#allocation6], 0 }
   0x5   :  { %22 = vsyncpa [#allocation4], 0 }
   0x6   :  { %24 = vsyncpa [#allocation4 + $0x1], 0 }
   0x7   :  { %25 = vsyncpa [#allocation9], 0 }
   0x8   :  { %27 = vsyncpa [#allocation9 + $0x1], 0  ;;  %s8606_s29 = smov 0   ;;  %s8608_s30 = smov 0  }
   0x9   :  { %s8610_s15 = smov 0   ;;  %s8612_s16 = smov 0  }
   0xa LB: > { %11350 = sst [smem:[#allocation14_spill]] %s8504_s29  ;;  %s8627_s17 = sadd.s32 4294967295, %s8516_s16   ;;  %s8516_s16 = sphi %s8612_s16, %s11451_s16   ;;  %s8512_s15 = sphi %s8610_s15, %s11453_s15   ;;  %s8508_s30 = sphi %s8608_s30, %s11455_s30   ;;  %s8504_s29 = sphi %s8606_s29, %s11454_s29  }
   0xb   : > { %11351 = sst [smem:[#allocation15_spill]] %s8512_s15  ;;  %s6856_s18 = sadd.s32 4294967294, %s8516_s16  }
   0xc   : > { %11352 = sst [smem:[#allocation16_spill]] %s8516_s16  ;;  %s8631_s19 = sadd.s32 1, %s8516_s16  }
   0xd   : > { %11353 = sst [smem:[#allocation17_spill]] %s8631_s19  ;;  %s328_s20 = sadd.s32 1, %s8512_s15 }
   0xe   : > { %s325_s21 = ssub.s32 %s8516_s16, %s8631_s19  ;;  %p338_p0 = scmp.ne.s32.totalorder %s8512_s15, %s8508_s30 }
   0xf   : > { %p326_p1 = scmp.eq.s32.totalorder %s325_s21, 0  ;;  %p339_p2 = scmp.eq.s32.totalorder %s8627_s17, 1 }
  0x10   : > { %p344_p3 = scmp.ne.s32.totalorder %s8508_s30, %s8504_s29  ;;  %p345_p4 = scmp.eq.s32.totalorder %s6856_s18, 1 }
  0x11   : > { %s8642_s22 = scalar_select %p326_p1, %s8512_s15, %s328_s20  }
  0x12   : > { %p8644_p5 = por %p339_p2, %p338_p0  ;;  %p8648_p6 = por %p345_p4, %p344_p3 }
  0x13   : > { %11354 = sst [smem:[#allocation18_spill]] %s8642_s22  ;;  %p6857_p7 = scmp.ge.s32.totalorder %s8516_s16, 1 }
  0x14   : > { %s11355_s23 = scalar_select %p8644_p5, 1, 0 }
  0x15   : > { %s11356_s24 = scalar_select %p8648_p6, 1, 0 }
  0x16   : > { %p378_p8 = scmp.lt.s32.totalorder %s8516_s16, 3  ;;  %p11322_p9 = scmp.eq.s32.totalorder %s8627_s17, 0 }
  0x17   : > { %11357 = sst [smem:[#allocation19_spill]] %s11356_s24  ;;  %s8518_s26 = smov [#allocation2]  }
  0x18   : > { %p8655_p10 = pnand %p6857_p7, %p378_p8  ;;  %s402_s27 = sshll.u32 %s8518_s26, 4  ;;  %s403_s27 = int_to_ptr.vmem [resolvable:$true] %s402_s27 }
  0x19   : > { %s8519_s18 = smov [#allocation5]   ;;  %s8358_s15 = scalar_lea.hbm %s11309_s7, 4096 }
  0x1a   : > { %s11358_s25 = scalar_select %p8655_p10, 1, 0 }
  0x1b   : > { %p7688_p11 = pneg %p8655_p10  ;;  %s418_s20 = sshll.u32 %s8519_s18, 4  ;;  %s8667_s20 = int_to_ptr.vmem [resolvable:$true] %s418_s20 }
  0x1c   : > { %p8359_p13 = scmp.ne.s32.totalorder %s11309_s7, %s8358_s15  ;;  %p8365_p3 = scmp.lt.u32.totalorder %s8358_s15, %s11309_s7 }
  0x1d   : > { %p8663_p12 = pnand %p11322_p9, %p7688_p11 }
  0x1f   : > { %p8360_p0 = pneg %p8663_p12 }
  0x21   : > { %p8361_p1 = pnand %p8360_p0, %p8359_p13 }
  0x23   : > { %p8362_p2 = pneg %p8361_p1 }
  0x25   : > { %p8367_p4 = pnand %p8365_p3, %p8362_p2 }
  0x27   : > { %8370 = shalt.err (!%p8367_p4)
}
  0x28   : > { %s8371_s18 = scalar_lea.vmem %s403_s27, 4096  ;;  %p8379_p9 = scmp.lt.s32.totalorder %s403_s27, %s403_s27 }
  0x29   : > { %p8372_p7 = scmp.ne.s32.totalorder %s403_s27, %s8371_s18  ;;  %p8380_p6 = scmp.lt.s32.totalorder %s8371_s18, %s8371_s18 }
  0x2b   : > { %p8374_p8 = pnand %p8372_p7, %p8360_p0  ;;  %p8381_p5 = por %p8380_p6, %p8379_p9 }
  0x2d   : > { %p8375_p11 = pneg %p8374_p8 }
  0x2f   : > { %p8382_p10 = pnand %p8381_p5, %p8375_p11 }
  0x31   : > { %8385 = shalt.err (!%p8382_p10)
}
  0x32   : > { %s8520_s19 = smov 128   ;;  %s8521_s22 = smov 8  }
  0x33   : > { %7691 = dma.hbm_to_vmem [thread:$0]  (!%p8663_p12), %s11309_s7, 4096, %s403_s27, [#allocation3], %s8520_s19, %s8520_s19, %s8521_s22  }
  0x34   : > { %s8386_s26 = scalar_lea.hbm %s11311_s9, 4096 }
  0x35   : > { %p8387_p13 = scmp.ne.s32.totalorder %s11311_s9, %s8386_s26  ;;  %p8393_p9 = scmp.lt.u32.totalorder %s8386_s26, %s11311_s9 }
  0x37   : > { %p8389_p5 = pnand %p8387_p13, %p8360_p0 }
  0x39   : > { %p8390_p6 = pneg %p8389_p5 }
  0x3b   : > { %p8395_p10 = pnand %p8393_p9, %p8390_p6 }
  0x3d   : > { %8398 = shalt.err (!%p8395_p10)
}
  0x3e   : > { %s8399_s27 = scalar_lea.vmem %s8667_s20, 4096  ;;  %p8407_p4 = scmp.lt.s32.totalorder %s8667_s20, %s8667_s20 }
  0x3f   : > { %p8400_p1 = scmp.ne.s32.totalorder %s8667_s20, %s8399_s27  ;;  %p8408_p7 = scmp.lt.s32.totalorder %s8399_s27, %s8399_s27 }
  0x41   : > { %p8402_p2 = pnand %p8400_p1, %p8360_p0  ;;  %p8409_p8 = por %p8408_p7, %p8407_p4 }
  0x43   : > { %p8403_p3 = pneg %p8402_p2 }
  0x45   : > { %p8410_p11 = pnand %p8409_p8, %p8403_p3 }
  0x47   : > { %8413 = shalt.err (!%p8410_p11)
}
  0x48   : > { %7694 = dma.hbm_to_vmem [thread:$0]  (!%p8663_p12), %s11311_s9, 4096, %s8667_s20, [#allocation6], %s8520_s19, %s8520_s19, %s8521_s22  }
  0x49   : > { %p11360_p13 = scmp.ne.s32.totalorder %s11358_s25, 0 }
  0x4b   : > { %473 = sbr.rel (%p11360_p13) target bundleno = 3764 (0xeb4), region = 72 }
  0x52   : > { %p11361_p5 = scmp.eq.s32.totalorder %s8627_s17, 0 }
  0x54   : > { %8487 = dma.done.wait (%p11361_p5), [#allocation3], 4096   ;;  %p11362_p0 = pmov %p11361_p5 }
  0x56   : > { %8489 = vsyncadd (%p11362_p0), [#allocation3], 4294963200  ;;  %p11363_p6 = pmov %p11362_p0 }
  0x57   : > { %p11364_p9 = pmov %p11362_p0 }
  0x58   : > { %8491 = dma.done.wait (%p11363_p6), [#allocation6], 4096  }
  0x59   : > { %8493 = vsyncadd (%p11364_p9), [#allocation6], 4294963200  ;;  %v7830_v0 = vld [vmem:[%s11305_s3 + $0x4] ss:$8 sps:$4 sm:$0xff]   ;;  %v7832_v1 = vld [vmem:[%s11305_s3] ss:$8 sps:$4 sm:$0xff]  }
  0x5a   : > { %929 = vmatprep.subr.bf16.mxu1 %v7830_v0  ;;  %v7833_v2 = vld [vmem:[%s11305_s3 + $0x14] ss:$8 sps:$4 sm:$0xff]   ;;  %v7835_v3 = vld [vmem:[%s11305_s3 + $0x10] ss:$8 sps:$4 sm:$0xff]   ;;  %v7836_v4 = vld [vmem:[%s11305_s3 + $0x24] ss:$8 sps:$4 sm:$0xff]  }
  0x5b   : > { %930 = vmatpush1.bf16.msra.mxu1 %v7832_v1  ;;  %v7838_v5 = vld [vmem:[#allocation2 + $0x4] ss:$8 sps:$4 sm:$0xff]   ;;  %v7841_v6 = vld [vmem:[#allocation2] ss:$8 sps:$4 sm:$0xff]   ;;  %v7844_v8 = vld [vmem:[#allocation2 + $0x14] ss:$8 sps:$4 sm:$0xff]  }
  0x5c   : > { %931 = vmatprep.subr.bf16.mxu1 %v7833_v2  ;;  %1643 = vmatprep.subr.bf16.mxu0 %v7838_v5  ;;  %v7840_v7 = vld [vmem:[%s11305_s3 + $0x20] ss:$8 sps:$4 sm:$0xff]   ;;  %v7847_v9 = vld [vmem:[#allocation2 + $0x10] ss:$8 sps:$4 sm:$0xff]   ;;  %v7842_v10 = vld [vmem:[%s11305_s3 + $0x34] ss:$8 sps:$4 sm:$0xff]  }
  0x5d   : > { %1644 = vmatpush1.bf16.msra.mxu0 %v7841_v6  ;;  %v7850_v11 = vld [vmem:[#allocation2 + $0x24] ss:$8 sps:$4 sm:$0xff]   ;;  %v7846_v12 = vld [vmem:[%s11305_s3 + $0x30] ss:$8 sps:$4 sm:$0xff]   ;;  %v7853_v13 = vld [vmem:[#allocation2 + $0x20] ss:$8 sps:$4 sm:$0xff]  }
  0x5e   : > { %1645 = vmatprep.subr.bf16.mxu0 %v7844_v8  ;;  %v7848_v14 = vld [vmem:[%s11305_s3 + $0x44] ss:$8 sps:$4 sm:$0xff]   ;;  %v7856_v15 = vld [vmem:[#allocation2 + $0x34] ss:$8 sps:$4 sm:$0xff]   ;;  %v7852_v16 = vld [vmem:[%s11305_s3 + $0x40] ss:$8 sps:$4 sm:$0xff]  }
  0x5f   : > { %932 = vmatpush1.bf16.msra.mxu1 %v7835_v3  ;;  %v7854_v17 = vld [vmem:[%s11305_s3 + $0x54] ss:$8 sps:$4 sm:$0xff]   ;;  %v7859_v18 = vld [vmem:[#allocation2 + $0x30] ss:$8 sps:$4 sm:$0xff]   ;;  %v7862_v19 = vld [vmem:[#allocation2 + $0x44] ss:$8 sps:$4 sm:$0xff]  }
  0x60   : > { %933 = vmatprep.subr.bf16.mxu1 %v7836_v4  ;;  %v7858_v20 = vld [vmem:[%s11305_s3 + $0x50] ss:$8 sps:$4 sm:$0xff]   ;;  %v7865_v21 = vld [vmem:[#allocation2 + $0x40] ss:$8 sps:$4 sm:$0xff]   ;;  %v7860_v22 = vld [vmem:[%s11305_s3 + $0x64] ss:$8 sps:$4 sm:$0xff]  }
  0x61   : > { %1646 = vmatpush1.bf16.msra.mxu0 %v7847_v9  ;;  %v7868_v23 = vld [vmem:[#allocation2 + $0x54] ss:$8 sps:$4 sm:$0xff]   ;;  %s6866_s18 = sshll.u32 %s8627_s17, 3  ;;  %v7864_v24 = vld [vmem:[%s11305_s3 + $0x60] ss:$8 sps:$4 sm:$0xff]   ;;  %vm8523_vm0 = vmmov 0  }
  0x62   : > { %1647 = vmatprep.subr.bf16.mxu0 %v7850_v11  ;;  %v7866_v25 = vld [vmem:[%s11305_s3 + $0x74] ss:$8 sps:$4 sm:$0xff]   ;;  %v7871_v26 = vld [vmem:[#allocation2 + $0x50] ss:$8 sps:$4 sm:$0xff]   ;;  %v7874_v27 = vld [vmem:[#allocation2 + $0x64] ss:$8 sps:$4 sm:$0xff]  }
  0x63   : > { %934 = vmatpush1.bf16.msra.mxu1 %v7840_v7  ;;  %v7870_v28 = vld [vmem:[%s11305_s3 + $0x70] ss:$8 sps:$4 sm:$0xff]   ;;  %p542_p12 = scmp.lt.s32.totalorder %s6866_s18, 15  ;;  %v7877_v29 = vld [vmem:[#allocation2 + $0x60] ss:$8 sps:$4 sm:$0xff]   ;;  %vm1780_vm1 = vcmask 523264  }
  0x64   : > { %935 = vmatprep.subr.bf16.mxu1 %v7842_v10  ;;  %v7872_v30 = vld [vmem:[%s11305_s3 + $0x84] ss:$8 sps:$4 sm:$0xff]   ;;  %v7880_v31 = vld [vmem:[#allocation2 + $0x74] ss:$8 sps:$4 sm:$0xff]   ;;  %v7876_v32 = vld [vmem:[%s11305_s3 + $0x80] ss:$8 sps:$4 sm:$0xff]  }
  0x65   : > { %1648 = vmatpush1.bf16.msra.mxu0 %v7853_v13  ;;  %s11457_s18 = smov (!%p542_p12, %s6866_s18), 15  ;;  %v7878_v33 = vld [vmem:[%s11305_s3 + $0x94] ss:$8 sps:$4 sm:$0xff]   ;;  %v7883_v34 = vld [vmem:[#allocation2 + $0x70] ss:$8 sps:$4 sm:$0xff]   ;;  %vm2173_vm2 = vcmask 130048  }
  0x66   : > { %1649 = vmatprep.subr.bf16.mxu0 %v7856_v15  ;;  %v7886_v35 = vld [vmem:[#allocation2 + $0x84] ss:$8 sps:$4 sm:$0xff]   ;;  %v7882_v36 = vld [vmem:[%s11305_s3 + $0x90] ss:$8 sps:$4 sm:$0xff]   ;;  %v7889_v37 = vld [vmem:[#allocation2 + $0x80] ss:$8 sps:$4 sm:$0xff]  }
  0x67   : > { %936 = vmatpush1.bf16.msra.mxu1 %v7846_v12  ;;  %s7157_s27 = sshll.u32 %s11457_s18, 4  ;;  %v7884_v38 = vld [vmem:[%s11305_s3 + $0xa4] ss:$8 sps:$4 sm:$0xff]   ;;  %v7892_v39 = vld [vmem:[#allocation2 + $0x94] ss:$8 sps:$4 sm:$0xff]   ;;  %s7159_s19 = sshll.u32 %s11457_s18, 5 }
  0x68   : > { %937 = vmatprep.subr.bf16.mxu1 %v7848_v14  ;;  %s8798_s20 = scalar_lea.vmem %s11302_s0, %s7157_s27  ;;  %v7888_v40 = vld [vmem:[%s11305_s3 + $0xa0] ss:$8 sps:$4 sm:$0xff]   ;;  %v7890_v41 = vld [vmem:[%s11305_s3 + $0xb4] ss:$8 sps:$4 sm:$0xff]   ;;  %v7895_v42 = vld [vmem:[#allocation2 + $0x90] ss:$8 sps:$4 sm:$0xff]   ;;  %s8814_s14 = scalar_lea.vmem %s11304_s2, %s7159_s19 }
  0x69   : > { %1650 = vmatpush1.bf16.msra.mxu0 %v7859_v18  ;;  %v7898_v43 = vld [vmem:[#allocation2 + $0xa4] ss:$8 sps:$4 sm:$0xff]   ;;  %v7894_v45 = vld [vmem:[%s11305_s3 + $0xb0] ss:$8 sps:$4 sm:$0xff]   ;;  %v7901_v47 = vld [vmem:[#allocation2 + $0xa0] ss:$8 sps:$4 sm:$0xff]   ;;  %s8898_s24 = scalar_lea.vmem %s11303_s1, %s7157_s27 }
  0x6a   : > { %1651 = vmatprep.subr.bf16.mxu0 %v7862_v19  ;;  %v7922_v44 = vld [vmem:[%s8798_s20 + $0x4] ss:$8 sps:$4 sm:$0xff]   ;;  %v7904_v48 = vld [vmem:[#allocation2 + $0xb4] ss:$8 sps:$4 sm:$0xff]   ;;  %v7900_v52 = vld [vmem:[%s11305_s3 + $0xc0] ss:$8 sps:$4 sm:$0xff]  }
  0x6b   : > { %938 = vmatpush1.bf16.msra.mxu1 %v7852_v16  ;;  %v7896_v46 = vld [vmem:[%s11305_s3 + $0xc4] ss:$8 sps:$4 sm:$0xff]   ;;  %961 = vmatprep.mubr.bf16.mxu1 %v7922_v44  ;;  %v600_v50 = vld [vmem:[%s8814_s14 + $0x18] sm:$0xff]  ;;  %v7913_v58 = vld [vmem:[#allocation2 + $0xc0] ss:$8 sps:$4 sm:$0xff]   ;;  %s8524_s29 = smov 64  }
  0x6c   : > { %939 = vmatprep.subr.bf16.mxu1 %v7854_v17  ;;  %v598_v49 = vld [vmem:[%s8814_s14 + $0x8] sm:$0xff]  ;;  %v7907_v53 = vld [vmem:[#allocation2 + $0xb0] ss:$8 sps:$4 sm:$0xff]   ;;  %v7902_v54 = vld [vmem:[%s11305_s3 + $0xd4] ss:$8 sps:$4 sm:$0xff]   ;;  %s9472_s15 = sand.u32 1, %s8508_s30  }
  0x6d   : > { %1652 = vmatpush1.bf16.msra.mxu0 %v7865_v21  ;;  %v630_v51 = vpack.c.bf16 %v600_v50, %v598_v49  ;;  %v7910_v55 = vld [vmem:[#allocation2 + $0xc4] ss:$8 sps:$4 sm:$0xff]   ;;  %v7906_v56 = vld [vmem:[%s11305_s3 + $0xd0] ss:$8 sps:$4 sm:$0xff]   ;;  %v7916_v59 = vld [vmem:[#allocation2 + $0xd4] ss:$8 sps:$4 sm:$0xff]  }
  0x6e   : > { %1653 = vmatprep.subr.bf16.mxu0 %v7868_v23  ;;  %v7908_v57 = vld [vmem:[%s11305_s3 + $0xe4] ss:$8 sps:$4 sm:$0xff]   ;;  %v7912_v60 = vld [vmem:[%s11305_s3 + $0xe0] ss:$8 sps:$4 sm:$0xff]   ;;  %v7919_v61 = vld [vmem:[#allocation2 + $0xd0] ss:$8 sps:$4 sm:$0xff]  }
  0x6f   : > { %940 = vmatpush1.bf16.msra.mxu1 %v7858_v20  ;;  %1675 = vmatprep.mubr.bf16.mxu0 %v630_v51  ;;  %v7914_v62 = vld [vmem:[%s11305_s3 + $0xf4] ss:$8 sps:$4 sm:$0xff]   ;;  %v7923_v63 = vld [vmem:[#allocation2 + $0xe4] ss:$8 sps:$4 sm:$0xff]   ;;  %v7918_v0 = vld [vmem:[%s11305_s3 + $0xf0] ss:$8 sps:$4 sm:$0xff]  }
  0x70   : > { %941 = vmatprep.subr.bf16.mxu1 %v7860_v22  ;;  %v7925_v1 = vld [vmem:[#allocation2 + $0xe0] ss:$8 sps:$4 sm:$0xff]   ;;  %v7926_v2 = vld [vmem:[#allocation2 + $0xf4] ss:$8 sps:$4 sm:$0xff]   ;;  %v7928_v4 = vld [vmem:[#allocation2 + $0xf0] ss:$8 sps:$4 sm:$0xff]  }
  0x71   : > { %1654 = vmatpush1.bf16.msra.mxu0 %v7871_v26  ;;  %v7920_v3 = vld [vmem:[%s8798_s20] ss:$8 sps:$4 sm:$0xff]   ;;  %v7929_v5 = vld [vmem:[%s8798_s20 + $0x14] ss:$8 sps:$4 sm:$0xff]   ;;  %v7952_v11 = vld [vmem:[%s11307_s5 + $0x4] ss:$8 sps:$4 sm:$0xff]  }
  0x72   : > { %1655 = vmatprep.subr.bf16.mxu0 %v7874_v27  ;;  %v597_v6 = vld [vmem:[%s8814_s14] sm:$0xff]  ;;  %v599_v7 = vld [vmem:[%s8814_s14 + $0x10] sm:$0xff]  ;;  %v602_v8 = vld [vmem:[%s8814_s14 + $0x28] sm:$0xff]  ;;  %s6865_s21 = sshll.u32 %s9472_s15, 9  ;;  %s6864_s28 = sshll.u32 %s9472_s15, 8 }
  0x73   : > { %942 = vmatpush1.bf16.msra.mxu1 %v7864_v24  ;;  %v604_v9 = vld [vmem:[%s8814_s14 + $0x38] sm:$0xff]  ;;  %v7950_v10 = vld [vmem:[%s11307_s5] ss:$8 sps:$4 sm:$0xff]   ;;  %v629_v12 = vpack.c.bf16 %v599_v7, %v597_v6  ;;  %v7932_v16 = vld [vmem:[%s8798_s20 + $0x24] ss:$8 sps:$4 sm:$0xff]   ;;  %s9480_s26 = scalar_lea.vmem [#allocation8], %s6865_s21 }
  0x74   : > { %943 = vmatprep.subr.bf16.mxu1 %v7866_v25  ;;  %v7955_v13 = vld [vmem:[%s11307_s5 + $0x14] ss:$8 sps:$4 sm:$0xff]   ;;  %v632_v14 = vpack.c.bf16 %v604_v9, %v602_v8  ;;  %v7931_v15 = vld [vmem:[%s8798_s20 + $0x10] ss:$8 sps:$4 sm:$0xff]   ;;  %v601_v18 = vld [vmem:[%s8814_s14 + $0x20] sm:$0xff]  ;;  %s11099_s25 = scalar_lea.vmem [#allocation7], %s6864_s28 }
  0x75   : > { %1656 = vmatpush1.bf16.msra.mxu0 %v7877_v29  ;;  %v7953_v17 = vld [vmem:[%s11307_s5 + $0x10] ss:$8 sps:$4 sm:$0xff]   ;;  %v7958_v19 = vld [vmem:[%s11307_s5 + $0x24] ss:$8 sps:$4 sm:$0xff]   ;;  %v7956_v23 = vld [vmem:[%s11307_s5 + $0x20] ss:$8 sps:$4 sm:$0xff]  }
  0x76   : > { %1657 = vmatprep.subr.bf16.mxu0 %v7880_v31  ;;  %v603_v20 = vld [vmem:[%s8814_s14 + $0x30] sm:$0xff]  ;;  %v606_v21 = vld [vmem:[%s8814_s14 + $0x48] sm:$0xff]  ;;  %v608_v22 = vld [vmem:[%s8814_s14 + $0x58] sm:$0xff]  ;;  %s7163_s19 = sshll.u32 %s8627_s17, 13  ;;  %s11444_s21 = sld [smem:[#allocation53_spill]] }
  0x77   : > { %944 = vmatpush1.bf16.msra.mxu1 %v7870_v28  ;;  %v631_v24 = vpack.c.bf16 %v603_v20, %v601_v18  ;;  %v7961_v25 = vld [vmem:[%s11307_s5 + $0x34] ss:$8 sps:$4 sm:$0xff]   ;;  %v634_v26 = vpack.c.bf16 %v608_v22, %v606_v21  ;;  %v7934_v27 = vld [vmem:[%s8798_s20 + $0x20] ss:$8 sps:$4 sm:$0xff]   ;;  %v7959_v29 = vld [vmem:[%s11307_s5 + $0x30] ss:$8 sps:$4 sm:$0xff]  }
  0x78   : > { %945 = vmatprep.subr.bf16.mxu1 %v7872_v30  ;;  %v7935_v28 = vld [vmem:[%s8798_s20 + $0x34] ss:$8 sps:$4 sm:$0xff]   ;;  %v605_v30 = vld [vmem:[%s8814_s14 + $0x40] sm:$0xff]  ;;  %s6685_s13 = scalar_lea.sflag [#allocation9], %s9472_s15  ;;  %p11445_p1 = scmp.ne.s32.totalorder %s11355_s23, 0 }
  0x79   : > { %1658 = vmatpush1.bf16.msra.mxu0 %v7883_v34  ;;  %v7964_v31 = vld [vmem:[%s11307_s5 + $0x44] ss:$8 sps:$4 sm:$0xff]   ;;  %v612_v34 = vld [vmem:[%s8814_s14 + $0x78] sm:$0xff]  ;;  %v611_v44 = vld [vmem:[%s8814_s14 + $0x70] sm:$0xff]  ;;  %s8525_s16 = smov [#allocation8]  }
  0x7a   : > { %1659 = vmatprep.subr.bf16.mxu0 %v7886_v35  ;;  %v7962_v35 = vld [vmem:[%s11307_s5 + $0x40] ss:$8 sps:$4 sm:$0xff]   ;;  %v7973_v49 = vld [vmem:[%s11307_s5 + $0x74] ss:$8 sps:$4 sm:$0xff]   ;;  %s8418_s18 = sshll.u32 %s8525_s16, 4  ;;  %s8419_s18 = int_to_ptr.vmem [resolvable:$false] %s8418_s18 }
  0x7b   : > { %946 = vmatpush1.bf16.msra.mxu1 %v7876_v32  ;;  %v607_v32 = vld [vmem:[%s8814_s14 + $0x50] sm:$0xff]  ;;  %v7940_v51 = vld [vmem:[%s8798_s20 + $0x40] ss:$8 sps:$4 sm:$0xff]   ;;  %v624_v6 = vld [vmem:[%s8814_s14 + $0xd8] sm:$0xff] }
  0x7c   : > { %947 = vmatprep.subr.bf16.mxu1 %v7878_v33  ;;  %v610_v33 = vld [vmem:[%s8814_s14 + $0x68] sm:$0xff]  ;;  %v7985_v9 = vld [vmem:[%s11307_s5 + $0xb4] ss:$8 sps:$4 sm:$0xff]  }
  0x7d   : > { %1660 = vmatpush1.bf16.msra.mxu0 %v7889_v37  ;;  %v7967_v37 = vld [vmem:[%s11307_s5 + $0x54] ss:$8 sps:$4 sm:$0xff]   ;;  %v7980_v7 = vld [vmem:[%s11307_s5 + $0xa0] ss:$8 sps:$4 sm:$0xff]  }
  0x7e   : > { %1661 = vmatprep.subr.bf16.mxu0 %v7892_v39  ;;  %v7937_v39 = vld [vmem:[%s8798_s20 + $0x30] ss:$8 sps:$4 sm:$0xff]   ;;  %v7991_v21 = vld [vmem:[%s11307_s5 + $0xd4] ss:$8 sps:$4 sm:$0xff]  }
  0x7f   : > { %948 = vmatpush1.bf16.msra.mxu1 %v7882_v36  ;;  %v633_v36 = vpack.c.bf16 %v607_v32, %v605_v30  ;;  %v628_v18 = vld [vmem:[%s8814_s14 + $0xf8] sm:$0xff] }
  0x80   : > { %949 = vmatprep.subr.bf16.mxu1 %v7884_v38  ;;  %v636_v38 = vpack.c.bf16 %v612_v34, %v610_v33  ;;  %v7995_v32 = vld [vmem:[%s11307_s5 + $0xf0] ss:$8 sps:$4 sm:$0xff]   ;;  %v7998_v33 = vld [vmem:[%s8898_s24] ss:$8 sps:$4 sm:$0xff]   ;;  %v8001_v34 = vld [vmem:[%s8898_s24 + $0x14] ss:$8 sps:$4 sm:$0xff]  }
  0x81   : > { %1662 = vmatpush1.bf16.msra.mxu0 %v7895_v42  ;;  %v609_v42 = vld [vmem:[%s8814_s14 + $0x60] sm:$0xff] }
  0x82   : > { %1663 = vmatprep.subr.bf16.mxu0 %v7898_v43  ;;  %v7970_v43 = vld [vmem:[%s11307_s5 + $0x64] ss:$8 sps:$4 sm:$0xff]  }
  0x83   : > { %950 = vmatpush1.bf16.msra.mxu1 %v7888_v40  ;;  %v7938_v40 = vld [vmem:[%s8798_s20 + $0x44] ss:$8 sps:$4 sm:$0xff]  }
  0x84   : > { %951 = vmatprep.subr.bf16.mxu1 %v7890_v41  ;;  %v7965_v41 = vld [vmem:[%s11307_s5 + $0x50] ss:$8 sps:$4 sm:$0xff]  }
  0x85   : > { %1664 = vmatpush1.bf16.msra.mxu0 %v7901_v47  ;;  %v7968_v47 = vld [vmem:[%s11307_s5 + $0x60] ss:$8 sps:$4 sm:$0xff]  }
  0x86   : > { %1665 = vmatprep.subr.bf16.mxu0 %v7904_v48  ;;  %v635_v48 = vpack.c.bf16 %v611_v44, %v609_v42  ;;  %v8012_v42 = vld [vmem:[%s8898_s24 + $0x40] ss:$8 sps:$4 sm:$0xff]   ;;  %v8015_v44 = vld [vmem:[%s8898_s24 + $0x50] ss:$8 sps:$4 sm:$0xff]  }
  0x87   : > { %952 = vmatpush1.bf16.msra.mxu1 %v7894_v45  ;;  %v614_v45 = vld [vmem:[%s8814_s14 + $0x88] sm:$0xff] }
  0x88   : > { %953 = vmatprep.subr.bf16.mxu1 %v7896_v46  ;;  %v616_v46 = vld [vmem:[%s8814_s14 + $0x98] sm:$0xff] }
  0x89   : > { %1666 = vmatpush1.bf16.msra.mxu0 %v7907_v53  ;;  %v638_v50 = vpack.c.bf16 %v616_v46, %v614_v45  ;;  %v613_v53 = vld [vmem:[%s8814_s14 + $0x80] sm:$0xff] }
  0x8a   : > { %1667 = vmatprep.subr.bf16.mxu0 %v7910_v55  ;;  %v7971_v55 = vld [vmem:[%s11307_s5 + $0x70] ss:$8 sps:$4 sm:$0xff]   ;;  %v8016_v45 = vld [vmem:[%s8898_s24 + $0x64] ss:$8 sps:$4 sm:$0xff]   ;;  %v8018_v46 = vld [vmem:[%s8898_s24 + $0x60] ss:$8 sps:$4 sm:$0xff]  }
  0x8b   : > { %954 = vmatpush1.bf16.msra.mxu1 %v7900_v52  ;;  %v7941_v52 = vld [vmem:[%s8798_s20 + $0x54] ss:$8 sps:$4 sm:$0xff]  }
  0x8c   : > { %955 = vmatprep.subr.bf16.mxu1 %v7902_v54  ;;  %v615_v54 = vld [vmem:[%s8814_s14 + $0x90] sm:$0xff] }
  0x8d   : > { %1668 = vmatpush1.bf16.msra.mxu0 %v7913_v58  ;;  %v7976_v58 = vld [vmem:[%s11307_s5 + $0x84] ss:$8 sps:$4 sm:$0xff]  }
  0x8e   : > { %1669 = vmatprep.subr.bf16.mxu0 %v7916_v59  ;;  %v7974_v59 = vld [vmem:[%s11307_s5 + $0x80] ss:$8 sps:$4 sm:$0xff]  }
  0x8f   : > { %956 = vmatpush1.bf16.msra.mxu1 %v7906_v56  ;;  %v618_v56 = vld [vmem:[%s8814_s14 + $0xa8] sm:$0xff] }
  0x90   : > { %957 = vmatprep.subr.bf16.mxu1 %v7908_v57  ;;  %v620_v57 = vld [vmem:[%s8814_s14 + $0xb8] sm:$0xff] }
  0x91   : > { %1670 = vmatpush1.bf16.msra.mxu0 %v7919_v61  ;;  %v637_v61 = vpack.c.bf16 %v615_v54, %v613_v53 }
  0x92   : > { %1671 = vmatprep.subr.bf16.mxu0 %v7923_v63  ;;  %v7977_v63 = vld [vmem:[%s11307_s5 + $0x90] ss:$8 sps:$4 sm:$0xff]  }
  0x93   : > { %958 = vmatpush1.bf16.msra.mxu1 %v7912_v60  ;;  %v7979_v60 = vld [vmem:[%s11307_s5 + $0x94] ss:$8 sps:$4 sm:$0xff]  }
  0x94   : > { %959 = vmatprep.subr.bf16.mxu1 %v7914_v62  ;;  %v640_v62 = vpack.c.bf16 %v620_v57, %v618_v56 }
  0x95   : > { %1672 = vmatpush1.bf16.msra.mxu0 %v7925_v1  ;;  %v7982_v1 = vld [vmem:[%s11307_s5 + $0xa4] ss:$8 sps:$4 sm:$0xff]  }
  0x96   : > { %1673 = vmatprep.subr.bf16.mxu0 %v7926_v2  ;;  %v7944_v2 = vld [vmem:[%s8798_s20 + $0x64] ss:$8 sps:$4 sm:$0xff]  }
  0x97   : > { %960 = vmatpush1.bf16.msra.mxu1 %v7918_v0  ;;  %v7943_v0 = vld [vmem:[%s8798_s20 + $0x50] ss:$8 sps:$4 sm:$0xff]  }
  0x98   : > { %1326 = vmatprep.subr.bf16.mxu1 %v7952_v11  ;;  %v7983_v11 = vld [vmem:[%s11307_s5 + $0xb0] ss:$8 sps:$4 sm:$0xff]  }
  0x99   : > { %1674 = vmatpush1.bf16.msra.mxu0 %v7928_v4  ;;  %v619_v4 = vld [vmem:[%s8814_s14 + $0xb0] sm:$0xff] }
  0x9a   : > { %962 = vmatmul.mubr.bf16.vlgmr.msra.gmra.mrb[0].mxu1 %v7920_v3  ;;  %v617_v3 = vld [vmem:[%s8814_s14 + $0xa0] sm:$0xff] }
  0x9b   : > { %971 = vmatprep.mubr.bf16.mxu1 %v7929_v5  ;;  %1327 = vmatpush1.bf16.msra.mxu1 %v7950_v10  ;;  %v622_v5 = vld [vmem:[%s8814_s14 + $0xc8] sm:$0xff]  ;;  %v639_v8 = vpack.c.bf16 %v619_v4, %v617_v3 }
  0x9c   : > { %1676 = vmatmul.mubr.bf16.vlgmr.msra.gmra.mrb[0].mxu0 %v629_v12  ;;  %1328 = vmatprep.subr.bf16.mxu1 %v7955_v13  ;;  %v642_v10 = vpack.c.bf16 %v624_v6, %v622_v5  ;;  %v7946_v12 = vld [vmem:[%s8798_s20 + $0x60] ss:$8 sps:$4 sm:$0xff]   ;;  %v7988_v13 = vld [vmem:[%s11307_s5 + $0xc4] ss:$8 sps:$4 sm:$0xff]  }
  0x9d   : > { %1685 = vmatprep.mubr.bf16.mxu0 %v632_v14  ;;  %v7947_v14 = vld [vmem:[%s8798_s20 + $0x74] ss:$8 sps:$4 sm:$0xff]  }
  0x9f   : > { %1329 = vmatpush1.bf16.msra.mxu1 %v7953_v17  ;;  %v626_v17 = vld [vmem:[%s8814_s14 + $0xe8] sm:$0xff] }
  0xa0   : > { %1330 = vmatprep.subr.bf16.mxu1 %v7958_v19  ;;  %v7986_v19 = vld [vmem:[%s11307_s5 + $0xc0] ss:$8 sps:$4 sm:$0xff]   ;;  %v644_v22 = vpack.c.bf16 %v628_v18, %v626_v17 }
  0xa2   : > { %972 = vmatmul.mubr.bf16.gmra.mrb[4].mxu1 %v7931_v15  ;;  %v621_v15 = vld [vmem:[%s8814_s14 + $0xc0] sm:$0xff] }
  0xa3   : > { %981 = vmatprep.mubr.bf16.mxu1 %v7932_v16  ;;  %1331 = vmatpush1.bf16.msra.mxu1 %v7956_v23  ;;  %v623_v16 = vld [vmem:[%s8814_s14 + $0xd0] sm:$0xff] }
  0xa4   : > { %1686 = vmatmul.mubr.bf16.gmra.mrb[4].mxu0 %v631_v24  ;;  %1332 = vmatprep.subr.bf16.mxu1 %v7961_v25  ;;  %v641_v20 = vpack.c.bf16 %v623_v16, %v621_v15  ;;  %v7989_v23 = vld [vmem:[%s11307_s5 + $0xd0] ss:$8 sps:$4 sm:$0xff]   ;;  %v7994_v25 = vld [vmem:[%s11307_s5 + $0xe4] ss:$8 sps:$4 sm:$0xff]  }
  0xa5   : > { %1695 = vmatprep.mubr.bf16.mxu0 %v634_v26  ;;  %v7949_v24 = vld [vmem:[%s8798_s20 + $0x70] ss:$8 sps:$4 sm:$0xff]   ;;  %v625_v26 = vld [vmem:[%s8814_s14 + $0xe0] sm:$0xff]  ;;  %s11112_s20 = scalar_lea.hbm %s11444_s21, %s7163_s19 }
  0xa7   : > { %1333 = vmatpush1.bf16.msra.mxu1 %v7959_v29  ;;  %v7992_v29 = vld [vmem:[%s11307_s5 + $0xe0] ss:$8 sps:$4 sm:$0xff]  }
  0xa8   : > { %1334 = vmatprep.subr.bf16.mxu1 %v7964_v31  ;;  %v7997_v31 = vld [vmem:[%s11307_s5 + $0xf4] ss:$8 sps:$4 sm:$0xff]  }
  0xaa   : > { %982 = vmatmul.mubr.bf16.gmra.mrb[8].mxu1 %v7934_v27  ;;  %v627_v27 = vld [vmem:[%s8814_s14 + $0xf0] sm:$0xff] }
  0xab   : > { %991 = vmatprep.mubr.bf16.mxu1 %v7935_v28  ;;  %1335 = vmatpush1.bf16.msra.mxu1 %v7962_v35  ;;  %v8000_v28 = vld [vmem:[%s8898_s24 + $0x4] ss:$8 sps:$4 sm:$0xff]   ;;  %v643_v30 = vpack.c.bf16 %v627_v27, %v625_v26  ;;  %v8003_v35 = vld [vmem:[%s8898_s24 + $0x10] ss:$8 sps:$4 sm:$0xff]  }
  0xac   : > { %1696 = vmatmul.mubr.bf16.gmra.mrb[8].mxu0 %v633_v36  ;;  %1336 = vmatprep.subr.bf16.mxu1 %v7967_v37  ;;  %v8004_v36 = vld [vmem:[%s8898_s24 + $0x24] ss:$8 sps:$4 sm:$0xff]   ;;  %v8006_v37 = vld [vmem:[%s8898_s24 + $0x20] ss:$8 sps:$4 sm:$0xff]  }
  0xad   : > { %1705 = vmatprep.mubr.bf16.mxu0 %v636_v38  ;;  %v8007_v38 = vld [vmem:[%s8898_s24 + $0x34] ss:$8 sps:$4 sm:$0xff]  }
  0xaf   : > { %1337 = vmatpush1.bf16.msra.mxu1 %v7965_v41  ;;  %v11328_v41 = vmov 0.0  }
  0xb0   : > { %1338 = vmatprep.subr.bf16.mxu1 %v7970_v43  ;;  %7340 = vmatprep.subr.bf16.mxu0 %v11328_v41  ;;  %v8013_v43 = vld [vmem:[%s8898_s24 + $0x54] ss:$8 sps:$4 sm:$0xff]  }
  0xb2   : > { %992 = vmatmul.mubr.bf16.gmra.mrb[12].mxu1 %v7937_v39  ;;  %v8009_v39 = vld [vmem:[%s8898_s24 + $0x30] ss:$8 sps:$4 sm:$0xff]  }
  0xb3   : > { %1001 = vmatprep.mubr.bf16.mxu1 %v7938_v40  ;;  %1339 = vmatpush1.bf16.msra.mxu1 %v7968_v47  ;;  %v8010_v40 = vld [vmem:[%s8898_s24 + $0x44] ss:$8 sps:$4 sm:$0xff]   ;;  %v8019_v47 = vld [vmem:[%s8898_s24 + $0x74] ss:$8 sps:$4 sm:$0xff]  }
  0xb4   : > { %1706 = vmatmul.mubr.bf16.gmra.mrb[12].mxu0 %v635_v48  ;;  %1340 = vmatprep.subr.bf16.mxu1 %v7973_v49  ;;  %v8021_v48 = vld [vmem:[%s8898_s24 + $0x70] ss:$8 sps:$4 sm:$0xff]   ;;  %v679_v49 = vlaneseq  ;;  %s6716_s24 = sshll.u32 %s9480_s26, 4  ;;  %s11114_s24 = int_to_ptr.vmem [resolvable:$true] %s6716_s24 }
  0xb5   : > { %1715 = vmatprep.mubr.bf16.mxu0 %v638_v50  ;;  %p8421_p4 = scmp.lt.s32.totalorder %s11114_s24, %s8419_s18 }
  0xb6   : > { %v680_v50 = vshrl.u32 %v679_v49, 7 }
  0xb7   : > { %1341 = vmatpush1.bf16.msra.mxu1 %v7971_v55  ;;  %v1471_v55 = vld [vmem:[%s11310_s8] sm:$0x3] }
  0xb8   : > { %1342 = vmatprep.subr.bf16.mxu1 %v7976_v58  ;;  %v9017_v53 = vsub.s32 0, %v680_v50 }
  0xba   : > { %1002 = vmatmul.mubr.bf16.gmra.mrb[16].mxu1 %v7940_v51  ;;  %v9012_v51 = vsub.s32 1, %v680_v50  ;;  %11366 = vst [vmem:[#allocation21_spill] sm:$0xff] %v9017_v53 }
  0xbb   : > { %1011 = vmatprep.mubr.bf16.mxu1 %v7941_v52  ;;  %1343 = vmatpush1.bf16.msra.mxu1 %v7974_v59  ;;  %v677_v52 = vld [vmem:[%s11306_s4] sm:$0x3]  ;;  %v9029_v59 = vrot.slane %v1471_v55, %v9017_v53 }
  0xbc   : > { %1716 = vmatmul.mubr.bf16.gmra.mrb[16].mxu0 %v637_v61  ;;  %1344 = vmatprep.subr.bf16.mxu1 %v7979_v60  ;;  %11365 = vst [vmem:[#allocation20_spill] sm:$0xff] %v9012_v51  ;;  %v9020_v54 = vrot.slane %v677_v52, %v9012_v51  ;;  %v9026_v56 = vrot.slane %v677_v52, %v9017_v53 }
  0xbd   : > { %1725 = vmatprep.mubr.bf16.mxu0 %v640_v62  ;;  %v9033_v62 = vrot.slane %v1471_v55, %v9012_v51 }
  0xbf   : > { %1345 = vmatpush1.bf16.msra.mxu1 %v7977_v63 }
  0xc0   : > { %1346 = vmatprep.subr.bf16.mxu1 %v7982_v1 }
  0xc2   : > { %1012 = vmatmul.mubr.bf16.gmra.mrb[20].mxu1 %v7943_v0 }
  0xc3   : > { %1021 = vmatprep.mubr.bf16.mxu1 %v7944_v2  ;;  %1347 = vmatpush1.bf16.msra.mxu1 %v7980_v7 }
  0xc4   : > { %1726 = vmatmul.mubr.bf16.gmra.mrb[20].mxu0 %v639_v8  ;;  %1348 = vmatprep.subr.bf16.mxu1 %v7985_v9 }
  0xc5   : > { %1735 = vmatprep.mubr.bf16.mxu0 %v642_v10 }
  0xc7   : > { %1349 = vmatpush1.bf16.msra.mxu1 %v7983_v11 }
  0xc8   : > { %1350 = vmatprep.subr.bf16.mxu1 %v7988_v13 }
  0xca   : > { %1022 = vmatmul.mubr.bf16.gmra.mrb[24].mxu1 %v7946_v12 }
  0xcb   : > { %1031 = vmatprep.mubr.bf16.mxu1 %v7947_v14  ;;  %1351 = vmatpush1.bf16.msra.mxu1 %v7986_v19 }
  0xcc   : > { %1736 = vmatmul.mubr.bf16.gmra.mrb[24].mxu0 %v641_v20  ;;  %1352 = vmatprep.subr.bf16.mxu1 %v7991_v21 }
  0xcd   : > { %1745 = vmatprep.mubr.bf16.mxu0 %v644_v22 }
  0xcf   : > { %1353 = vmatpush1.bf16.msra.mxu1 %v7989_v23 }
  0xd0   : > { %1354 = vmatprep.subr.bf16.mxu1 %v7994_v25 }
  0xd2   : > { %1032 = vmatmul.mubr.bf16.gmra.mrb[28].mxu1 %v7949_v24 }
  0xd3   : > { %1358 = vmatprep.mubr.bf16.mxu1 %v8000_v28  ;;  %1355 = vmatpush1.bf16.msra.mxu1 %v7992_v29 }
  0xd4   : > { %1746 = vmatmul.mubr.bf16.gmra.mrb[28].mxu0 %v643_v30  ;;  %1356 = vmatprep.subr.bf16.mxu1 %v7997_v31 }
  0xd5   : > { %7342 = vmatprep.mubr.msk.bf16.mxu0 %vm8523_vm0, %v11328_v41 }
  0xd7   : > { %1357 = vmatpush1.bf16.msra.mxu1 %v7995_v32 }
  0xd8   : > { %7292 = vmatprep.subr.bf16.mxu1 %v11328_v41 }
  0xda   : > { %1359 = vmatmul.mubr.bf16.vlgmr.msra.gmra.mrb[32].mxu1 %v7998_v33 }
  0xdb   : > { %1368 = vmatprep.mubr.bf16.mxu1 %v8001_v34 }
  0xe2   : > { %1369 = vmatmul.mubr.bf16.gmra.mrb[36].mxu1 %v8003_v35 }
  0xe3   : > { %1378 = vmatprep.mubr.bf16.mxu1 %v8004_v36 }
  0xea   : > { %1379 = vmatmul.mubr.bf16.gmra.mrb[40].mxu1 %v8006_v37 }
  0xeb   : > { %1388 = vmatprep.mubr.bf16.mxu1 %v8007_v38 }
  0xf2   : > { %1389 = vmatmul.mubr.bf16.gmra.mrb[44].mxu1 %v8009_v39 }
  0xf3   : > { %1398 = vmatprep.mubr.bf16.mxu1 %v8010_v40 }
  0xfa   : > { %1399 = vmatmul.mubr.bf16.gmra.mrb[48].mxu1 %v8012_v42 }
  0xfb   : > { %1408 = vmatprep.mubr.bf16.mxu1 %v8013_v43 }
 0x102   : > { %1409 = vmatmul.mubr.bf16.gmra.mrb[52].mxu1 %v8015_v44 }
 0x103   : > { %1418 = vmatprep.mubr.bf16.mxu1 %v8016_v45 }
 0x10a   : > { %1419 = vmatmul.mubr.bf16.gmra.mrb[56].mxu1 %v8018_v46 }
 0x10b   : > { %1428 = vmatprep.mubr.bf16.mxu1 %v8019_v47 }
 0x112   : > { %1429 = vmatmul.mubr.bf16.gmra.mrb[60].mxu1 %v8021_v48 }
 0x113   : > { %7294 = vmatprep.mubr.msk.bf16.mxu1 %vm8523_vm0, %v11328_v41 }
 0x16d   : > { %v963_v57 = vpop.f32.mrb[0].mxu1 }
 0x16e   : > { %v965_v58 = vpop.f32.mrb[1].mxu1  ;;  %v964_v63 = vadd.f32 %v963_v57, %v9026_v56 }
 0x16f   : > { %v966_v60 = vadd.f32 %v965_v58, %v9020_v54  ;;  %v967_v61 = vpop.f32.mrb[2].mxu1  ;;  %v1677_v3 = vpop.f32.mrb[0].mxu0 }
 0x170   : > { %v968_v0 = vadd.f32 %v967_v61, %v9026_v56  ;;  %v969_v1 = vpop.f32.mrb[3].mxu1  ;;  %v1678_v5 = vadd.f32 %v1677_v3, %v9029_v59  ;;  %v1679_v6 = vpop.f32.mrb[1].mxu0 }
 0x171   : > { %v970_v2 = vadd.f32 %v969_v1, %v9020_v54  ;;  %v1680_v8 = vadd.f32 %v1679_v6, %v9033_v62  ;;  %v1681_v9 = vpop.f32.mrb[2].mxu0 }
 0x172   : > { %v9038_v4 = vpack.c.bf16 %v968_v0, %v964_v63  ;;  %v1682_v11 = vadd.f32 %v1681_v9, %v9029_v59  ;;  %v1683_v12 = vpop.f32.mrb[3].mxu0 }
 0x173   : > { %v9041_v7 = vpack.c.bf16 %v970_v2, %v966_v60  ;;  %v1684_v14 = vadd.f32 %v1683_v12, %v9033_v62 }
 0x174   : > { %v1785_v10 = vsel %vm1780_vm1, %v9038_v4, 0  ;;  %v9048_v16 = vpack.c.bf16 %v1682_v11, %v1678_v5 }
 0x175   : > { %v973_v13 = vpop.f32.mrb[4].mxu1  ;;  %7293 = vmatpush3.bf16.xpose.msra.mxu1 %v1785_v10  ;;  %v9052_v19 = vpack.c.bf16 %v1684_v14, %v1680_v8 }
 0x176   : > { %v975_v15 = vpop.f32.mrb[5].mxu1  ;;  %7298 = vmatprep.subr.bf16.mxu1 %v11328_v41  ;;  %v974_v20 = vadd.f32 %v973_v13, %v9026_v56 }
 0x177   : > { %v976_v17 = vadd.f32 %v975_v15, %v9020_v54  ;;  %v977_v18 = vpop.f32.mrb[6].mxu1  ;;  %v1687_v24 = vpop.f32.mrb[4].mxu0 }
 0x178   : > { %v978_v21 = vadd.f32 %v977_v18, %v9026_v56  ;;  %v979_v22 = vpop.f32.mrb[7].mxu1  ;;  %v1688_v26 = vadd.f32 %v1687_v24, %v9029_v59  ;;  %v1689_v27 = vpop.f32.mrb[5].mxu0 }
 0x179   : > { %v980_v23 = vadd.f32 %v979_v22, %v9020_v54  ;;  %v1690_v29 = vadd.f32 %v1689_v27, %v9033_v62  ;;  %v1691_v30 = vpop.f32.mrb[6].mxu0 }
 0x17a   : > { %v9057_v25 = vpack.c.bf16 %v978_v21, %v974_v20  ;;  %v1692_v32 = vadd.f32 %v1691_v30, %v9029_v59  ;;  %v1693_v33 = vpop.f32.mrb[7].mxu0 }
 0x17b   : > { %v9060_v28 = vpack.c.bf16 %v980_v23, %v976_v17  ;;  %v1694_v35 = vadd.f32 %v1693_v33, %v9033_v62 }
 0x17c   : > { %7295 = vmatmul.mubr.msk.bf16.vlgmr.msra.gmra.mrb[64].mxu1 %vm1780_vm1, %v9048_v16  ;;  %v1832_v31 = vsel %vm1780_vm1, %v9057_v25, 0  ;;  %v9071_v37 = vpack.c.bf16 %v1692_v32, %v1688_v26 }
 0x17d   : > { %v983_v34 = vpop.f32.mrb[8].mxu1  ;;  %7299 = vmatpush3.bf16.xpose.msra.mxu1 %v1832_v31  ;;  %7300 = vmatprep.mubr.msk.bf16.mxu1 %vm8523_vm0, %v11328_v41  ;;  %v9075_v40 = vpack.c.bf16 %v1694_v35, %v1690_v29 }
 0x17e   : > { %v985_v36 = vpop.f32.mrb[9].mxu1  ;;  %7304 = vmatprep.subr.bf16.mxu1 %v11328_v41  ;;  %v984_v42 = vadd.f32 %v983_v34, %v9026_v56 }
 0x17f   : > { %v986_v38 = vadd.f32 %v985_v36, %v9020_v54  ;;  %v987_v39 = vpop.f32.mrb[10].mxu1  ;;  %v1697_v46 = vpop.f32.mrb[8].mxu0 }
 0x180   : > { %v988_v43 = vadd.f32 %v987_v39, %v9026_v56  ;;  %v989_v44 = vpop.f32.mrb[11].mxu1  ;;  %v1698_v48 = vadd.f32 %v1697_v46, %v9029_v59  ;;  %v1699_v49 = vpop.f32.mrb[9].mxu0 }
 0x181   : > { %v990_v45 = vadd.f32 %v989_v44, %v9020_v54  ;;  %v1700_v52 = vadd.f32 %v1699_v49, %v9033_v62  ;;  %v1701_v55 = vpop.f32.mrb[10].mxu0 }
 0x182   : > { %v9080_v47 = vpack.c.bf16 %v988_v43, %v984_v42  ;;  %v1702_v58 = vadd.f32 %v1701_v55, %v9029_v59  ;;  %v1703_v60 = vpop.f32.mrb[11].mxu0 }
 0x183   : > { %v9083_v50 = vpack.c.bf16 %v990_v45, %v986_v38  ;;  %v1704_v63 = vadd.f32 %v1703_v60, %v9033_v62 }
 0x184   : > { %7301 = vmatmul.mubr.msk.bf16.vlgmr.msra.gmra.mrb[68].mxu1 %vm1780_vm1, %v9071_v37  ;;  %v1879_v57 = vsel %vm1780_vm1, %v9080_v47, 0  ;;  %v9094_v1 = vpack.c.bf16 %v1702_v58, %v1698_v48 }
 0x185   : > { %v993_v61 = vpop.f32.mrb[12].mxu1  ;;  %7305 = vmatpush3.bf16.xpose.msra.mxu1 %v1879_v57  ;;  %7306 = vmatprep.mubr.msk.bf16.mxu1 %vm8523_vm0, %v11328_v41  ;;  %v9098_v5 = vpack.c.bf16 %v1704_v63, %v1700_v52 }
 0x186   : > { %v995_v0 = vpop.f32.mrb[13].mxu1  ;;  %7310 = vmatprep.subr.bf16.mxu1 %v11328_v41  ;;  %v994_v6 = vadd.f32 %v993_v61, %v9026_v56 }
 0x187   : > { %v996_v2 = vadd.f32 %v995_v0, %v9020_v54  ;;  %v997_v3 = vpop.f32.mrb[14].mxu1  ;;  %v1707_v11 = vpop.f32.mrb[12].mxu0 }
 0x188   : > { %v998_v8 = vadd.f32 %v997_v3, %v9026_v56  ;;  %v999_v9 = vpop.f32.mrb[15].mxu1  ;;  %v1708_v13 = vadd.f32 %v1707_v11, %v9029_v59  ;;  %v1709_v14 = vpop.f32.mrb[13].mxu0 }
 0x189   : > { %v1000_v10 = vadd.f32 %v999_v9, %v9020_v54  ;;  %v1710_v17 = vadd.f32 %v1709_v14, %v9033_v62  ;;  %v1711_v18 = vpop.f32.mrb[14].mxu0 }
 0x18a   : > { %v9103_v12 = vpack.c.bf16 %v998_v8, %v994_v6  ;;  %v1712_v21 = vadd.f32 %v1711_v18, %v9029_v59  ;;  %v1713_v22 = vpop.f32.mrb[15].mxu0 }
 0x18b   : > { %v9106_v15 = vpack.c.bf16 %v1000_v10, %v996_v2  ;;  %v1714_v24 = vadd.f32 %v1713_v22, %v9033_v62 }
 0x18c   : > { %7307 = vmatmul.mubr.msk.bf16.vlgmr.msra.gmra.mrb[72].mxu1 %vm1780_vm1, %v9094_v1  ;;  %v1926_v20 = vsel %vm1780_vm1, %v9103_v12, 0  ;;  %v9117_v27 = vpack.c.bf16 %v1712_v21, %v1708_v13 }
 0x18d   : > { %v1003_v23 = vpop.f32.mrb[16].mxu1  ;;  %7311 = vmatpush3.bf16.xpose.msra.mxu1 %v1926_v20  ;;  %7312 = vmatprep.mubr.msk.bf16.mxu1 %vm8523_vm0, %v11328_v41  ;;  %v9121_v31 = vpack.c.bf16 %v1714_v24, %v1710_v17 }
 0x18e   : > { %v1005_v26 = vpop.f32.mrb[17].mxu1  ;;  %7316 = vmatprep.subr.bf16.mxu1 %v11328_v41  ;;  %v1004_v32 = vadd.f32 %v1003_v23, %v9026_v56 }
 0x18f   : > { %v1006_v29 = vadd.f32 %v1005_v26, %v9020_v54  ;;  %v1007_v30 = vpop.f32.mrb[18].mxu1  ;;  %11367 = vst [vmem:[#allocation22_spill] sm:$0xff] %v9121_v31  ;;  %v1717_v36 = vpop.f32.mrb[16].mxu0 }
 0x190   : > { %v1008_v33 = vadd.f32 %v1007_v30, %v9026_v56  ;;  %v1009_v34 = vpop.f32.mrb[19].mxu1  ;;  %v1718_v39 = vadd.f32 %v1717_v36, %v9029_v59  ;;  %v1719_v42 = vpop.f32.mrb[17].mxu0 }
 0x191   : > { %v1010_v35 = vadd.f32 %v1009_v34, %v9020_v54  ;;  %v1720_v44 = vadd.f32 %v1719_v42, %v9033_v62  ;;  %v1721_v45 = vpop.f32.mrb[18].mxu0 }
 0x192   : > { %v9126_v38 = vpack.c.bf16 %v1008_v33, %v1004_v32  ;;  %v1722_v48 = vadd.f32 %v1721_v45, %v9029_v59  ;;  %v1723_v49 = vpop.f32.mrb[19].mxu0 }
 0x193   : > { %v9129_v43 = vpack.c.bf16 %v1010_v35, %v1006_v29  ;;  %v1724_v55 = vadd.f32 %v1723_v49, %v9033_v62 }
 0x194   : > { %7313 = vmatmul.mubr.msk.bf16.vlgmr.msra.gmra.mrb[76].mxu1 %vm1780_vm1, %v9117_v27  ;;  %v1973_v46 = vsel %vm1780_vm1, %v9126_v38, 0  ;;  %v9140_v58 = vpack.c.bf16 %v1722_v48, %v1718_v39 }
 0x195   : > { %v1013_v52 = vpop.f32.mrb[20].mxu1  ;;  %7317 = vmatpush3.bf16.xpose.msra.mxu1 %v1973_v46  ;;  %7318 = vmatprep.mubr.msk.bf16.mxu1 %vm8523_vm0, %v11328_v41  ;;  %v9144_v63 = vpack.c.bf16 %v1724_v55, %v1720_v44 }
 0x196   : > { %v1015_v57 = vpop.f32.mrb[21].mxu1  ;;  %7322 = vmatprep.subr.bf16.mxu1 %v11328_v41  ;;  %v1014_v0 = vadd.f32 %v1013_v52, %v9026_v56 }
 0x197   : > { %v1016_v60 = vadd.f32 %v1015_v57, %v9020_v54  ;;  %v1017_v61 = vpop.f32.mrb[22].mxu1  ;;  %v1727_v8 = vpop.f32.mrb[20].mxu0 }
 0x198   : > { %v1018_v2 = vadd.f32 %v1017_v61, %v9026_v56  ;;  %v1019_v3 = vpop.f32.mrb[23].mxu1  ;;  %v1728_v10 = vadd.f32 %v1727_v8, %v9029_v59  ;;  %v1729_v11 = vpop.f32.mrb[21].mxu0 }
 0x199   : > { %v1020_v6 = vadd.f32 %v1019_v3, %v9020_v54  ;;  %v1730_v14 = vadd.f32 %v1729_v11, %v9033_v62  ;;  %v1731_v17 = vpop.f32.mrb[22].mxu0 }
 0x19a   : > { %v9149_v9 = vpack.c.bf16 %v1018_v2, %v1014_v0  ;;  %v1732_v20 = vadd.f32 %v1731_v17, %v9029_v59  ;;  %v1733_v21 = vpop.f32.mrb[23].mxu0 }
 0x19b   : > { %v9152_v13 = vpack.c.bf16 %v1020_v6, %v1016_v60  ;;  %v1734_v23 = vadd.f32 %v1733_v21, %v9033_v62 }
 0x19c   : > { %7319 = vmatmul.mubr.msk.bf16.vlgmr.msra.gmra.mrb[80].mxu1 %vm1780_vm1, %v9140_v58  ;;  %v2020_v18 = vsel %vm1780_vm1, %v9149_v9, 0  ;;  %v9163_v26 = vpack.c.bf16 %v1732_v20, %v1728_v10  ;;  %v1074_v20 = vld [vmem:[%s11308_s6] sm:$0x3] }
 0x19d   : > { %11368 = vst [vmem:[#allocation23_spill] sm:$0xff] %v9152_v13  ;;  %v1023_v22 = vpop.f32.mrb[24].mxu1  ;;  %7323 = vmatpush3.bf16.xpose.msra.mxu1 %v2020_v18  ;;  %7324 = vmatprep.mubr.msk.bf16.mxu1 %vm8523_vm0, %v11328_v41  ;;  %v9167_v32 = vpack.c.bf16 %v1734_v23, %v1730_v14 }
 0x19e   : > { %v1025_v24 = vpop.f32.mrb[25].mxu1  ;;  %7328 = vmatprep.subr.bf16.mxu1 %v11328_v41  ;;  %v1024_v33 = vadd.f32 %v1023_v22, %v9026_v56 }
 0x19f   : > { %v1026_v29 = vadd.f32 %v1025_v24, %v9020_v54  ;;  %v1027_v30 = vpop.f32.mrb[26].mxu1  ;;  %11369 = vst [vmem:[#allocation24_spill] sm:$0xff] %v9167_v32  ;;  %v1737_v39 = vpop.f32.mrb[24].mxu0 }
 0x1a0   : > { %v1028_v34 = vadd.f32 %v1027_v30, %v9026_v56  ;;  %v1029_v35 = vpop.f32.mrb[27].mxu1  ;;  %v1738_v44 = vadd.f32 %v1737_v39, %v9029_v59  ;;  %v1739_v45 = vpop.f32.mrb[25].mxu0 }
 0x1a1   : > { %v1030_v36 = vadd.f32 %v1029_v35, %v9020_v54  ;;  %v1740_v48 = vadd.f32 %v1739_v45, %v9033_v62  ;;  %v1741_v49 = vpop.f32.mrb[26].mxu0 }
 0x1a2   : > { %v9172_v42 = vpack.c.bf16 %v1028_v34, %v1024_v33  ;;  %v1742_v55 = vadd.f32 %v1741_v49, %v9029_v59  ;;  %v1743_v57 = vpop.f32.mrb[27].mxu0  ;;  %v9210_v34 = vrot.slane %v1074_v20, %v9017_v53 }
 0x1a3   : > { %v9175_v46 = vpack.c.bf16 %v1030_v36, %v1026_v29  ;;  %v1744_v61 = vadd.f32 %v1743_v57, %v9033_v62  ;;  %v9216_v36 = vrot.slane %v1074_v20, %v9012_v51 }
 0x1a4   : > { %7325 = vmatmul.mubr.msk.bf16.vlgmr.msra.gmra.mrb[84].mxu1 %vm1780_vm1, %v9163_v26  ;;  %v2067_v52 = vsel %vm1780_vm1, %v9172_v42, 0  ;;  %v9187_v3 = vpack.c.bf16 %v1742_v55, %v1738_v44 }
 0x1a5   : > { %v1033_v60 = vpop.f32.mrb[28].mxu1  ;;  %7329 = vmatpush3.bf16.xpose.msra.mxu1 %v2067_v52  ;;  %7330 = vmatprep.mubr.msk.bf16.mxu1 %vm8523_vm0, %v11328_v41  ;;  %v9191_v10 = vpack.c.bf16 %v1744_v61, %v1740_v48 }
 0x1a6   : > { %v1034_v0 = vadd.f32 %v1033_v60, %v9026_v56  ;;  %v1035_v2 = vpop.f32.mrb[29].mxu1  ;;  %7334 = vmatprep.subr.bf16.mxu1 %v11328_v41 }
 0x1a7   : > { %v1036_v6 = vadd.f32 %v1035_v2, %v9020_v54  ;;  %v1037_v8 = vpop.f32.mrb[30].mxu1  ;;  %11370 = vst [vmem:[#allocation25_spill] sm:$0xff] %v9191_v10  ;;  %v1747_v17 = vpop.f32.mrb[28].mxu0 }
 0x1a8   : > { %v1038_v11 = vadd.f32 %v1037_v8, %v9026_v56  ;;  %v1039_v14 = vpop.f32.mrb[31].mxu1  ;;  %v1748_v22 = vadd.f32 %v1747_v17, %v9029_v59  ;;  %v1749_v23 = vpop.f32.mrb[29].mxu0 }
 0x1a9   : > { %v1040_v18 = vadd.f32 %v1039_v14, %v9020_v54  ;;  %v1750_v24 = vadd.f32 %v1749_v23, %v9033_v62  ;;  %v1751_v29 = vpop.f32.mrb[30].mxu0 }
 0x1aa   : > { %v9198_v21 = vpack.c.bf16 %v1038_v11, %v1034_v0  ;;  %v1752_v56 = vadd.f32 %v1751_v29, %v9029_v59  ;;  %v1753_v33 = vpop.f32.mrb[31].mxu0 }
 0x1ab   : > { %v9202_v30 = vpack.c.bf16 %v1040_v18, %v1036_v6  ;;  %v1754_v35 = vadd.f32 %v1753_v33, %v9033_v62 }
 0x1ac   : > { %7331 = vmatmul.mubr.msk.bf16.vlgmr.msra.gmra.mrb[88].mxu1 %vm1780_vm1, %v9187_v3  ;;  %v2114_v54 = vsel %vm1780_vm1, %v9198_v21, 0  ;;  %v9218_v39 = vpack.c.bf16 %v1752_v56, %v1748_v22 }
 0x1ad   : > { %11371 = vst [vmem:[#allocation26_spill] sm:$0xff] %v9202_v30  ;;  %7335 = vmatpush3.bf16.xpose.msra.mxu1 %v2114_v54  ;;  %7336 = vmatprep.mubr.msk.bf16.mxu1 %vm8523_vm0, %v11328_v41  ;;  %v9221_v44 = vpack.c.bf16 %v1754_v35, %v1750_v24  ;;  %v1360_v59 = vpop.f32.mrb[32].mxu1 }
 0x1ae   : > { %7346 = vmatprep.subr.bf16.mxu1 %v11328_v41  ;;  %v1361_v45 = vadd.f32 %v1360_v59, %v9210_v34  ;;  %v1362_v48 = vpop.f32.mrb[33].mxu1 }
 0x1af   : > { %11372 = vst [vmem:[#allocation27_spill] sm:$0xff] %v9221_v44  ;;  %v1363_v49 = vadd.f32 %v1362_v48, %v9216_v36  ;;  %v1364_v52 = vpop.f32.mrb[34].mxu1 }
 0x1b0   : > { %v1365_v55 = vadd.f32 %v1364_v52, %v9210_v34  ;;  %v1366_v57 = vpop.f32.mrb[35].mxu1 }
 0x1b1   : > { %v1367_v62 = vadd.f32 %v1366_v57, %v9216_v36 }
 0x1b2   : > { %v9229_v60 = vpack.c.bf16 %v1365_v55, %v1361_v45 }
 0x1b3   : > { %v9231_v61 = vpack.c.bf16 %v1367_v62, %v1363_v49 }
 0x1b4   : > { %7337 = vmatmul.mubr.msk.bf16.vlgmr.msra.gmra.mrb[92].mxu1 %vm1780_vm1, %v9218_v39  ;;  %7341 = vmatpush3.bf16.msra.mxu0 %v9229_v60 }
 0x1b5   : > { %11373 = vst [vmem:[#allocation28_spill] sm:$0xff] %v9231_v61  ;;  %7348 = vmatprep.mubr.msk.bf16.mxu1 %vm8523_vm0, %v11328_v41  ;;  %v1370_v0 = vpop.f32.mrb[36].mxu1  ;;  %7352 = vmatprep.subr.bf16.mxu0 %v11328_v41 }
 0x1b6   : > { %v1371_v2 = vadd.f32 %v1370_v0, %v9210_v34  ;;  %v1372_v6 = vpop.f32.mrb[37].mxu1 }
 0x1b7   : > { %v1373_v8 = vadd.f32 %v1372_v6, %v9216_v36  ;;  %v1374_v11 = vpop.f32.mrb[38].mxu1 }
 0x1b8   : > { %v1375_v14 = vadd.f32 %v1374_v11, %v9210_v34  ;;  %v1376_v17 = vpop.f32.mrb[39].mxu1 }
 0x1b9   : > { %v1377_v18 = vadd.f32 %v1376_v17, %v9216_v36 }
 0x1ba   : > { %v9241_v20 = vpack.c.bf16 %v1375_v14, %v1371_v2 }
 0x1bb   : > { %v9243_v22 = vpack.c.bf16 %v1377_v18, %v1373_v8 }
 0x1bc   : > { %7347 = vmatpush3.bf16.msra.mxu1 %v9241_v20 }
 0x1bd   : > { %11374 = vst [vmem:[#allocation29_spill] sm:$0xff] %v9243_v22  ;;  %v1380_v23 = vpop.f32.mrb[40].mxu1  ;;  %7358 = vmatprep.subr.bf16.mxu1 %v11328_v41 }
 0x1be   : > { %v1381_v24 = vadd.f32 %v1380_v23, %v9210_v34  ;;  %v1382_v29 = vpop.f32.mrb[41].mxu1 }
 0x1bf   : > { %v1383_v54 = vadd.f32 %v1382_v29, %v9216_v36  ;;  %v1384_v56 = vpop.f32.mrb[42].mxu1 }
 0x1c0   : > { %v1385_v33 = vadd.f32 %v1384_v56, %v9210_v34  ;;  %v1386_v35 = vpop.f32.mrb[43].mxu1 }
 0x1c1   : > { %v1387_v59 = vadd.f32 %v1386_v35, %v9216_v36 }
 0x1c2   : > { %v9251_v45 = vpack.c.bf16 %v1385_v33, %v1381_v24 }
 0x1c3   : > { %v9253_v48 = vpack.c.bf16 %v1387_v59, %v1383_v54 }
 0x1c5   : > { %11375 = vst [vmem:[#allocation30_spill] sm:$0xff] %v9253_v48  ;;  %v1390_v49 = vpop.f32.mrb[44].mxu1 }
 0x1c6   : > { %v1391_v52 = vadd.f32 %v1390_v49, %v9210_v34  ;;  %v1392_v55 = vpop.f32.mrb[45].mxu1 }
 0x1c7   : > { %v1393_v57 = vadd.f32 %v1392_v55, %v9216_v36  ;;  %v1394_v62 = vpop.f32.mrb[46].mxu1 }
 0x1c8   : > { %v1395_v0 = vadd.f32 %v1394_v62, %v9210_v34  ;;  %v1396_v2 = vpop.f32.mrb[47].mxu1 }
 0x1c9   : > { %v1397_v6 = vadd.f32 %v1396_v2, %v9216_v36 }
 0x1ca   : > { %v9259_v8 = vpack.c.bf16 %v1395_v0, %v1391_v52 }
 0x1cb   : > { %v9261_v11 = vpack.c.bf16 %v1397_v6, %v1393_v57 }
 0x1cd   : > { %11376 = vst [vmem:[#allocation31_spill] sm:$0xff] %v9261_v11  ;;  %v1400_v14 = vpop.f32.mrb[48].mxu1 }
 0x1ce   : > { %v1401_v17 = vadd.f32 %v1400_v14, %v9210_v34  ;;  %v1402_v18 = vpop.f32.mrb[49].mxu1 }
 0x1cf   : > { %v1403_v23 = vadd.f32 %v1402_v18, %v9216_v36  ;;  %v1404_v24 = vpop.f32.mrb[50].mxu1 }
 0x1d0   : > { %v1405_v29 = vadd.f32 %v1404_v24, %v9210_v34  ;;  %v1406_v54 = vpop.f32.mrb[51].mxu1 }
 0x1d1   : > { %v1407_v56 = vadd.f32 %v1406_v54, %v9216_v36 }
 0x1d2   : > { %v9267_v33 = vpack.c.bf16 %v1405_v29, %v1401_v17 }
 0x1d3   : > { %v9269_v35 = vpack.c.bf16 %v1407_v56, %v1403_v23 }
 0x1d5   : > { %11377 = vst [vmem:[#allocation32_spill] sm:$0xff] %v9269_v35  ;;  %v1410_v59 = vpop.f32.mrb[52].mxu1 }
 0x1d6   : > { %v1411_v49 = vadd.f32 %v1410_v59, %v9210_v34  ;;  %v1412_v52 = vpop.f32.mrb[53].mxu1 }
 0x1d7   : > { %v1413_v55 = vadd.f32 %v1412_v52, %v9216_v36  ;;  %v1414_v57 = vpop.f32.mrb[54].mxu1 }
 0x1d8   : > { %v1415_v62 = vadd.f32 %v1414_v57, %v9210_v34  ;;  %v1416_v0 = vpop.f32.mrb[55].mxu1 }
 0x1d9   : > { %v1417_v2 = vadd.f32 %v1416_v0, %v9216_v36 }
 0x1da   : > { %v9275_v6 = vpack.c.bf16 %v1415_v62, %v1411_v49 }
 0x1db   : > { %v9277_v14 = vpack.c.bf16 %v1417_v2, %v1413_v55 }
 0x1dd   : > { %11378 = vst [vmem:[#allocation33_spill] sm:$0xff] %v9277_v14  ;;  %v1420_v17 = vpop.f32.mrb[56].mxu1 }
 0x1de   : > { %v1421_v18 = vadd.f32 %v1420_v17, %v9210_v34  ;;  %v1422_v23 = vpop.f32.mrb[57].mxu1 }
 0x1df   : > { %v1423_v24 = vadd.f32 %v1422_v23, %v9216_v36  ;;  %v1424_v29 = vpop.f32.mrb[58].mxu1 }
 0x1e0   : > { %v1425_v54 = vadd.f32 %v1424_v29, %v9210_v34  ;;  %v1426_v56 = vpop.f32.mrb[59].mxu1 }
 0x1e1   : > { %v1427_v59 = vadd.f32 %v1426_v56, %v9216_v36 }
 0x1e2   : > { %v9283_v52 = vpack.c.bf16 %v1425_v54, %v1421_v18 }
 0x1e3   : > { %v9285_v57 = vpack.c.bf16 %v1427_v59, %v1423_v24 }
 0x1e5   : > { %11379 = vst [vmem:[#allocation34_spill] sm:$0xff] %v9285_v57  ;;  %v1430_v49 = vpop.f32.mrb[60].mxu1 }
 0x1e6   : > { %v1431_v55 = vadd.f32 %v1430_v49, %v9210_v34  ;;  %v1432_v62 = vpop.f32.mrb[61].mxu1 }
 0x1e7   : > { %v1433_v0 = vadd.f32 %v1432_v62, %v9216_v36  ;;  %v1434_v2 = vpop.f32.mrb[62].mxu1 }
 0x1e8   : > { %v1435_v17 = vadd.f32 %v1434_v2, %v9210_v34  ;;  %v1436_v23 = vpop.f32.mrb[63].mxu1 }
 0x1e9   : > { %v1437_v41 = vadd.f32 %v1436_v23, %v9216_v36 }
 0x1ea   : > { %v9291_v29 = vpack.c.bf16 %v1435_v17, %v1431_v55 }
 0x1eb   : > { %v9293_v51 = vpack.c.bf16 %v1437_v41, %v1433_v0 }
 0x1ed   : > { %11380 = vst [vmem:[#allocation35_spill] sm:$0xff] %v9293_v51 }
 0x24f   : > { %v1821_v18 = vpop.f32.mrb[64].mxu1 }
 0x250   : > { %v9295_v24 = vmul.f32 0.25, %v1821_v18  ;;  %v7296_v54 = vpop.f32.mrb[65].mxu1 }
 0x251   : > { %v1824_v56 = vpop.f32.mrb[66].mxu1 }
 0x252   : > { %v2174_v59 = vsel %vm2173_vm2, %v9295_v24, -inf  ;;  %v9299_v49 = vmul.f32 0.25, %v1824_v56  ;;  %v7297_v62 = vpop.f32.mrb[67].mxu1 }
 0x253   : > { %2175 = vmax.xlane.f32.xlu0 %v2174_v59 }
 0x254   : > { %v2177_v34 = vsel %vm2173_vm2, %v9299_v49, -inf }
 0x257   : > { %2178 = vmax.xlane.f32.xlu0 %v2177_v34  ;;  %v1868_v36 = vpop.f32.mrb[68].mxu1 }
 0x258   : > { %v9303_v41 = vmul.f32 0.25, %v1868_v36  ;;  %v7302_v55 = vpop.f32.mrb[69].mxu1 }
 0x259   : > { %v1871_v0 = vpop.f32.mrb[70].mxu1 }
 0x25a   : > { %v2180_v2 = vsel %vm2173_vm2, %v9303_v41, -inf  ;;  %v9307_v17 = vmul.f32 0.25, %v1871_v0  ;;  %v7303_v23 = vpop.f32.mrb[71].mxu1 }
 0x25b   : > { %2181 = vmax.xlane.f32.xlu1 %v2180_v2 }
 0x25c   : > { %v2183_v18 = vsel %vm2173_vm2, %v9307_v17, -inf }
 0x25f   : > { %2184 = vmax.xlane.f32.xlu1 %v2183_v18  ;;  %v1915_v54 = vpop.f32.mrb[72].mxu1 }
 0x260   : > { %v9311_v56 = vmul.f32 0.25, %v1915_v54  ;;  %v7308_v59 = vpop.f32.mrb[73].mxu1 }
 0x261   : > { %v1918_v62 = vpop.f32.mrb[74].mxu1 }
 0x262   : > { %v9313_v34 = vmul.f32 0.25, %v1918_v62  ;;  %v2186_v36 = vsel %vm2173_vm2, %v9311_v56, -inf  ;;  %v7309_v55 = vpop.f32.mrb[75].mxu1 }
 0x263   : > { %2187 = vmax.xlane.f32.xlu0 %v2186_v36 }
 0x264   : > { %v2189_v0 = vsel %vm2173_vm2, %v9313_v34, -inf }
 0x265   : > { %2190 = vmax.xlane.f32.xlu1 %v2189_v0 }
 0x267   : > { %v1962_v2 = vpop.f32.mrb[76].mxu1 }
 0x268   : > { %v9319_v23 = vmul.f32 0.25, %v1962_v2  ;;  %v7314_v18 = vpop.f32.mrb[77].mxu1 }
 0x269   : > { %v1965_v53 = vpop.f32.mrb[78].mxu1 }
 0x26a   : > { %v9321_v54 = vmul.f32 0.25, %v1965_v53  ;;  %v2192_v59 = vsel %vm2173_vm2, %v9319_v23, -inf  ;;  %v7315_v62 = vpop.f32.mrb[79].mxu1 }
 0x26b   : > { %2193 = vmax.xlane.f32.xlu0 %v2192_v59 }
 0x26c   : > { %v2195_v55 = vsel %vm2173_vm2, %v9321_v54, -inf }
 0x26d   : > { %2196 = vmax.xlane.f32.xlu1 %v2195_v55 }
 0x26f   : > { %v2009_v36 = vpop.f32.mrb[80].mxu1 }
 0x270   : > { %v9327_v51 = vmul.f32 0.25, %v2009_v36  ;;  %v7320_v0 = vpop.f32.mrb[81].mxu1 }
 0x271   : > { %v2012_v57 = vpop.f32.mrb[82].mxu1 }
 0x272   : > { %v9329_v2 = vmul.f32 0.25, %v2012_v57  ;;  %v2198_v53 = vsel %vm2173_vm2, %v9327_v51, -inf  ;;  %v7321_v18 = vpop.f32.mrb[83].mxu1 }
 0x273   : > { %2199 = vmax.xlane.f32.xlu0 %v2198_v53 }
 0x274   : > { %v2201_v62 = vsel %vm2173_vm2, %v9329_v2, -inf }
 0x275   : > { %2202 = vmax.xlane.f32.xlu1 %v2201_v62 }
 0x277   : > { %v2056_v59 = vpop.f32.mrb[84].mxu1 }
 0x278   : > { %v9335_v14 = vmul.f32 0.25, %v2056_v59  ;;  %v7326_v55 = vpop.f32.mrb[85].mxu1 }
 0x279   : > { %v2059_v35 = vpop.f32.mrb[86].mxu1 }
 0x27a   : > { %v9337_v36 = vmul.f32 0.25, %v2059_v35  ;;  %v2204_v57 = vsel %vm2173_vm2, %v9335_v14, -inf  ;;  %v7327_v0 = vpop.f32.mrb[87].mxu1 }
 0x27b   : > { %2205 = vmax.xlane.f32.xlu0 %v2204_v57 }
 0x27c   : > { %v2207_v18 = vsel %vm2173_vm2, %v9337_v36, -inf }
 0x27d   : > { %2208 = vmax.xlane.f32.xlu1 %v2207_v18 }
 0x27f   : > { %v2103_v53 = vpop.f32.mrb[88].mxu1 }
 0x280   : > { %v9343_v11 = vmul.f32 0.25, %v2103_v53  ;;  %v7332_v62 = vpop.f32.mrb[89].mxu1 }
 0x281   : > { %v2106_v48 = vpop.f32.mrb[90].mxu1 }
 0x282   : > { %v9345_v59 = vmul.f32 0.25, %v2106_v48  ;;  %v2210_v35 = vsel %vm2173_vm2, %v9343_v11, -inf  ;;  %v7333_v55 = vpop.f32.mrb[91].mxu1 }
 0x283   : > { %2211 = vmax.xlane.f32.xlu0 %v2210_v35 }
 0x284   : > { %v2213_v0 = vsel %vm2173_vm2, %v9345_v59, -inf }
 0x285   : > { %2214 = vmax.xlane.f32.xlu1 %v2213_v0 }
 0x287   : > { %v2150_v57 = vpop.f32.mrb[92].mxu1 }
 0x288   : > { %v9351_v22 = vmul.f32 0.25, %v2150_v57  ;;  %v7338_v18 = vpop.f32.mrb[93].mxu1 }
 0x289   : > { %v2153_v44 = vpop.f32.mrb[94].mxu1 }
 0x28a   : > { %v9353_v53 = vmul.f32 0.25, %v2153_v44  ;;  %v2216_v48 = vsel %vm2173_vm2, %v9351_v22, -inf  ;;  %v7339_v62 = vpop.f32.mrb[95].mxu1 }
 0x28b   : > { %2217 = vmax.xlane.f32.xlu0 %v2216_v48 }
 0x28c   : > { %v2219_v55 = vsel %vm2173_vm2, %v9353_v53, -inf }
 0x28d   : > { %2220 = vmax.xlane.f32.xlu1 %v2219_v55 }
 0x2e0   : > { %v2176_v35 = vpop.xlane.xlu0 %2175 }
 0x2e1   : > { %v2222_v30 = vsub.f32 %v9295_v24, %v2176_v35 }
 0x2e3   : > { %v2238_v0 = vmul.f32 1.442695, %v2222_v30 }
 0x2e4   : > { %v2179_v32 = vpop.xlane.xlu0 %2178 }
 0x2e5   : > { %8070 = vpow2.f32 %v2238_v0  ;;  %v2223_v57 = vsub.f32 %v9299_v49, %v2179_v32 }
 0x2e7   : > { %v2240_v18 = vmul.f32 1.442695, %v2223_v57 }
 0x2e8   : > { %v2182_v44 = vpop.xlane.xlu1 %2181 }
 0x2e9   : > { %8072 = vpow2.f32 %v2240_v18  ;;  %v2224_v61 = vsub.f32 %v9303_v41, %v2182_v44 }
 0x2eb   : > { %v2242_v10 = vmul.f32 1.442695, %v2224_v61 }
 0x2ec   : > { %v2185_v62 = vpop.xlane.xlu1 %2184 }
 0x2ed   : > { %8074 = vpow2.f32 %v2242_v10  ;;  %v2225_v48 = vsub.f32 %v9307_v17, %v2185_v62 }
 0x2ef   : > { %v9363_v13 = vpop.eup %8070  ;;  %v2244_v55 = vmul.f32 1.442695, %v2225_v48 }
 0x2f0   : > { %v2188_v31 = vpop.xlane.xlu0 %2187  ;;  %v2270_v30 = vsel %vm2173_vm2, %v9363_v13, 0.0 }
 0x2f1   : > { %8076 = vpow2.f32 %v2244_v55  ;;  %v2226_v32 = vsub.f32 %v9311_v56, %v2188_v31  ;;  %2271 = vadd.xlane.f32.xlu0 %v2270_v30 }
 0x2f2   : > { %v2191_v24 = vpop.xlane.xlu1 %2190 }
 0x2f3   : > { %v9368_v49 = vpop.eup %8072  ;;  %v2246_v41 = vmul.f32 1.442695, %v2226_v32  ;;  %v2227_v61 = vsub.f32 %v9313_v34, %v2191_v24 }
 0x2f4   : > { %v2273_v10 = vsel %vm2173_vm2, %v9368_v49, 0.0 }
 0x2f5   : > { %8078 = vpow2.f32 %v2246_v41  ;;  %v2248_v17 = vmul.f32 1.442695, %v2227_v61  ;;  %2274 = vadd.xlane.f32.xlu1 %v2273_v10 }
 0x2f7   : > { %v9373_v35 = vpop.eup %8074  ;;  %8080 = vpow2.f32 %v2248_v17 }
 0x2f8   : > { %v2194_v0 = vpop.xlane.xlu0 %2193  ;;  %v2276_v31 = vsel %vm2173_vm2, %v9373_v35, 0.0 }
 0x2f9   : > { %v2228_v56 = vsub.f32 %v9319_v23, %v2194_v0  ;;  %2277 = vadd.xlane.f32.xlu0 %v2276_v31 }
 0x2fa   : > { %v2197_v57 = vpop.xlane.xlu1 %2196 }
 0x2fb   : > { %v9378_v18 = vpop.eup %8076  ;;  %v2250_v34 = vmul.f32 1.442695, %v2228_v56  ;;  %v2229_v44 = vsub.f32 %v9321_v54, %v2197_v57 }
 0x2fc   : > { %v2279_v62 = vsel %vm2173_vm2, %v9378_v18, 0.0 }
 0x2fd   : > { %8082 = vpow2.f32 %v2250_v34  ;;  %v2252_v48 = vmul.f32 1.442695, %v2229_v44  ;;  %2280 = vadd.xlane.f32.xlu1 %v2279_v62 }
 0x2ff   : > { %v9383_v55 = vpop.eup %8078  ;;  %8084 = vpow2.f32 %v2252_v48 }
 0x300   : > { %v2200_v30 = vpop.xlane.xlu0 %2199  ;;  %v2282_v23 = vsel %vm2173_vm2, %v9383_v55, 0.0 }
 0x301   : > { %v9387_v32 = vpop.eup %8080  ;;  %v2230_v24 = vsub.f32 %v9327_v51, %v2200_v30  ;;  %2283 = vadd.xlane.f32.xlu0 %v2282_v23 }
 0x302   : > { %v2203_v41 = vpop.xlane.xlu1 %2202  ;;  %v2285_v54 = vsel %vm2173_vm2, %v9387_v32, 0.0 }
 0x303   : > { %v2254_v61 = vmul.f32 1.442695, %v2230_v24  ;;  %v2231_v10 = vsub.f32 %v9329_v2, %v2203_v41  ;;  %2286 = vadd.xlane.f32.xlu1 %v2285_v54 }
 0x305   : > { %8086 = vpow2.f32 %v2254_v61  ;;  %v2256_v17 = vmul.f32 1.442695, %v2231_v10 }
 0x307   : > { %v9393_v0 = vpop.eup %8082  ;;  %8088 = vpow2.f32 %v2256_v17 }
 0x308   : > { %v2206_v31 = vpop.xlane.xlu0 %2205  ;;  %v2288_v56 = vsel %vm2173_vm2, %v9393_v0, 0.0 }
 0x309   : > { %v9397_v57 = vpop.eup %8084  ;;  %v2232_v51 = vsub.f32 %v9335_v14, %v2206_v31  ;;  %2289 = vadd.xlane.f32.xlu0 %v2288_v56 }
 0x30a   : > { %v2209_v34 = vpop.xlane.xlu1 %2208  ;;  %v2291_v44 = vsel %vm2173_vm2, %v9397_v57, 0.0 }
 0x30b   : > { %v2258_v2 = vmul.f32 1.442695, %v2232_v51  ;;  %v2233_v62 = vsub.f32 %v9337_v36, %v2209_v34  ;;  %2292 = vadd.xlane.f32.xlu1 %v2291_v44 }
 0x30d   : > { %8090 = vpow2.f32 %v2258_v2  ;;  %v2260_v48 = vmul.f32 1.442695, %v2233_v62 }
 0x30f   : > { %v9403_v30 = vpop.eup %8086  ;;  %8092 = vpow2.f32 %v2260_v48 }
 0x310   : > { %v2212_v23 = vpop.xlane.xlu0 %2211  ;;  %v2294_v24 = vsel %vm2173_vm2, %v9403_v30, 0.0 }
 0x311   : > { %v9407_v41 = vpop.eup %8088  ;;  %v2234_v14 = vsub.f32 %v9343_v11, %v2212_v23  ;;  %2295 = vadd.xlane.f32.xlu0 %v2294_v24 }
 0x312   : > { %v2215_v54 = vpop.xlane.xlu1 %2214  ;;  %v2297_v61 = vsel %vm2173_vm2, %v9407_v41, 0.0 }
 0x313   : > { %v2262_v36 = vmul.f32 1.442695, %v2234_v14  ;;  %v2235_v10 = vsub.f32 %v9345_v59, %v2215_v54  ;;  %2298 = vadd.xlane.f32.xlu1 %v2297_v61 }
 0x315   : > { %8094 = vpow2.f32 %v2262_v36  ;;  %v2264_v17 = vmul.f32 1.442695, %v2235_v10 }
 0x317   : > { %v9413_v31 = vpop.eup %8090  ;;  %8096 = vpow2.f32 %v2264_v17 }
 0x318   : > { %v2218_v56 = vpop.xlane.xlu0 %2217  ;;  %v2300_v51 = vsel %vm2173_vm2, %v9413_v31, 0.0 }
 0x319   : > { %v9417_v34 = vpop.eup %8092  ;;  %v2236_v11 = vsub.f32 %v9351_v22, %v2218_v56  ;;  %2301 = vadd.xlane.f32.xlu0 %v2300_v51 }
 0x31a   : > { %v2303_v44 = vsel %vm2173_vm2, %v9417_v34, 0.0  ;;  %v2221_v14 = vpop.xlane.xlu1 %2220 }
 0x31b   : > { %v2266_v2 = vmul.f32 1.442695, %v2236_v11  ;;  %2304 = vadd.xlane.f32.xlu1 %v2303_v44  ;;  %v2237_v54 = vsub.f32 %v9353_v53, %v2221_v14 }
 0x31d   : > { %8098 = vpow2.f32 %v2266_v2 }
 0x31f   : > { %v9422_v59 = vpop.eup %8094 }
 0x320   : > { %v2306_v62 = vsel %vm2173_vm2, %v9422_v59, 0.0 }
 0x321   : > { %v9426_v48 = vpop.eup %8096  ;;  %2307 = vadd.xlane.f32.xlu0 %v2306_v62 }
 0x322   : > { %v2309_v23 = vsel %vm2173_vm2, %v9426_v48, 0.0 }
 0x323   : > { %2310 = vadd.xlane.f32.xlu1 %v2309_v23 }
 0x327   : > { %v9430_v22 = vpop.eup %8098 }
 0x328   : > { %v2312_v24 = vsel %vm2173_vm2, %v9430_v22, 0.0 }
 0x329   : > { %2313 = vadd.xlane.f32.xlu0 %v2312_v24 }
 0x334   : > { %2727 = vrot.lane.b32.xlu1 %v9048_v16, %s8524_s29  ;;  %v2268_v16 = vmul.f32 1.442695, %v2237_v54 }
 0x336   : > { %8100 = vpow2.f32 %v2268_v16 }
 0x338   : > { %2783 = vrot.lane.b32.xlu1 %v9057_v25, %s8524_s29 }
 0x33c   : > { %2836 = vrot.lane.b32.xlu1 %v9080_v47, %s8524_s29 }
 0x33f   : > { %2730 = vrot.lane.b32.xlu0 %v9038_v4, %s8524_s29 }
 0x340   : > { %v9457_v4 = vpop.eup %8100 }
 0x341   : > { %v2315_v25 = vsel %vm2173_vm2, %v9457_v4, 0.0 }
 0x343   : > { %2780 = vrot.lane.b32.xlu0 %v9071_v37, %s8524_s29 }
 0x347   : > { %2889 = vrot.lane.b32.xlu0 %v9103_v12, %s8524_s29 }
 0x34b   : > { %2886 = vrot.lane.b32.xlu0 %v9117_v27, %s8524_s29 }
 0x34f   : > { %2995 = vrot.lane.b32.xlu0 %v9149_v9, %s8524_s29 }
 0x353   : > { %2992 = vrot.lane.b32.xlu0 %v9163_v26, %s8524_s29 }
 0x357   : > { %3101 = vrot.lane.b32.xlu0 %v9198_v21, %s8524_s29 }
 0x35b   : > { %3368 = vrot.lane.b32.xlu0 %v9229_v60, %s8524_s29 }
 0x360   : > { %2316 = vadd.xlane.f32.xlu1 %v2315_v25 }
 0x371   : > { %2833 = vrot.lane.b32.xlu1 %v9094_v1, %s8524_s29 }
 0x375   : > { %2942 = vrot.lane.b32.xlu1 %v9126_v38, %s8524_s29 }
 0x379   : > { %2939 = vrot.lane.b32.xlu1 %v9140_v58, %s8524_s29 }
 0x37d   : > { %3048 = vrot.lane.b32.xlu1 %v9172_v42, %s8524_s29 }
 0x37e   : > { %v2272_v37 = vpop.xlane.xlu0 %2271 }
 0x37f   : > { %8102 = vrcp.f32 %v2272_v37 }
 0x381   : > { %3045 = vrot.lane.b32.xlu1 %v9187_v3, %s8524_s29 }
 0x382   : > { %v2275_v47 = vpop.xlane.xlu1 %2274 }
 0x383   : > { %8104 = vrcp.f32 %v2275_v47 }
 0x385   : > { %3098 = vrot.lane.b32.xlu1 %v9218_v39, %s8524_s29  ;;  %v11381_v39 = vmov 0.0  }
 0x386   : > { %v2278_v1 = vpop.xlane.xlu0 %2277 }
 0x387   : > { %8106 = vrcp.f32 %v2278_v1 }
 0x389   : > { %v8103_v12 = vpop.eup %8102  ;;  %3416 = vrot.lane.b32.xlu1 %v9241_v20, %s8524_s29 }
 0x38a   : > { %v2334_v27 = vmul.f32 %v8103_v12, %v9363_v13  ;;  %v2281_v38 = vpop.xlane.xlu1 %2280 }
 0x38b   : > { %8108 = vrcp.f32 %v2281_v38 }
 0x38c   : > { %2350 = vst.msk [vmem:[%s9480_s26] sm:$0xff] %vm2173_vm2, %v2334_v27 }
 0x38d   : > { %v8105_v58 = vpop.eup %8104 }
 0x38e   : > { %v2335_v9 = vmul.f32 %v8105_v58, %v9368_v49  ;;  %v2284_v26 = vpop.xlane.xlu0 %2283 }
 0x38f   : > { %8110 = vrcp.f32 %v2284_v26 }
 0x390   : > { %2351 = vst.msk [vmem:[%s9480_s26 + $0x8] sm:$0xff] %vm2173_vm2, %v2335_v9  ;;  %v2366_v42 = vpack.c.bf16 %v2335_v9, %v2334_v27  ;;  %v2287_v3 = vpop.xlane.xlu1 %2286 }
 0x391   : > { %v8107_v13 = vpop.eup %8106  ;;  %8112 = vrcp.f32 %v2287_v3 }
 0x392   : > { %v2336_v21 = vmul.f32 %v8107_v13, %v9373_v35  ;;  %7343 = vmatmul.mubr.msk.bf16.vlgmr.msra.gmra.mrb[32].mxu0 %vm2173_vm2, %v2366_v42 }
 0x393   : > { %7353 = vmatpush3.bf16.msra.mxu0 %v9251_v45  ;;  %7354 = vmatprep.mubr.msk.bf16.mxu0 %vm8523_vm0, %v11381_v39 }
 0x394   : > { %2352 = vst.msk [vmem:[%s9480_s26 + $0x40] sm:$0xff] %vm2173_vm2, %v2336_v21  ;;  %7364 = vmatprep.subr.bf16.mxu0 %v11381_v39 }
 0x395   : > { %v8109_v60 = vpop.eup %8108 }
 0x396   : > { %v2337_v20 = vmul.f32 %v8109_v60, %v9378_v18  ;;  %v2290_v53 = vpop.xlane.xlu0 %2289 }
 0x397   : > { %8114 = vrcp.f32 %v2290_v53 }
 0x398   : > { %2353 = vst.msk [vmem:[%s9480_s26 + $0x48] sm:$0xff] %vm2173_vm2, %v2337_v20  ;;  %v2293_v49 = vpop.xlane.xlu1 %2292  ;;  %v2367_v35 = vpack.c.bf16 %v2337_v20, %v2336_v21 }
 0x399   : > { %v8111_v61 = vpop.eup %8110  ;;  %8116 = vrcp.f32 %v2293_v49 }
 0x39a   : > { %v2338_v36 = vmul.f32 %v8111_v61, %v9383_v55  ;;  %7349 = vmatmul.mubr.msk.bf16.vlgmr.msra.gmra.mrb[96].mxu1 %vm2173_vm2, %v2367_v35 }
 0x39b   : > { %v8113_v10 = vpop.eup %8112  ;;  %7359 = vmatpush3.bf16.msra.mxu1 %v9259_v8  ;;  %7360 = vmatprep.mubr.msk.bf16.mxu1 %vm8523_vm0, %v11381_v39 }
 0x39c   : > { %2354 = vst.msk [vmem:[%s9480_s26 + $0x80] sm:$0xff] %vm2173_vm2, %v2338_v36  ;;  %v2339_v18 = vmul.f32 %v8113_v10, %v9387_v32  ;;  %7370 = vmatprep.subr.bf16.mxu1 %v11381_v39 }
 0x39e   : > { %2355 = vst.msk [vmem:[%s9480_s26 + $0x88] sm:$0xff] %vm2173_vm2, %v2339_v18  ;;  %v2296_v17 = vpop.xlane.xlu0 %2295  ;;  %v2368_v55 = vpack.c.bf16 %v2339_v18, %v2338_v36 }
 0x39f   : > { %8118 = vrcp.f32 %v2296_v17 }
 0x3a0   : > { %7355 = vmatmul.mubr.msk.bf16.vlgmr.msra.gmra.mrb[36].mxu0 %vm2173_vm2, %v2368_v55  ;;  %v2299_v56 = vpop.xlane.xlu1 %2298 }
 0x3a1   : > { %v8115_v51 = vpop.eup %8114  ;;  %7365 = vmatpush3.bf16.msra.mxu0 %v9267_v33  ;;  %8120 = vrcp.f32 %v2299_v56  ;;  %7366 = vmatprep.mubr.msk.bf16.mxu0 %vm8523_vm0, %v11381_v39 }
 0x3a2   : > { %v2340_v32 = vmul.f32 %v8115_v51, %v9393_v0  ;;  %7376 = vmatprep.subr.bf16.mxu0 %v11381_v39 }
 0x3a3   : > { %v8117_v11 = vpop.eup %8116 }
 0x3a4   : > { %2356 = vst.msk [vmem:[%s9480_s26 + $0xc0] sm:$0xff] %vm2173_vm2, %v2340_v32  ;;  %v2341_v44 = vmul.f32 %v8117_v11, %v9397_v57 }
 0x3a6   : > { %2357 = vst.msk [vmem:[%s9480_s26 + $0xc8] sm:$0xff] %vm2173_vm2, %v2341_v44  ;;  %v2302_v2 = vpop.xlane.xlu0 %2301  ;;  %v2369_v62 = vpack.c.bf16 %v2341_v44, %v2340_v32 }
 0x3a7   : > { %8122 = vrcp.f32 %v2302_v2 }
 0x3a8   : > { %7361 = vmatmul.mubr.msk.bf16.vlgmr.msra.gmra.mrb[100].mxu1 %vm2173_vm2, %v2369_v62  ;;  %v2305_v23 = vpop.xlane.xlu1 %2304 }
 0x3a9   : > { %v8119_v24 = vpop.eup %8118  ;;  %7371 = vmatpush3.bf16.msra.mxu1 %v9275_v6  ;;  %8124 = vrcp.f32 %v2305_v23  ;;  %7372 = vmatprep.mubr.msk.bf16.mxu1 %vm8523_vm0, %v11381_v39 }
 0x3aa   : > { %v2342_v0 = vmul.f32 %v8119_v24, %v9403_v30  ;;  %7382 = vmatprep.subr.bf16.mxu1 %v11381_v39 }
 0x3ab   : > { %v8121_v57 = vpop.eup %8120 }
 0x3ac   : > { %2358 = vst.msk [vmem:[%s9480_s26 + $0x100] sm:$0xff] %vm2173_vm2, %v2342_v0  ;;  %v2343_v14 = vmul.f32 %v8121_v57, %v9407_v41 }
 0x3ae   : > { %2359 = vst.msk [vmem:[%s9480_s26 + $0x108] sm:$0xff] %vm2173_vm2, %v2343_v14  ;;  %v2308_v54 = vpop.xlane.xlu0 %2307  ;;  %v2370_v16 = vpack.c.bf16 %v2343_v14, %v2342_v0 }
 0x3af   : > { %8126 = vrcp.f32 %v2308_v54 }
 0x3b0   : > { %7367 = vmatmul.mubr.msk.bf16.vlgmr.msra.gmra.mrb[40].mxu0 %vm2173_vm2, %v2370_v16  ;;  %v2311_v25 = vpop.xlane.xlu1 %2310 }
 0x3b1   : > { %v8123_v37 = vpop.eup %8122  ;;  %7377 = vmatpush3.bf16.msra.mxu0 %v9283_v52  ;;  %8128 = vrcp.f32 %v2311_v25  ;;  %7378 = vmatprep.mubr.msk.bf16.mxu0 %vm8523_vm0, %v11381_v39 }
 0x3b2   : > { %v2344_v30 = vmul.f32 %v8123_v37, %v9413_v31  ;;  %7388 = vmatprep.subr.bf16.mxu0 %v11381_v39 }
 0x3b3   : > { %v8125_v41 = vpop.eup %8124 }
 0x3b4   : > { %2360 = vst.msk [vmem:[%s9480_s26 + $0x140] sm:$0xff] %vm2173_vm2, %v2344_v30  ;;  %v2345_v47 = vmul.f32 %v8125_v41, %v9417_v34  ;;  %v2728_v38 = vpop.permute.xlu1 %2727 }
 0x3b6   : > { %2361 = vst.msk [vmem:[%s9480_s26 + $0x148] sm:$0xff] %vm2173_vm2, %v2345_v47  ;;  %v2314_v1 = vpop.xlane.xlu0 %2313  ;;  %v2371_v12 = vpack.c.bf16 %v2345_v47, %v2344_v30 }
 0x3b7   : > { %8130 = vrcp.f32 %v2314_v1 }
 0x3b8   : > { %7373 = vmatmul.mubr.msk.bf16.vlgmr.msra.gmra.mrb[104].mxu1 %vm2173_vm2, %v2371_v12  ;;  %v2784_v42 = vpop.permute.xlu1 %2783 }
 0x3b9   : > { %v8127_v27 = vpop.eup %8126  ;;  %7383 = vmatpush3.bf16.msra.mxu1 %v9291_v29  ;;  %7384 = vmatprep.mubr.msk.bf16.mxu1 %vm8523_vm0, %v11381_v39  ;;  %v2789_v51 = vsel %vm1780_vm1, %v2784_v42, 0 }
 0x3ba   : > { %v2346_v31 = vmul.f32 %v8127_v27, %v9422_v59  ;;  %7394 = vmatprep.subr.bf16.mxu1 %v11381_v39  ;;  %v2731_v9 = vpop.permute.xlu0 %2730 }
 0x3bb   : > { %v8129_v34 = vpop.eup %8128  ;;  %v2736_v3 = vsel %vm1780_vm1, %v2731_v9, 0 }
 0x3bc   : > { %2362 = vst.msk [vmem:[%s9480_s26 + $0x180] sm:$0xff] %vm2173_vm2, %v2346_v31  ;;  %v2347_v58 = vmul.f32 %v8129_v34, %v9426_v48  ;;  %v2837_v48 = vpop.permute.xlu1 %2836 }
 0x3bd   : > { %v2842_v21 = vsel %vm1780_vm1, %v2837_v48, 0 }
 0x3be   : > { %2363 = vst.msk [vmem:[%s9480_s26 + $0x188] sm:$0xff] %vm2173_vm2, %v2347_v58  ;;  %v2372_v26 = vpack.c.bf16 %v2347_v58, %v2346_v31  ;;  %v2781_v60 = vpop.permute.xlu0 %2780 }
 0x3c0   : > { %7379 = vmatmul.mubr.msk.bf16.vlgmr.msra.gmra.mrb[44].mxu0 %vm2173_vm2, %v2372_v26 }
 0x3c1   : > { %v8131_v13 = vpop.eup %8130  ;;  %7389 = vmatpush3.bf16.xpose.msra.mxu0 %v2736_v3  ;;  %7390 = vmatprep.mubr.msk.bf16.mxu0 %vm8523_vm0, %v11381_v39 }
 0x3c2   : > { %v2348_v59 = vmul.f32 %v8131_v13, %v9430_v22  ;;  %7400 = vmatprep.subr.bf16.mxu0 %v11381_v39  ;;  %v2890_v20 = vpop.permute.xlu0 %2889 }
 0x3c3   : > { %v2895_v44 = vsel %vm1780_vm1, %v2890_v20, 0 }
 0x3c4   : > { %2364 = vst.msk [vmem:[%s9480_s26 + $0x1c0] sm:$0xff] %vm2173_vm2, %v2348_v59 }
 0x3c6   : > { %v2887_v22 = vpop.permute.xlu0 %2886 }
 0x3c8   : > { %7391 = vmatmul.mubr.msk.bf16.vlgmr.msra.gmra.mrb[48].mxu0 %vm1780_vm1, %v2728_v38 }
 0x3c9   : > { %7401 = vmatpush3.bf16.xpose.msra.mxu0 %v2842_v21  ;;  %7402 = vmatprep.mubr.msk.bf16.mxu0 %vm8523_vm0, %v11381_v39 }
 0x3ca   : > { %7412 = vmatprep.subr.bf16.mxu0 %v11381_v39  ;;  %v2996_v35 = vpop.permute.xlu0 %2995 }
 0x3cb   : > { %v3001_v23 = vsel %vm1780_vm1, %v2996_v35, 0 }
 0x3ce   : > { %v2993_v55 = vpop.permute.xlu0 %2992 }
 0x3ed   : > { %v2317_v53 = vpop.xlane.xlu1 %2316 }
 0x3ee   : > { %8132 = vrcp.f32 %v2317_v53 }
 0x3f1   : > { %v2834_v49 = vpop.permute.xlu1 %2833 }
 0x3f2   : > { %7403 = vmatmul.mubr.msk.bf16.vlgmr.msra.gmra.mrb[52].mxu0 %vm1780_vm1, %v2834_v49 }
 0x3f3   : > { %7414 = vmatprep.mubr.msk.bf16.mxu0 %vm8523_vm0, %v11381_v39 }
 0x3f5   : > { %v2943_v61 = vpop.permute.xlu1 %2942 }
 0x3f6   : > { %v2948_v36 = vsel %vm1780_vm1, %v2943_v61, 0 }
 0x3f7   : > { %7413 = vmatpush3.bf16.xpose.msra.mxu0 %v2948_v36 }
 0x3f8   : > { %v8133_v10 = vpop.eup %8132  ;;  %7424 = vmatprep.subr.bf16.mxu0 %v11381_v39 }
 0x3f9   : > { %v2349_v18 = vmul.f32 %v8133_v10, %v9457_v4  ;;  %v2940_v17 = vpop.permute.xlu1 %2939  ;;  %v3102_v4 = vpop.permute.xlu0 %3101 }
 0x3fa   : > { %v3107_v24 = vsel %vm1780_vm1, %v3102_v4, 0 }
 0x3fb   : > { %2365 = vst.msk [vmem:[%s9480_s26 + $0x1c8] sm:$0xff] %vm2173_vm2, %v2349_v18  ;;  %v2373_v56 = vpack.c.bf16 %v2349_v18, %v2348_v59 }
 0x3fd   : > { %7385 = vmatmul.mubr.msk.bf16.vlgmr.msra.gmra.mrb[108].mxu1 %vm2173_vm2, %v2373_v56  ;;  %v3049_v32 = vpop.permute.xlu1 %3048  ;;  %v3369_v62 = vpop.permute.xlu0 %3368 }
 0x3fe   : > { %7395 = vmatpush3.bf16.xpose.msra.mxu1 %v2789_v51  ;;  %v3054_v11 = vsel %vm1780_vm1, %v3049_v32, 0  ;;  %7415 = vmatmul.mubr.msk.bf16.vlgmr.msra.gmra.mrb[56].mxu0 %vm1780_vm1, %v2940_v17 }
 0x3ff   : > { %7425 = vmatpush3.bf16.xpose.msra.mxu0 %v3054_v11  ;;  %7396 = vmatprep.mubr.msk.bf16.mxu1 %vm8523_vm0, %v11381_v39 }
 0x400   : > { %7406 = vmatprep.subr.bf16.mxu1 %v11381_v39  ;;  %7426 = vmatprep.mubr.msk.bf16.mxu0 %vm8523_vm0, %v11381_v39 }
 0x401   : > { %7436 = vmatprep.subr.bf16.mxu0 %v11381_v39  ;;  %v3046_v2 = vpop.permute.xlu1 %3045 }
 0x405   : > { %7397 = vmatmul.mubr.msk.bf16.vlgmr.msra.gmra.mrb[112].mxu1 %vm1780_vm1, %v2781_v60  ;;  %v3099_v0 = vpop.permute.xlu1 %3098 }
 0x406   : > { %7407 = vmatpush3.bf16.xpose.msra.mxu1 %v2895_v44  ;;  %7427 = vmatmul.mubr.msk.bf16.vlgmr.msra.gmra.mrb[60].mxu0 %vm1780_vm1, %v3046_v2 }
 0x407   : > { %7437 = vmatpush3.bf16.msra.mxu0 %v3369_v62  ;;  %7408 = vmatprep.mubr.msk.bf16.mxu1 %vm8523_vm0, %v11381_v39 }
 0x408   : > { %7418 = vmatprep.subr.bf16.mxu1 %v11381_v39  ;;  %7438 = vmatprep.mubr.msk.bf16.mxu0 %vm8523_vm0, %v11381_v39 }
 0x409   : > { %7448 = vmatprep.subr.bf16.mxu0 %v11381_v39  ;;  %v3417_v57 = vpop.permute.xlu1 %3416 }
 0x40d   : > { %7409 = vmatmul.mubr.msk.bf16.vlgmr.msra.gmra.mrb[116].mxu1 %vm1780_vm1, %v2887_v22 }
 0x40e   : > { %7419 = vmatpush3.bf16.xpose.msra.mxu1 %v3001_v23  ;;  %7420 = vmatprep.mubr.msk.bf16.mxu1 %vm8523_vm0, %v11381_v39 }
 0x40f   : > { %7430 = vmatprep.subr.bf16.mxu1 %v11381_v39 }
 0x415   : > { %7421 = vmatmul.mubr.msk.bf16.vlgmr.msra.gmra.mrb[120].mxu1 %vm1780_vm1, %v2993_v55 }
 0x416   : > { %7431 = vmatpush3.bf16.xpose.msra.mxu1 %v3107_v24  ;;  %7432 = vmatprep.mubr.msk.bf16.mxu1 %vm8523_vm0, %v11381_v39 }
 0x417   : > { %7442 = vmatprep.subr.bf16.mxu1 %v11381_v39 }
 0x41d   : > { %7433 = vmatmul.mubr.msk.bf16.vlgmr.msra.gmra.mrb[124].mxu1 %vm1780_vm1, %v3099_v0 }
 0x41e   : > { %7443 = vmatpush3.bf16.msra.mxu1 %v3417_v57  ;;  %7444 = vmatprep.mubr.msk.bf16.mxu1 %vm8523_vm0, %v11381_v39 }
 0x41f   : > { %7454 = vmatprep.subr.bf16.mxu1 %v11381_v39 }
 0x465   : > { %v9607_v14 = vpop.f32.mrb[32].mxu0 }
 0x466   : > { %11382 = vst [vmem:[#allocation36_spill] sm:$0xff] %v9607_v14  ;;  %v7344_v54 = vpop.f32.mrb[33].mxu0 }
 0x467   : > { %v9609_v16 = vpop.f32.mrb[34].mxu0 }
 0x468   : > { %11383 = vst [vmem:[#allocation37_spill] sm:$0xff] %v9609_v16  ;;  %v7345_v25 = vpop.f32.mrb[35].mxu0 }
 0x46d   : > { %v9611_v37 = vpop.f32.mrb[96].mxu1 }
 0x46e   : > { %11384 = vst [vmem:[#allocation38_spill] sm:$0xff] %v9611_v37  ;;  %v7350_v30 = vpop.f32.mrb[97].mxu1 }
 0x46f   : > { %v9613_v41 = vpop.f32.mrb[98].mxu1 }
 0x470   : > { %11385 = vst [vmem:[#allocation39_spill] sm:$0xff] %v9613_v41  ;;  %v7351_v47 = vpop.f32.mrb[99].mxu1 }
 0x473   : > { %v9615_v1 = vpop.f32.mrb[36].mxu0 }
 0x474   : > { %11386 = vst [vmem:[#allocation40_spill] sm:$0xff] %v9615_v1  ;;  %v7356_v12 = vpop.f32.mrb[37].mxu0 }
 0x475   : > { %v9617_v27 = vpop.f32.mrb[38].mxu0 }
 0x476   : > { %11387 = vst [vmem:[#allocation41_spill] sm:$0xff] %v9617_v27  ;;  %v7357_v38 = vpop.f32.mrb[39].mxu0 }
 0x47b   : > { %v9619_v31 = vpop.f32.mrb[100].mxu1 }
 0x47c   : > { %11388 = vst [vmem:[#allocation42_spill] sm:$0xff] %v9619_v31  ;;  %v7362_v34 = vpop.f32.mrb[101].mxu1 }
 0x47d   : > { %v9621_v58 = vpop.f32.mrb[102].mxu1 }
 0x47e   : > { %11389 = vst [vmem:[#allocation43_spill] sm:$0xff] %v9621_v58  ;;  %v7363_v9 = vpop.f32.mrb[103].mxu1 }
 0x483   : > { %v9623_v26 = vpop.f32.mrb[40].mxu0 }
 0x484   : > { %11390 = vst [vmem:[#allocation44_spill] sm:$0xff] %v9623_v26  ;;  %v7368_v42 = vpop.f32.mrb[41].mxu0 }
 0x485   : > { %v9625_v3 = vpop.f32.mrb[42].mxu0 }
 0x486   : > { %11391 = vst [vmem:[#allocation45_spill] sm:$0xff] %v9625_v3  ;;  %v7369_v13 = vpop.f32.mrb[43].mxu0 }
 0x48b   : > { %v9627_v59 = vpop.f32.mrb[104].mxu1 }
 0x48c   : > { %11392 = vst [vmem:[#allocation46_spill] sm:$0xff] %v9627_v59  ;;  %v7374_v48 = vpop.f32.mrb[105].mxu1 }
 0x48d   : > { %v9629_v21 = vpop.f32.mrb[106].mxu1 }
 0x48e   : > { %11393 = vst [vmem:[#allocation47_spill] sm:$0xff] %v9629_v21  ;;  %v7375_v60 = vpop.f32.mrb[107].mxu1 }
 0x493   : > { %v9631_v20 = vpop.f32.mrb[44].mxu0 }
 0x494   : > { %11394 = vst [vmem:[#allocation48_spill] sm:$0xff] %v9631_v20  ;;  %v7380_v53 = vpop.f32.mrb[45].mxu0 }
 0x495   : > { %v9633_v22 = vpop.f32.mrb[46].mxu0 }
 0x496   : > { %11395 = vst [vmem:[#allocation49_spill] sm:$0xff] %v9633_v22  ;;  %v7381_v49 = vpop.f32.mrb[47].mxu0 }
 0x49b   : > { %v2772_v35 = vpop.f32.mrb[48].mxu0 }
 0x49c   : > { %v9635_v61 = vmul.f32 0.25, %v2772_v35  ;;  %v7392_v36 = vpop.f32.mrb[49].mxu0 }
 0x49d   : > { %v2775_v10 = vpop.f32.mrb[50].mxu0 }
 0x49e   : > { %v9637_v18 = vmul.f32 0.25, %v2775_v10  ;;  %v7393_v17 = vpop.f32.mrb[51].mxu0  ;;  %v3166_v55 = vsel %vm2173_vm2, %v9635_v61, -inf }
 0x49f   : > { %3167 = vmax.xlane.f32.xlu0 %v3166_v55 }
 0x4a0   : > { %v3169_v56 = vsel %vm2173_vm2, %v9637_v18, -inf }
 0x4a1   : > { %3170 = vmax.xlane.f32.xlu1 %v3169_v56 }
 0x4c5   : > { %v2878_v51 = vpop.f32.mrb[52].mxu0 }
 0x4c6   : > { %v7404_v32 = vpop.f32.mrb[53].mxu0  ;;  %v9653_v13 = vmul.f32 0.25, %v2878_v51 }
 0x4c7   : > { %v2881_v11 = vpop.f32.mrb[54].mxu0 }
 0x4c8   : > { %v9643_v4 = vmul.f32 0.25, %v2881_v11  ;;  %v7405_v44 = vpop.f32.mrb[55].mxu0  ;;  %v3178_v36 = vsel %vm2173_vm2, %v9653_v13, -inf }
 0x4ca   : > { %v3181_v2 = vsel %vm2173_vm2, %v9643_v4, -inf }
 0x4cb   : > { %3182 = vmax.xlane.f32.xlu1 %v3181_v2 }
 0x4d0   : > { %v9647_v62 = vpop.f32.mrb[108].mxu1 }
 0x4d1   : > { %11396 = vst [vmem:[#allocation50_spill] sm:$0xff] %v9647_v62  ;;  %v7386_v23 = vpop.f32.mrb[109].mxu1  ;;  %v2984_v24 = vpop.f32.mrb[56].mxu0 }
 0x4d2   : > { %v9649_v0 = vpop.f32.mrb[110].mxu1  ;;  %v7416_v57 = vpop.f32.mrb[57].mxu0  ;;  %v9671_v23 = vmul.f32 0.25, %v2984_v24 }
 0x4d3   : > { %11397 = vst [vmem:[#allocation51_spill] sm:$0xff] %v9649_v0  ;;  %v7387_v54 = vpop.f32.mrb[111].mxu1  ;;  %v2987_v25 = vpop.f32.mrb[58].mxu0 }
 0x4d4   : > { %v7417_v30 = vpop.f32.mrb[59].mxu0  ;;  %v9667_v44 = vmul.f32 0.25, %v2987_v25 }
 0x4d8   : > { %v2825_v47 = vpop.f32.mrb[112].mxu1 }
 0x4d9   : > { %v9651_v12 = vmul.f32 0.25, %v2825_v47  ;;  %v7398_v38 = vpop.f32.mrb[113].mxu1  ;;  %v3090_v34 = vpop.f32.mrb[60].mxu0  ;;  %v3193_v47 = vsel %vm2173_vm2, %v9667_v44, -inf }
 0x4da   : > { %v2828_v9 = vpop.f32.mrb[114].mxu1  ;;  %v7428_v42 = vpop.f32.mrb[61].mxu0  ;;  %v9681_v24 = vmul.f32 0.25, %v3090_v34 }
 0x4db   : > { %v7399_v48 = vpop.f32.mrb[115].mxu1  ;;  %v3093_v60 = vpop.f32.mrb[62].mxu0  ;;  %v3172_v53 = vsel %vm2173_vm2, %v9651_v12, -inf  ;;  %v9657_v35 = vmul.f32 0.25, %v2828_v9  ;;  %v3190_v42 = vsel %vm2173_vm2, %v9671_v23, -inf }
 0x4dc   : > { %v7429_v49 = vpop.f32.mrb[63].mxu0  ;;  %3173 = vmax.xlane.f32.xlu0 %v3172_v53 }
 0x4dd   : > { %v3175_v11 = vsel %vm2173_vm2, %v9657_v35, -inf }
 0x4e0   : > { %3179 = vmax.xlane.f32.xlu0 %v3178_v36  ;;  %v2931_v10 = vpop.f32.mrb[116].mxu1 }
 0x4e1   : > { %v7410_v17 = vpop.f32.mrb[117].mxu1  ;;  %v9661_v56 = vmul.f32 0.25, %v2931_v10 }
 0x4e2   : > { %v2934_v55 = vpop.f32.mrb[118].mxu1  ;;  %v3202_v17 = vsel %vm2173_vm2, %v9681_v24, -inf }
 0x4e3   : > { %v9663_v51 = vmul.f32 0.25, %v2934_v55  ;;  %v7411_v32 = vpop.f32.mrb[119].mxu1  ;;  %v3184_v57 = vsel %vm2173_vm2, %v9661_v56, -inf  ;;  %v9693_v55 = vmul.f32 0.25, %v3093_v60 }
 0x4e4   : > { %3176 = vmax.xlane.f32.xlu0 %v3175_v11 }
 0x4e5   : > { %v3187_v2 = vsel %vm2173_vm2, %v9663_v51, -inf }
 0x4e6   : > { %3188 = vmax.xlane.f32.xlu1 %v3187_v2  ;;  %v3205_v2 = vsel %vm2173_vm2, %v9693_v55, -inf }
 0x4e8   : > { %3185 = vmax.xlane.f32.xlu0 %v3184_v57  ;;  %v3037_v54 = vpop.f32.mrb[120].mxu1 }
 0x4e9   : > { %v7422_v30 = vpop.f32.mrb[121].mxu1  ;;  %v9677_v9 = vmul.f32 0.25, %v3037_v54 }
 0x4ea   : > { %3194 = vmax.xlane.f32.xlu1 %v3193_v47  ;;  %v3040_v38 = vpop.f32.mrb[122].mxu1 }
 0x4eb   : > { %v7423_v25 = vpop.f32.mrb[123].mxu1  ;;  %v3196_v48 = vsel %vm2173_vm2, %v9677_v9, -inf  ;;  %v9691_v34 = vmul.f32 0.25, %v3040_v38 }
 0x4ec   : > { %3191 = vmax.xlane.f32.xlu0 %v3190_v42 }
 0x4ed   : > { %v3199_v32 = vsel %vm2173_vm2, %v9691_v34, -inf }
 0x4f0   : > { %3197 = vmax.xlane.f32.xlu0 %v3196_v48  ;;  %v3143_v53 = vpop.f32.mrb[124].mxu1 }
 0x4f1   : > { %v7434_v49 = vpop.f32.mrb[125].mxu1  ;;  %v9701_v57 = vmul.f32 0.25, %v3143_v53 }
 0x4f2   : > { %v3146_v36 = vpop.f32.mrb[126].mxu1 }
 0x4f3   : > { %v7435_v10 = vpop.f32.mrb[127].mxu1  ;;  %v9697_v11 = vmul.f32 0.25, %v3146_v36 }
 0x4f4   : > { %3203 = vmax.xlane.f32.xlu0 %v3202_v17 }
 0x4fb   : > { %3560 = vrot.lane.b32.xlu1 %v9267_v33, %s8524_s29  ;;  %v3211_v33 = vsel %vm2173_vm2, %v9697_v11, -inf }
 0x50a   : > { %3464 = vrot.lane.b32.xlu0 %v9251_v45, %s8524_s29  ;;  %v3208_v45 = vsel %vm2173_vm2, %v9701_v57, -inf }
 0x51f   : > { %3200 = vmax.xlane.f32.xlu1 %v3199_v32 }
 0x523   : > { %3206 = vmax.xlane.f32.xlu1 %v3205_v2 }
 0x527   : > { %3212 = vmax.xlane.f32.xlu1 %v3211_v33 }
 0x529   : > { %3209 = vmax.xlane.f32.xlu0 %v3208_v45 }
 0x52c   : > { %v3168_v54 = vpop.xlane.xlu0 %3167 }
 0x52d   : > { %v3214_v47 = vsub.f32 %v9635_v61, %v3168_v54 }
 0x52e   : > { %v3171_v60 = vpop.xlane.xlu1 %3170 }
 0x52f   : > { %v3215_v30 = vsub.f32 %v9637_v18, %v3171_v60  ;;  %v3230_v25 = vmul.f32 1.442695, %v3214_v47 }
 0x531   : > { %v3232_v38 = vmul.f32 1.442695, %v3215_v30 }
 0x533   : > { %8134 = vpow2.f32 %v3232_v38 }
 0x534   : > { %8136 = vpow2.f32 %v3230_v25 }
 0x538   : > { %3656 = vrot.lane.b32.xlu1 %v9283_v52, %s8524_s29 }
 0x53d   : > { %v9713_v42 = vpop.eup %8134 }
 0x53e   : > { %v9715_v48 = vpop.eup %8136  ;;  %v3265_v52 = vsel %vm2173_vm2, %v9713_v42, 0.0 }
 0x53f   : > { %3512 = vrot.lane.b32.xlu0 %v9259_v8, %s8524_s29  ;;  %v3262_v8 = vsel %vm2173_vm2, %v9715_v48, 0.0 }
 0x558   : > { %v3183_v49 = vpop.xlane.xlu1 %3182 }
 0x559   : > { %v3219_v17 = vsub.f32 %v9643_v4, %v3183_v49 }
 0x55b   : > { %v3240_v60 = vmul.f32 1.442695, %v3219_v17 }
 0x55c   : > { %3266 = vadd.xlane.f32.xlu1 %v3265_v52 }
 0x55e   : > { %3263 = vadd.xlane.f32.xlu0 %v3262_v8 }
 0x569   : > { %v3174_v53 = vpop.xlane.xlu0 %3173 }
 0x56a   : > { %v3216_v18 = vsub.f32 %v9651_v12, %v3174_v53 }
 0x56c   : > { %v3234_v61 = vmul.f32 1.442695, %v3216_v18 }
 0x56d   : > { %v3180_v36 = vpop.xlane.xlu0 %3179 }
 0x56e   : > { %8138 = vpow2.f32 %v3234_v61  ;;  %v3218_v10 = vsub.f32 %v9653_v13, %v3180_v36 }
 0x570   : > { %v3238_v32 = vmul.f32 1.442695, %v3218_v10 }
 0x571   : > { %v3177_v2 = vpop.xlane.xlu0 %3176 }
 0x572   : > { %8140 = vpow2.f32 %v3238_v32  ;;  %v3217_v33 = vsub.f32 %v9657_v35, %v3177_v2 }
 0x573   : > { %v3189_v45 = vpop.xlane.xlu1 %3188 }
 0x574   : > { %v3236_v54 = vmul.f32 1.442695, %v3217_v33  ;;  %v3221_v30 = vsub.f32 %v9663_v51, %v3189_v45 }
 0x575   : > { %v3186_v47 = vpop.xlane.xlu0 %3185 }
 0x576   : > { %8142 = vpow2.f32 %v3236_v54  ;;  %v3220_v12 = vsub.f32 %v9661_v56, %v3186_v47  ;;  %v3244_v13 = vmul.f32 1.442695, %v3221_v30 }
 0x577   : > { %v3195_v38 = vpop.xlane.xlu1 %3194  ;;  %8144 = vpow2.f32 %v3240_v60 }
 0x578   : > { %v9727_v25 = vpop.eup %8138  ;;  %v3242_v4 = vmul.f32 1.442695, %v3220_v12  ;;  %v3223_v52 = vsub.f32 %v9667_v44, %v3195_v38 }
 0x579   : > { %v3192_v8 = vpop.xlane.xlu0 %3191  ;;  %v3268_v35 = vsel %vm2173_vm2, %v9727_v25, 0.0 }
 0x57a   : > { %8146 = vpow2.f32 %v3242_v4  ;;  %v3222_v53 = vsub.f32 %v9671_v23, %v3192_v8  ;;  %3269 = vadd.xlane.f32.xlu0 %v3268_v35  ;;  %v3248_v56 = vmul.f32 1.442695, %v3223_v52 }
 0x57b   : > { %8148 = vpow2.f32 %v3244_v13  ;;  %v9771_v35 = vpop.permute.xlu1 %3560 }
 0x57c   : > { %v9733_v51 = vpop.eup %8140  ;;  %v3246_v18 = vmul.f32 1.442695, %v3222_v53 }
 0x57d   : > { %v3198_v61 = vpop.xlane.xlu0 %3197  ;;  %v3274_v49 = vsel %vm2173_vm2, %v9733_v51, 0.0 }
 0x57e   : > { %8150 = vpow2.f32 %v3246_v18  ;;  %v3224_v44 = vsub.f32 %v9677_v9, %v3198_v61  ;;  %3275 = vadd.xlane.f32.xlu0 %v3274_v49 }
 0x57f   : > { %8152 = vpow2.f32 %v3248_v56 }
 0x580   : > { %v9738_v36 = vpop.eup %8142  ;;  %v3250_v10 = vmul.f32 1.442695, %v3224_v44 }
 0x581   : > { %v3204_v17 = vpop.xlane.xlu0 %3203  ;;  %v3271_v23 = vsel %vm2173_vm2, %v9738_v36, 0.0  ;;  %v9742_v32 = vpop.eup %8144 }
 0x582   : > { %8154 = vpow2.f32 %v3250_v10  ;;  %v3226_v2 = vsub.f32 %v9681_v24, %v3204_v17  ;;  %3272 = vadd.xlane.f32.xlu1 %v3271_v23  ;;  %v3277_v60 = vsel %vm2173_vm2, %v9742_v32, 0.0 }
 0x584   : > { %v9745_v33 = vpop.eup %8146  ;;  %v3254_v45 = vmul.f32 1.442695, %v3226_v2 }
 0x585   : > { %v3280_v9 = vsel %vm2173_vm2, %v9745_v33, 0.0  ;;  %v9751_v54 = vpop.eup %8148  ;;  %v3465_v44 = vpop.permute.xlu0 %3464 }
 0x586   : > { %8156 = vpow2.f32 %v3254_v45  ;;  %3281 = vadd.xlane.f32.xlu0 %v3280_v9  ;;  %3278 = vadd.xlane.f32.xlu1 %v3277_v60  ;;  %v3283_v47 = vsel %vm2173_vm2, %v9751_v54, 0.0 }
 0x588   : > { %v9753_v30 = vpop.eup %8150 }
 0x589   : > { %v3286_v24 = vsel %vm2173_vm2, %v9753_v30, 0.0  ;;  %v9759_v12 = vpop.eup %8152 }
 0x58a   : > { %3287 = vadd.xlane.f32.xlu0 %v3286_v24  ;;  %3284 = vadd.xlane.f32.xlu1 %v3283_v47  ;;  %v3289_v4 = vsel %vm2173_vm2, %v9759_v12, 0.0 }
 0x58c   : > { %v9761_v38 = vpop.eup %8154 }
 0x58d   : > { %v3292_v13 = vsel %vm2173_vm2, %v9761_v38, 0.0 }
 0x58e   : > { %3293 = vadd.xlane.f32.xlu0 %v3292_v13  ;;  %3290 = vadd.xlane.f32.xlu1 %v3289_v4 }
 0x590   : > { %v9767_v52 = vpop.eup %8156 }
 0x591   : > { %v3298_v8 = vsel %vm2173_vm2, %v9767_v52, 0.0 }
 0x592   : > { %3299 = vadd.xlane.f32.xlu0 %v3298_v8 }
 0x5a8   : > { %3608 = vrot.lane.b32.xlu0 %v9275_v6, %s8524_s29 }
 0x5ac   : > { %v3201_v53 = vpop.xlane.xlu1 %3200 }
 0x5ad   : > { %v3225_v56 = vsub.f32 %v9691_v34, %v3201_v53 }
 0x5af   : > { %v3252_v18 = vmul.f32 1.442695, %v3225_v56 }
 0x5b0   : > { %v3207_v61 = vpop.xlane.xlu1 %3206 }
 0x5b1   : > { %8158 = vpow2.f32 %v3252_v18  ;;  %v3227_v49 = vsub.f32 %v9693_v55, %v3207_v61 }
 0x5b3   : > { %v3256_v10 = vmul.f32 1.442695, %v3227_v49 }
 0x5b4   : > { %v3213_v17 = vpop.xlane.xlu1 %3212 }
 0x5b5   : > { %8160 = vpow2.f32 %v3256_v10  ;;  %v3229_v23 = vsub.f32 %v9697_v11, %v3213_v17 }
 0x5b6   : > { %v3210_v2 = vpop.xlane.xlu0 %3209 }
 0x5b7   : > { %v3228_v45 = vsub.f32 %v9701_v57, %v3210_v2  ;;  %v3260_v9 = vmul.f32 1.442695, %v3229_v23 }
 0x5b8   : > { %v9797_v4 = vpop.permute.xlu1 %3656 }
 0x5b9   : > { %v3258_v60 = vmul.f32 1.442695, %v3228_v45 }
 0x5ba   : > { %v3513_v8 = vpop.permute.xlu0 %3512 }
 0x5bb   : > { %v9779_v6 = vpop.eup %8158  ;;  %8162 = vpow2.f32 %v3258_v60 }
 0x5bc   : > { %v3295_v34 = vsel %vm2173_vm2, %v9779_v6, 0.0  ;;  %8164 = vpow2.f32 %v3260_v9 }
 0x5bd   : > { %3296 = vadd.xlane.f32.xlu1 %v3295_v34 }
 0x5bf   : > { %v9783_v55 = vpop.eup %8160 }
 0x5c0   : > { %v3301_v24 = vsel %vm2173_vm2, %v9783_v55, 0.0 }
 0x5c1   : > { %3302 = vadd.xlane.f32.xlu1 %v3301_v24 }
 0x5c5   : > { %v9787_v11 = vpop.eup %8162 }
 0x5c6   : > { %v3304_v57 = vsel %vm2173_vm2, %v9787_v11, 0.0  ;;  %v9791_v47 = vpop.eup %8164 }
 0x5c7   : > { %3305 = vadd.xlane.f32.xlu1 %v3304_v57  ;;  %v3307_v13 = vsel %vm2173_vm2, %v9791_v47, 0.0 }
 0x5cb   : > { %3308 = vadd.xlane.f32.xlu1 %v3307_v13 }
 0x5dc   : > { %3704 = vrot.lane.b32.xlu1 %v9291_v29, %s8524_s29 }
 0x5e9   : > { %v3267_v53 = vpop.xlane.xlu1 %3266 }
 0x5ea   : > { %8166 = vrcp.f32 %v3267_v53 }
 0x5eb   : > { %v3264_v56 = vpop.xlane.xlu0 %3263 }
 0x5ec   : > { %8168 = vrcp.f32 %v3264_v56 }
 0x5f4   : > { %v8167_v18 = vpop.eup %8166 }
 0x5f5   : > { %v3327_v61 = vmul.f32 %v8167_v18, %v9713_v42 }
 0x5f6   : > { %v8169_v49 = vpop.eup %8168 }
 0x5f7   : > { %7028 = vst.msk [vmem:[%s9480_s26 + $0x18] sm:$0xff] %vm2173_vm2, %v3327_v61  ;;  %v3326_v10 = vmul.f32 %v8169_v49, %v9715_v48 }
 0x5f9   : > { %7027 = vst.msk [vmem:[%s9480_s26 + $0x10] sm:$0xff] %vm2173_vm2, %v3326_v10  ;;  %v3359_v17 = vpack.c.bf16 %v3327_v61, %v3326_v10 }
 0x5fb   : > { %7439 = vmatmul.mubr.msk.bf16.vlgmr.msra.gmra.mrb[64].mxu0 %vm2173_vm2, %v3359_v17 }
 0x5fc   : > { %7449 = vmatpush3.bf16.msra.mxu0 %v3465_v44  ;;  %7450 = vmatprep.mubr.msk.bf16.mxu0 %vm8523_vm0, %v11381_v39 }
 0x5fd   : > { %7460 = vmatprep.subr.bf16.mxu0 %v11381_v39 }
 0x607   : > { %v3270_v29 = vpop.xlane.xlu0 %3269 }
 0x608   : > { %8170 = vrcp.f32 %v3270_v29 }
 0x60b   : > { %v3276_v42 = vpop.xlane.xlu0 %3275 }
 0x60c   : > { %8172 = vrcp.f32 %v3276_v42 }
 0x60f   : > { %v3273_v23 = vpop.xlane.xlu1 %3272 }
 0x610   : > { %8174 = vrcp.f32 %v3273_v23 }
 0x612   : > { %v8171_v48 = vpop.eup %8170 }
 0x613   : > { %v3328_v2 = vmul.f32 %v8171_v48, %v9727_v25  ;;  %v3282_v45 = vpop.xlane.xlu0 %3281  ;;  %v3279_v9 = vpop.xlane.xlu1 %3278 }
 0x614   : > { %8176 = vrcp.f32 %v3282_v45 }
 0x615   : > { %7029 = vst.msk [vmem:[%s9480_s26 + $0x50] sm:$0xff] %vm2173_vm2, %v3328_v2  ;;  %8178 = vrcp.f32 %v3279_v9 }
 0x616   : > { %v8173_v44 = vpop.eup %8172 }
 0x617   : > { %v3330_v60 = vmul.f32 %v8173_v44, %v9733_v51  ;;  %v3288_v34 = vpop.xlane.xlu0 %3287  ;;  %v3285_v24 = vpop.xlane.xlu1 %3284 }
 0x618   : > { %8180 = vrcp.f32 %v3288_v34 }
 0x619   : > { %7031 = vst.msk [vmem:[%s9480_s26 + $0x90] sm:$0xff] %vm2173_vm2, %v3330_v60  ;;  %8182 = vrcp.f32 %v3285_v24 }
 0x61a   : > { %v8175_v57 = vpop.eup %8174 }
 0x61b   : > { %v3329_v13 = vmul.f32 %v8175_v57, %v9738_v36  ;;  %v3294_v25 = vpop.xlane.xlu0 %3293  ;;  %v3291_v53 = vpop.xlane.xlu1 %3290 }
 0x61c   : > { %8184 = vrcp.f32 %v3294_v25 }
 0x61d   : > { %7030 = vst.msk [vmem:[%s9480_s26 + $0x58] sm:$0xff] %vm2173_vm2, %v3329_v13  ;;  %8186 = vrcp.f32 %v3291_v53  ;;  %v3360_v56 = vpack.c.bf16 %v3329_v13, %v3328_v2 }
 0x61e   : > { %v8177_v18 = vpop.eup %8176 }
 0x61f   : > { %v8179_v51 = vpop.eup %8178  ;;  %v3332_v61 = vmul.f32 %v8177_v18, %v9745_v33  ;;  %v3300_v49 = vpop.xlane.xlu0 %3299  ;;  %7445 = vmatmul.mubr.msk.bf16.vlgmr.msra.gmra.mrb[128].mxu1 %vm2173_vm2, %v3360_v56  ;;  %v3873_v18 = vsel %vm1780_vm1, %v9083_v50, 0 }
 0x620   : > { %v3331_v10 = vmul.f32 %v8179_v51, %v9742_v32  ;;  %8188 = vrcp.f32 %v3300_v49  ;;  %7455 = vmatpush3.bf16.msra.mxu1 %v3513_v8  ;;  %7456 = vmatprep.mubr.msk.bf16.mxu1 %vm8523_vm0, %v11381_v39  ;;  %v4061_v49 = vsel %vm1780_vm1, %v9175_v46, 0 }
 0x621   : > { %7033 = vst.msk [vmem:[%s9480_s26 + $0xd0] sm:$0xff] %vm2173_vm2, %v3332_v61  ;;  %7466 = vmatprep.subr.bf16.mxu1 %v11381_v39 }
 0x622   : > { %v8181_v36 = vpop.eup %8180  ;;  %7032 = vst.msk [vmem:[%s9480_s26 + $0x98] sm:$0xff] %vm2173_vm2, %v3331_v10  ;;  %v3361_v33 = vpack.c.bf16 %v3331_v10, %v3330_v60  ;;  %v11398_v10 = vld [vmem:[#allocation22_spill] sm:$0xff] }
 0x623   : > { %v8183_v17 = vpop.eup %8182  ;;  %v3334_v29 = vmul.f32 %v8181_v36, %v9753_v30  ;;  %v3609_v48 = vpop.permute.xlu0 %3608  ;;  %v11399_v36 = vld [vmem:[#allocation23_spill] sm:$0xff] }
 0x624   : > { %v3333_v32 = vmul.f32 %v8183_v17, %v9751_v54  ;;  %7451 = vmatmul.mubr.msk.bf16.vlgmr.msra.gmra.mrb[68].mxu0 %vm2173_vm2, %v3361_v33  ;;  %v4014_v33 = vsel %vm1780_vm1, %v11399_v36, 0  ;;  %v11400_v17 = vld [vmem:[#allocation25_spill] sm:$0xff] }
 0x625   : > { %7035 = vst.msk [vmem:[%s9480_s26 + $0x110] sm:$0xff] %vm2173_vm2, %v3334_v29  ;;  %7461 = vmatpush3.bf16.msra.mxu0 %v9771_v35  ;;  %7462 = vmatprep.mubr.msk.bf16.mxu0 %vm8523_vm0, %v11381_v39 }
 0x626   : > { %v8185_v8 = vpop.eup %8184  ;;  %7034 = vst.msk [vmem:[%s9480_s26 + $0xd8] sm:$0xff] %vm2173_vm2, %v3333_v32  ;;  %v3362_v42 = vpack.c.bf16 %v3333_v32, %v3332_v61  ;;  %7472 = vmatprep.subr.bf16.mxu0 %v11381_v39  ;;  %v3920_v61 = vsel %vm1780_vm1, %v9106_v15, 0  ;;  %v11402_v32 = vld [vmem:[#allocation24_spill] sm:$0xff] }
 0x627   : > { %v8187_v30 = vpop.eup %8186  ;;  %v3336_v54 = vmul.f32 %v8185_v8, %v9761_v38  ;;  %v11403_v8 = vld [vmem:[#allocation26_spill] sm:$0xff] }
 0x628   : > { %v3335_v23 = vmul.f32 %v8187_v30, %v9759_v12  ;;  %7457 = vmatmul.mubr.msk.bf16.vlgmr.msra.gmra.mrb[132].mxu1 %vm2173_vm2, %v3362_v42  ;;  %v4108_v42 = vsel %vm1780_vm1, %v11403_v8, 0  ;;  %v11404_v30 = vld [vmem:[#allocation27_spill] sm:$0xff] }
 0x629   : > { %7037 = vst.msk [vmem:[%s9480_s26 + $0x150] sm:$0xff] %vm2173_vm2, %v3336_v54  ;;  %7467 = vmatpush3.bf16.msra.mxu1 %v3609_v48  ;;  %7468 = vmatprep.mubr.msk.bf16.mxu1 %vm8523_vm0, %v11381_v39 }
 0x62a   : > { %v8189_v35 = vpop.eup %8188  ;;  %7036 = vst.msk [vmem:[%s9480_s26 + $0x118] sm:$0xff] %vm2173_vm2, %v3335_v23  ;;  %v3363_v2 = vpack.c.bf16 %v3335_v23, %v3334_v29  ;;  %7478 = vmatprep.subr.bf16.mxu1 %v11381_v39  ;;  %v11401_v29 = vld [vmem:[#allocation28_spill] sm:$0xff] }
 0x62b   : > { %v3338_v38 = vmul.f32 %v8189_v35, %v9767_v52 }
 0x62c   : > { %7463 = vmatmul.mubr.msk.bf16.vlgmr.msra.gmra.mrb[72].mxu0 %vm2173_vm2, %v3363_v2 }
 0x62d   : > { %7039 = vst.msk [vmem:[%s9480_s26 + $0x190] sm:$0xff] %vm2173_vm2, %v3338_v38  ;;  %7473 = vmatpush3.bf16.msra.mxu0 %v9797_v4  ;;  %7474 = vmatprep.mubr.msk.bf16.mxu0 %vm8523_vm0, %v11381_v39 }
 0x62e   : > { %7484 = vmatprep.subr.bf16.mxu0 %v11381_v39 }
 0x64a   : > { %v3297_v12 = vpop.xlane.xlu1 %3296 }
 0x64b   : > { %8190 = vrcp.f32 %v3297_v12 }
 0x64e   : > { %v3303_v45 = vpop.xlane.xlu1 %3302 }
 0x64f   : > { %8192 = vrcp.f32 %v3303_v45 }
 0x654   : > { %v3306_v9 = vpop.xlane.xlu1 %3305 }
 0x655   : > { %v8191_v44 = vpop.eup %8190  ;;  %8194 = vrcp.f32 %v3306_v9 }
 0x656   : > { %v3337_v52 = vmul.f32 %v8191_v44, %v9779_v6  ;;  %v3779_v6 = vsel %vm1780_vm1, %v9041_v7, 0 }
 0x658   : > { %7038 = vst.msk [vmem:[%s9480_s26 + $0x158] sm:$0xff] %vm2173_vm2, %v3337_v52  ;;  %v3309_v60 = vpop.xlane.xlu1 %3308  ;;  %v3364_v34 = vpack.c.bf16 %v3337_v52, %v3336_v54  ;;  %v11405_v54 = vld [vmem:[#allocation29_spill] sm:$0xff] }
 0x659   : > { %v8193_v4 = vpop.eup %8192  ;;  %8196 = vrcp.f32 %v3309_v60 }
 0x65a   : > { %v3339_v24 = vmul.f32 %v8193_v4, %v9783_v55  ;;  %7469 = vmatmul.mubr.msk.bf16.vlgmr.msra.gmra.mrb[136].mxu1 %vm2173_vm2, %v3364_v34 }
 0x65b   : > { %7480 = vmatprep.mubr.msk.bf16.mxu1 %vm8523_vm0, %v11381_v39 }
 0x65c   : > { %7040 = vst.msk [vmem:[%s9480_s26 + $0x198] sm:$0xff] %vm2173_vm2, %v3339_v24  ;;  %v3705_v57 = vpop.permute.xlu1 %3704  ;;  %v3365_v13 = vpack.c.bf16 %v3339_v24, %v3338_v38 }
 0x65d   : > { %7479 = vmatpush3.bf16.msra.mxu1 %v3705_v57 }
 0x65e   : > { %7475 = vmatmul.mubr.msk.bf16.vlgmr.msra.gmra.mrb[76].mxu0 %vm2173_vm2, %v3365_v13  ;;  %7490 = vmatprep.subr.bf16.mxu1 %v11381_v39 }
 0x65f   : > { %v8195_v25 = vpop.eup %8194  ;;  %7485 = vmatpush3.bf16.xpose.msra.mxu0 %v3779_v6  ;;  %7486 = vmatprep.mubr.msk.bf16.mxu0 %vm8523_vm0, %v11381_v39 }
 0x660   : > { %v3340_v55 = vmul.f32 %v8195_v25, %v9787_v11  ;;  %7496 = vmatprep.subr.bf16.mxu0 %v11381_v39  ;;  %v3826_v11 = vsel %vm1780_vm1, %v9060_v28, 0 }
 0x662   : > { %7041 = vst.msk [vmem:[%s9480_s26 + $0x1d0] sm:$0xff] %vm2173_vm2, %v3340_v55 }
 0x663   : > { %v8197_v53 = vpop.eup %8196 }
 0x664   : > { %v3341_v56 = vmul.f32 %v8197_v53, %v9791_v47  ;;  %v3967_v47 = vsel %vm1780_vm1, %v9129_v43, 0 }
 0x666   : > { %7042 = vst.msk [vmem:[%s9480_s26 + $0x1d8] sm:$0xff] %vm2173_vm2, %v3341_v56  ;;  %7487 = vmatmul.mubr.msk.bf16.vlgmr.msra.gmra.mrb[80].mxu0 %vm1780_vm1, %v9052_v19  ;;  %v3366_v51 = vpack.c.bf16 %v3341_v56, %v3340_v55 }
 0x667   : > { %7497 = vmatpush3.bf16.xpose.msra.mxu0 %v3873_v18  ;;  %7498 = vmatprep.mubr.msk.bf16.mxu0 %vm8523_vm0, %v11381_v39 }
 0x668   : > { %7481 = vmatmul.mubr.msk.bf16.vlgmr.msra.gmra.mrb[140].mxu1 %vm2173_vm2, %v3366_v51  ;;  %7508 = vmatprep.subr.bf16.mxu0 %v11381_v39 }
 0x669   : > { %7491 = vmatpush3.bf16.xpose.msra.mxu1 %v3826_v11  ;;  %7492 = vmatprep.mubr.msk.bf16.mxu1 %vm8523_vm0, %v11381_v39 }
 0x66a   : > { %7502 = vmatprep.subr.bf16.mxu1 %v11381_v39 }
 0x66e   : > { %7499 = vmatmul.mubr.msk.bf16.vlgmr.msra.gmra.mrb[84].mxu0 %vm1780_vm1, %v9098_v5 }
 0x66f   : > { %7509 = vmatpush3.bf16.xpose.msra.mxu0 %v3967_v47  ;;  %7510 = vmatprep.mubr.msk.bf16.mxu0 %vm8523_vm0, %v11381_v39 }
 0x670   : > { %7493 = vmatmul.mubr.msk.bf16.vlgmr.msra.gmra.mrb[144].mxu1 %vm1780_vm1, %v9075_v40  ;;  %7520 = vmatprep.subr.bf16.mxu0 %v11381_v39 }
 0x671   : > { %7503 = vmatpush3.bf16.xpose.msra.mxu1 %v3920_v61  ;;  %7504 = vmatprep.mubr.msk.bf16.mxu1 %vm8523_vm0, %v11381_v39 }
 0x672   : > { %7514 = vmatprep.subr.bf16.mxu1 %v11381_v39 }
 0x676   : > { %7511 = vmatmul.mubr.msk.bf16.vlgmr.msra.gmra.mrb[88].mxu0 %vm1780_vm1, %v9144_v63 }
 0x677   : > { %7521 = vmatpush3.bf16.xpose.msra.mxu0 %v4061_v49  ;;  %7522 = vmatprep.mubr.msk.bf16.mxu0 %vm8523_vm0, %v11381_v39 }
 0x678   : > { %7505 = vmatmul.mubr.msk.bf16.vlgmr.msra.gmra.mrb[148].mxu1 %vm1780_vm1, %v11398_v10  ;;  %7532 = vmatprep.subr.bf16.mxu0 %v11381_v39 }
 0x679   : > { %7515 = vmatpush3.bf16.xpose.msra.mxu1 %v4014_v33  ;;  %7516 = vmatprep.mubr.msk.bf16.mxu1 %vm8523_vm0, %v11381_v39 }
 0x67a   : > { %7526 = vmatprep.subr.bf16.mxu1 %v11381_v39 }
 0x67e   : > { %7523 = vmatmul.mubr.msk.bf16.vlgmr.msra.gmra.mrb[92].mxu0 %vm1780_vm1, %v11400_v17 }
 0x67f   : > { %7533 = vmatpush3.bf16.msra.mxu0 %v11401_v29  ;;  %7534 = vmatprep.mubr.msk.bf16.mxu0 %vm8523_vm0, %v11381_v39 }
 0x680   : > { %7517 = vmatmul.mubr.msk.bf16.vlgmr.msra.gmra.mrb[152].mxu1 %vm1780_vm1, %v11402_v32  ;;  %7544 = vmatprep.subr.bf16.mxu0 %v11381_v39 }
 0x681   : > { %7527 = vmatpush3.bf16.xpose.msra.mxu1 %v4108_v42  ;;  %7528 = vmatprep.mubr.msk.bf16.mxu1 %vm8523_vm0, %v11381_v39 }
 0x682   : > { %7538 = vmatprep.subr.bf16.mxu1 %v11381_v39 }
 0x688   : > { %7529 = vmatmul.mubr.msk.bf16.vlgmr.msra.gmra.mrb[156].mxu1 %vm1780_vm1, %v11404_v30 }
 0x689   : > { %7539 = vmatpush3.bf16.msra.mxu1 %v11405_v54  ;;  %7540 = vmatprep.mubr.msk.bf16.mxu1 %vm8523_vm0, %v11381_v39 }
 0x68a   : > { %7550 = vmatprep.subr.bf16.mxu1 %v11381_v39 }
 0x6ce   : > { %v9939_v23 = vpop.f32.mrb[64].mxu0 }
 0x6cf   : > { %v7440_v48 = vpop.f32.mrb[65].mxu0 }
 0x6d0   : > { %v9941_v35 = vpop.f32.mrb[66].mxu0 }
 0x6d1   : > { %v7441_v38 = vpop.f32.mrb[67].mxu0 }
 0x6f2   : > { %v9945_v12 = vpop.f32.mrb[128].mxu1 }
 0x6f3   : > { %v7446_v45 = vpop.f32.mrb[129].mxu1 }
 0x6f4   : > { %v9947_v9 = vpop.f32.mrb[130].mxu1 }
 0x6f5   : > { %v7447_v52 = vpop.f32.mrb[131].mxu1 }
 0x6f7   : > { %v9951_v60 = vpop.f32.mrb[68].mxu0 }
 0x6f8   : > { %v7452_v34 = vpop.f32.mrb[69].mxu0 }
 0x6f9   : > { %v9953_v4 = vpop.f32.mrb[70].mxu0 }
 0x6fa   : > { %v7453_v57 = vpop.f32.mrb[71].mxu0 }
 0x6fb   : > { %v9957_v13 = vpop.f32.mrb[132].mxu1 }
 0x6fc   : > { %v7458_v6 = vpop.f32.mrb[133].mxu1 }
 0x6fd   : > { %v9959_v25 = vpop.f32.mrb[134].mxu1 }
 0x6fe   : > { %v7459_v53 = vpop.f32.mrb[135].mxu1 }
 0x6ff   : > { %v9963_v56 = vpop.f32.mrb[72].mxu0 }
 0x700   : > { %v7464_v18 = vpop.f32.mrb[73].mxu0 }
 0x701   : > { %v9965_v51 = vpop.f32.mrb[74].mxu0 }
 0x702   : > { %v7465_v47 = vpop.f32.mrb[75].mxu0 }
 0x72d   : > { %v9969_v61 = vpop.f32.mrb[136].mxu1 }
 0x72e   : > { %v7470_v49 = vpop.f32.mrb[137].mxu1 }
 0x72f   : > { %v9971_v33 = vpop.f32.mrb[138].mxu1 }
 0x730   : > { %v7471_v48 = vpop.f32.mrb[139].mxu1 }
 0x731   : > { %v9975_v38 = vpop.f32.mrb[76].mxu0 }
 0x732   : > { %v7476_v45 = vpop.f32.mrb[77].mxu0 }
 0x733   : > { %v9977_v52 = vpop.f32.mrb[78].mxu0 }
 0x734   : > { %v7477_v57 = vpop.f32.mrb[79].mxu0 }
 0x739   : > { %v3815_v6 = vpop.f32.mrb[80].mxu0 }
 0x73a   : > { %v9981_v53 = vmul.f32 0.25, %v3815_v6  ;;  %v7488_v18 = vpop.f32.mrb[81].mxu0 }
 0x73b   : > { %v9983_v47 = vpop.f32.mrb[140].mxu1  ;;  %v3818_v49 = vpop.f32.mrb[82].mxu0 }
 0x73c   : > { %v9985_v11 = vmul.f32 0.25, %v3818_v49  ;;  %v7482_v42 = vpop.f32.mrb[141].mxu1  ;;  %v7489_v48 = vpop.f32.mrb[83].mxu0  ;;  %v4167_v45 = vsel %vm2173_vm2, %v9981_v53, -inf }
 0x73d   : > { %4168 = vmax.xlane.f32.xlu0 %v4167_v45  ;;  %v9989_v55 = vpop.f32.mrb[142].mxu1 }
 0x73e   : > { %v7483_v34 = vpop.f32.mrb[143].mxu1  ;;  %v4170_v6 = vsel %vm2173_vm2, %v9985_v11, -inf }
 0x73f   : > { %4171 = vmax.xlane.f32.xlu1 %v4170_v6 }
 0x741   : > { %v3909_v18 = vpop.f32.mrb[84].mxu0 }
 0x742   : > { %v7500_v24 = vpop.f32.mrb[85].mxu0  ;;  %v9999_v62 = vmul.f32 0.25, %v3909_v18 }
 0x743   : > { %v3862_v49 = vpop.f32.mrb[144].mxu1  ;;  %v3912_v44 = vpop.f32.mrb[86].mxu0 }
 0x744   : > { %v9995_v42 = vmul.f32 0.25, %v3862_v49  ;;  %v9997_v48 = vmul.f32 0.25, %v3912_v44  ;;  %v7494_v2 = vpop.f32.mrb[145].mxu1  ;;  %v7501_v45 = vpop.f32.mrb[87].mxu0 }
 0x745   : > { %v3865_v0 = vpop.f32.mrb[146].mxu1  ;;  %v4179_v2 = vsel %vm2173_vm2, %v9999_v62, -inf }
 0x746   : > { %v7495_v22 = vpop.f32.mrb[147].mxu1  ;;  %v4182_v34 = vsel %vm2173_vm2, %v9997_v48, -inf  ;;  %v4173_v6 = vsel %vm2173_vm2, %v9995_v42, -inf  ;;  %v10005_v57 = vmul.f32 0.25, %v3865_v0 }
 0x747   : > { %4183 = vmax.xlane.f32.xlu1 %v4182_v34  ;;  %4174 = vmax.xlane.f32.xlu0 %v4173_v6 }
 0x748   : > { %v4176_v34 = vsel %vm2173_vm2, %v10005_v57, -inf }
 0x749   : > { %v4003_v24 = vpop.f32.mrb[88].mxu0 }
 0x74a   : > { %v7512_v49 = vpop.f32.mrb[89].mxu0 }
 0x74b   : > { %v4006_v44 = vpop.f32.mrb[90].mxu0  ;;  %4180 = vmax.xlane.f32.xlu0 %v4179_v2  ;;  %v3956_v18 = vpop.f32.mrb[148].mxu1  ;;  %v10019_v2 = vmul.f32 0.25, %v4003_v24 }
 0x74c   : > { %v7506_v45 = vpop.f32.mrb[149].mxu1  ;;  %v7513_v22 = vpop.f32.mrb[91].mxu0  ;;  %v10009_v21 = vmul.f32 0.25, %v3956_v18  ;;  %v10015_v0 = vmul.f32 0.25, %v4006_v44 }
 0x74d   : > { %v3959_v20 = vpop.f32.mrb[150].mxu1 }
 0x74e   : > { %v10011_v59 = vmul.f32 0.25, %v3959_v20  ;;  %v7507_v3 = vpop.f32.mrb[151].mxu1  ;;  %v4185_v18 = vsel %vm2173_vm2, %v10009_v21, -inf  ;;  %v4194_v44 = vsel %vm2173_vm2, %v10015_v0, -inf }
 0x74f   : > { %4177 = vmax.xlane.f32.xlu0 %v4176_v34 }
 0x750   : > { %v4188_v6 = vsel %vm2173_vm2, %v10011_v59, -inf }
 0x751   : > { %v4097_v49 = vpop.f32.mrb[92].mxu0  ;;  %4189 = vmax.xlane.f32.xlu1 %v4188_v6  ;;  %v4191_v6 = vsel %vm2173_vm2, %v10019_v2, -inf }
 0x752   : > { %v7524_v45 = vpop.f32.mrb[93].mxu0 }
 0x753   : > { %v4100_v20 = vpop.f32.mrb[94].mxu0  ;;  %4186 = vmax.xlane.f32.xlu0 %v4185_v18  ;;  %v4050_v3 = vpop.f32.mrb[152].mxu1 }
 0x754   : > { %v7518_v22 = vpop.f32.mrb[153].mxu1  ;;  %v7525_v26 = vpop.f32.mrb[95].mxu0  ;;  %v10025_v58 = vmul.f32 0.25, %v4050_v3  ;;  %v10031_v45 = vmul.f32 0.25, %v4100_v20 }
 0x755   : > { %4195 = vmax.xlane.f32.xlu1 %v4194_v44  ;;  %v4053_v34 = vpop.f32.mrb[154].mxu1  ;;  %v10035_v26 = vmul.f32 0.25, %v4097_v49 }
 0x756   : > { %v10027_v31 = vmul.f32 0.25, %v4053_v34  ;;  %v7519_v24 = vpop.f32.mrb[155].mxu1  ;;  %v4197_v22 = vsel %vm2173_vm2, %v10025_v58, -inf  ;;  %v4206_v34 = vsel %vm2173_vm2, %v10031_v45, -inf }
 0x757   : > { %4192 = vmax.xlane.f32.xlu0 %v4191_v6  ;;  %v4203_v49 = vsel %vm2173_vm2, %v10035_v26, -inf }
 0x758   : > { %v4200_v18 = vsel %vm2173_vm2, %v10027_v31, -inf }
 0x759   : > { %4201 = vmax.xlane.f32.xlu1 %v4200_v18 }
 0x75b   : > { %4198 = vmax.xlane.f32.xlu0 %v4197_v22  ;;  %v4144_v3 = vpop.f32.mrb[156].mxu1 }
 0x75c   : > { %v7530_v44 = vpop.f32.mrb[157].mxu1  ;;  %v10041_v6 = vmul.f32 0.25, %v4144_v3 }
 0x75d   : > { %4207 = vmax.xlane.f32.xlu1 %v4206_v34  ;;  %v4147_v24 = vpop.f32.mrb[158].mxu1 }
 0x75e   : > { %v10043_v20 = vmul.f32 0.25, %v4147_v24  ;;  %v7531_v27 = vpop.f32.mrb[159].mxu1  ;;  %v4209_v22 = vsel %vm2173_vm2, %v10041_v6, -inf }
 0x75f   : > { %4204 = vmax.xlane.f32.xlu0 %v4203_v49 }
 0x760   : > { %v4212_v18 = vsel %vm2173_vm2, %v10043_v20, -inf }
 0x761   : > { %4213 = vmax.xlane.f32.xlu1 %v4212_v18 }
 0x763   : > { %4210 = vmax.xlane.f32.xlu0 %v4209_v22 }
 0x7ca   : > { %v4169_v44 = vpop.xlane.xlu0 %4168 }
 0x7cb   : > { %v4215_v34 = vsub.f32 %v9981_v53, %v4169_v44 }
 0x7cc   : > { %v4172_v3 = vpop.xlane.xlu1 %4171 }
 0x7cd   : > { %v4231_v1 = vmul.f32 1.442695, %v4215_v34  ;;  %v4216_v24 = vsub.f32 %v9985_v11, %v4172_v3 }
 0x7cf   : > { %8198 = vpow2.f32 %v4231_v1  ;;  %v4233_v27 = vmul.f32 1.442695, %v4216_v24 }
 0x7d1   : > { %8200 = vpow2.f32 %v4233_v27 }
 0x7d4   : > { %v4175_v41 = vpop.xlane.xlu0 %4174  ;;  %v4184_v14 = vpop.xlane.xlu1 %4183 }
 0x7d5   : > { %v4217_v49 = vsub.f32 %v9995_v42, %v4175_v41  ;;  %v4220_v1 = vsub.f32 %v9997_v48, %v4184_v14 }
 0x7d7   : > { %v4235_v37 = vmul.f32 1.442695, %v4217_v49 }
 0x7d8   : > { %v4181_v18 = vpop.xlane.xlu0 %4180 }
 0x7d9   : > { %v10054_v16 = vpop.eup %8198  ;;  %v4219_v22 = vsub.f32 %v9999_v62, %v4181_v18  ;;  %8202 = vpow2.f32 %v4235_v37  ;;  %v4241_v62 = vmul.f32 1.442695, %v4220_v1 }
 0x7da   : > { %v4263_v53 = vsel %vm2173_vm2, %v10054_v16, 0.0 }
 0x7db   : > { %v10059_v44 = vpop.eup %8200  ;;  %v4239_v11 = vmul.f32 1.442695, %v4219_v22  ;;  %4264 = vadd.xlane.f32.xlu0 %v4263_v53 }
 0x7dc   : > { %v4178_v34 = vpop.xlane.xlu0 %4177  ;;  %v4266_v41 = vsel %vm2173_vm2, %v10059_v44, 0.0 }
 0x7dd   : > { %8204 = vpow2.f32 %v4239_v11  ;;  %v4218_v42 = vsub.f32 %v10005_v57, %v4178_v34  ;;  %4267 = vadd.xlane.f32.xlu1 %v4266_v41 }
 0x7de   : > { %v4190_v3 = vpop.xlane.xlu1 %4189 }
 0x7df   : > { %v4237_v37 = vmul.f32 1.442695, %v4218_v42  ;;  %v4222_v24 = vsub.f32 %v10011_v59, %v4190_v3 }
 0x7e0   : > { %v4187_v27 = vpop.xlane.xlu0 %4186 }
 0x7e1   : > { %8206 = vpow2.f32 %v4237_v37  ;;  %v4221_v49 = vsub.f32 %v10009_v21, %v4187_v27  ;;  %v4245_v48 = vmul.f32 1.442695, %v4222_v24 }
 0x7e2   : > { %v4196_v14 = vpop.xlane.xlu1 %4195  ;;  %8208 = vpow2.f32 %v4241_v62 }
 0x7e3   : > { %v4243_v18 = vmul.f32 1.442695, %v4221_v49  ;;  %v4224_v22 = vsub.f32 %v10015_v0, %v4196_v14  ;;  %v10068_v53 = vpop.eup %8202 }
 0x7e4   : > { %v4193_v11 = vpop.xlane.xlu0 %4192  ;;  %v4269_v1 = vsel %vm2173_vm2, %v10068_v53, 0.0 }
 0x7e5   : > { %8210 = vpow2.f32 %v4243_v18  ;;  %v4223_v57 = vsub.f32 %v10019_v2, %v4193_v11  ;;  %4270 = vadd.xlane.f32.xlu0 %v4269_v1  ;;  %v4249_v21 = vmul.f32 1.442695, %v4224_v22 }
 0x7e6   : > { %v4202_v59 = vpop.xlane.xlu1 %4201  ;;  %8212 = vpow2.f32 %v4245_v48 }
 0x7e7   : > { %v10073_v34 = vpop.eup %8204  ;;  %v4247_v41 = vmul.f32 1.442695, %v4223_v57  ;;  %v4226_v42 = vsub.f32 %v10027_v31, %v4202_v59 }
 0x7e8   : > { %v4199_v3 = vpop.xlane.xlu0 %4198  ;;  %v4275_v0 = vsel %vm2173_vm2, %v10073_v34, 0.0 }
 0x7e9   : > { %8214 = vpow2.f32 %v4247_v41  ;;  %v4225_v62 = vsub.f32 %v10025_v58, %v4199_v3  ;;  %4276 = vadd.xlane.f32.xlu0 %v4275_v0  ;;  %v4253_v24 = vmul.f32 1.442695, %v4226_v42 }
 0x7ea   : > { %v4208_v2 = vpop.xlane.xlu1 %4207  ;;  %8216 = vpow2.f32 %v4249_v21 }
 0x7eb   : > { %v10079_v37 = vpop.eup %8206  ;;  %v4251_v27 = vmul.f32 1.442695, %v4225_v62  ;;  %v4228_v49 = vsub.f32 %v10031_v45, %v4208_v2 }
 0x7ec   : > { %v4205_v14 = vpop.xlane.xlu0 %4204  ;;  %v4272_v31 = vsel %vm2173_vm2, %v10079_v37, 0.0  ;;  %v10084_v48 = vpop.eup %8208 }
 0x7ed   : > { %8218 = vpow2.f32 %v4251_v27  ;;  %v4227_v18 = vsub.f32 %v10035_v26, %v4205_v14  ;;  %4273 = vadd.xlane.f32.xlu1 %v4272_v31  ;;  %v4257_v22 = vmul.f32 1.442695, %v4228_v49  ;;  %v4278_v45 = vsel %vm2173_vm2, %v10084_v48, 0.0 }
 0x7ee   : > { %8220 = vpow2.f32 %v4253_v24 }
 0x7ef   : > { %v10087_v58 = vpop.eup %8210  ;;  %v4255_v11 = vmul.f32 1.442695, %v4227_v18 }
 0x7f0   : > { %v4211_v57 = vpop.xlane.xlu0 %4210  ;;  %v4281_v1 = vsel %vm2173_vm2, %v10087_v58, 0.0  ;;  %v10093_v59 = vpop.eup %8212 }
 0x7f1   : > { %8222 = vpow2.f32 %v4255_v11  ;;  %v4229_v21 = vsub.f32 %v10041_v6, %v4211_v57  ;;  %4282 = vadd.xlane.f32.xlu0 %v4281_v1  ;;  %4279 = vadd.xlane.f32.xlu1 %v4278_v45  ;;  %v4284_v3 = vsel %vm2173_vm2, %v10093_v59, 0.0  ;;  %v4214_v57 = vpop.xlane.xlu1 %4213 }
 0x7f2   : > { %8224 = vpow2.f32 %v4257_v22  ;;  %v4230_v1 = vsub.f32 %v10043_v20, %v4214_v57 }
 0x7f3   : > { %v10096_v26 = vpop.eup %8214  ;;  %v4259_v41 = vmul.f32 1.442695, %v4229_v21 }
 0x7f4   : > { %v4287_v42 = vsel %vm2173_vm2, %v10096_v26, 0.0  ;;  %v10102_v0 = vpop.eup %8216  ;;  %v4261_v45 = vmul.f32 1.442695, %v4230_v1 }
 0x7f5   : > { %8226 = vpow2.f32 %v4259_v41  ;;  %4288 = vadd.xlane.f32.xlu0 %v4287_v42  ;;  %4285 = vadd.xlane.f32.xlu1 %v4284_v3  ;;  %v4290_v2 = vsel %vm2173_vm2, %v10102_v0, 0.0 }
 0x7f6   : > { %8228 = vpow2.f32 %v4261_v45 }
 0x7f7   : > { %v10104_v62 = vpop.eup %8218 }
 0x7f8   : > { %v4293_v6 = vsel %vm2173_vm2, %v10104_v62, 0.0  ;;  %v10110_v24 = vpop.eup %8220 }
 0x7f9   : > { %4294 = vadd.xlane.f32.xlu0 %v4293_v6  ;;  %4291 = vadd.xlane.f32.xlu1 %v4290_v2  ;;  %v4296_v14 = vsel %vm2173_vm2, %v10110_v24, 0.0 }
 0x7fb   : > { %v10112_v27 = vpop.eup %8222 }
 0x7fc   : > { %v4299_v49 = vsel %vm2173_vm2, %v10112_v27, 0.0  ;;  %v10118_v31 = vpop.eup %8224 }
 0x7fd   : > { %4300 = vadd.xlane.f32.xlu0 %v4299_v49  ;;  %4297 = vadd.xlane.f32.xlu1 %v4296_v14  ;;  %v4302_v11 = vsel %vm2173_vm2, %v10118_v31, 0.0 }
 0x7ff   : > { %v10120_v18 = vpop.eup %8226 }
 0x800   : > { %v4305_v22 = vsel %vm2173_vm2, %v10120_v18, 0.0 }
 0x801   : > { %4306 = vadd.xlane.f32.xlu0 %v4305_v22  ;;  %4303 = vadd.xlane.f32.xlu1 %v4302_v11 }
 0x812   : > { %4721 = vrot.lane.b32.xlu1 %v9052_v19, %s8524_s29 }
 0x817   : > { %4724 = vrot.lane.b32.xlu0 %v9041_v7, %s8524_s29  ;;  %v10143_v7 = vpop.eup %8228 }
 0x818   : > { %v4308_v19 = vsel %vm2173_vm2, %v10143_v7, 0.0 }
 0x81b   : > { %4830 = vrot.lane.b32.xlu0 %v9083_v50, %s8524_s29 }
 0x81f   : > { %4883 = vrot.lane.b32.xlu0 %v9106_v15, %s8524_s29 }
 0x823   : > { %4936 = vrot.lane.b32.xlu0 %v9129_v43, %s8524_s29 }
 0x827   : > { %4989 = vrot.lane.b32.xlu0 %v11399_v36, %s8524_s29 }
 0x82b   : > { %5042 = vrot.lane.b32.xlu0 %v9175_v46, %s8524_s29 }
 0x82f   : > { %5095 = vrot.lane.b32.xlu0 %v11403_v8, %s8524_s29 }
 0x833   : > { %5362 = vrot.lane.b32.xlu0 %v11401_v29, %s8524_s29 }
 0x836   : > { %4309 = vadd.xlane.f32.xlu1 %v4308_v19 }
 0x847   : > { %4777 = vrot.lane.b32.xlu1 %v9060_v28, %s8524_s29 }
 0x84b   : > { %4774 = vrot.lane.b32.xlu1 %v9075_v40, %s8524_s29 }
 0x84f   : > { %4827 = vrot.lane.b32.xlu1 %v9098_v5, %s8524_s29 }
 0x853   : > { %4880 = vrot.lane.b32.xlu1 %v11398_v10, %s8524_s29 }
 0x857   : > { %4933 = vrot.lane.b32.xlu1 %v9144_v63, %s8524_s29 }
 0x85b   : > { %4986 = vrot.lane.b32.xlu1 %v11402_v32, %s8524_s29 }
 0x85f   : > { %5039 = vrot.lane.b32.xlu1 %v11400_v17, %s8524_s29  ;;  %v11406_v17 = vld [vmem:[#allocation30_spill] sm:$0xff] }
 0x863   : > { %5092 = vrot.lane.b32.xlu1 %v11404_v30, %s8524_s29 }
 0x868   : > { %v4265_v28 = vpop.xlane.xlu0 %4264 }
 0x869   : > { %8230 = vrcp.f32 %v4265_v28 }
 0x86a   : > { %v4268_v40 = vpop.xlane.xlu1 %4267 }
 0x86b   : > { %8232 = vrcp.f32 %v4268_v40  ;;  %v11408_v40 = vld [vmem:[#allocation32_spill] sm:$0xff] }
 0x872   : > { %v4271_v5 = vpop.xlane.xlu0 %4270 }
 0x873   : > { %v8231_v50 = vpop.eup %8230  ;;  %8234 = vrcp.f32 %v4271_v5 }
 0x874   : > { %v4327_v15 = vmul.f32 %v8231_v50, %v10054_v16 }
 0x875   : > { %v8233_v43 = vpop.eup %8232 }
 0x876   : > { %7059 = vst.msk [vmem:[%s9480_s26 + $0x20] sm:$0xff] %vm2173_vm2, %v4327_v15  ;;  %v4328_v63 = vmul.f32 %v8233_v43, %v10059_v44  ;;  %v4277_v46 = vpop.xlane.xlu0 %4276  ;;  %v11409_v43 = vld [vmem:[#allocation33_spill] sm:$0xff] }
 0x877   : > { %8236 = vrcp.f32 %v4277_v46 }
 0x878   : > { %7060 = vst.msk [vmem:[%s9480_s26 + $0x28] sm:$0xff] %vm2173_vm2, %v4328_v63  ;;  %v4360_v10 = vpack.c.bf16 %v4328_v63, %v4327_v15 }
 0x87a   : > { %7535 = vmatmul.mubr.msk.bf16.vlgmr.msra.gmra.mrb[96].mxu0 %vm2173_vm2, %v4360_v10  ;;  %v4274_v36 = vpop.xlane.xlu1 %4273 }
 0x87b   : > { %7545 = vmatpush3.bf16.msra.mxu0 %v11406_v17  ;;  %8238 = vrcp.f32 %v4274_v36  ;;  %7546 = vmatprep.mubr.msk.bf16.mxu0 %vm8523_vm0, %v11381_v39  ;;  %v11410_v36 = vld [vmem:[#allocation34_spill] sm:$0xff] }
 0x87c   : > { %7556 = vmatprep.subr.bf16.mxu0 %v11381_v39 }
 0x87d   : > { %v8235_v16 = vpop.eup %8234 }
 0x87e   : > { %v4283_v29 = vpop.xlane.xlu0 %4282  ;;  %v4280_v32 = vpop.xlane.xlu1 %4279  ;;  %v4329_v8 = vmul.f32 %v8235_v16, %v10068_v53 }
 0x87f   : > { %8240 = vrcp.f32 %v4283_v29 }
 0x880   : > { %8242 = vrcp.f32 %v4280_v32  ;;  %7061 = vst.msk [vmem:[%s9480_s26 + $0x60] sm:$0xff] %vm2173_vm2, %v4329_v8 }
 0x881   : > { %v8237_v30 = vpop.eup %8236 }
 0x882   : > { %v4289_v20 = vpop.xlane.xlu0 %4288  ;;  %v4286_v44 = vpop.xlane.xlu1 %4285  ;;  %v4331_v21 = vmul.f32 %v8237_v30, %v10073_v34 }
 0x883   : > { %8244 = vrcp.f32 %v4289_v20 }
 0x884   : > { %8246 = vrcp.f32 %v4286_v44  ;;  %7063 = vst.msk [vmem:[%s9480_s26 + $0xa0] sm:$0xff] %vm2173_vm2, %v4331_v21 }
 0x885   : > { %v8239_v41 = vpop.eup %8238 }
 0x886   : > { %v4330_v42 = vmul.f32 %v8239_v41, %v10079_v37  ;;  %v4295_v3 = vpop.xlane.xlu0 %4294  ;;  %v4292_v53 = vpop.xlane.xlu1 %4291  ;;  %v11407_v37 = vld [vmem:[#allocation31_spill] sm:$0xff] }
 0x887   : > { %8248 = vrcp.f32 %v4295_v3 }
 0x888   : > { %7062 = vst.msk [vmem:[%s9480_s26 + $0x68] sm:$0xff] %vm2173_vm2, %v4330_v42  ;;  %8250 = vrcp.f32 %v4292_v53  ;;  %v4361_v6 = vpack.c.bf16 %v4330_v42, %v4329_v8  ;;  %v11411_v8 = vld [vmem:[#allocation35_spill] sm:$0xff] }
 0x889   : > { %v8241_v2 = vpop.eup %8240 }
 0x88a   : > { %v8243_v49 = vpop.eup %8242  ;;  %v4333_v34 = vmul.f32 %v8241_v2, %v10087_v58  ;;  %v4301_v14 = vpop.xlane.xlu0 %4300  ;;  %7541 = vmatmul.mubr.msk.bf16.vlgmr.msra.gmra.mrb[160].mxu1 %vm2173_vm2, %v4361_v6 }
 0x88b   : > { %v4298_v22 = vpop.xlane.xlu1 %4297  ;;  %v4332_v11 = vmul.f32 %v8243_v49, %v10084_v48  ;;  %8252 = vrcp.f32 %v4301_v14  ;;  %7551 = vmatpush3.bf16.msra.mxu1 %v11407_v37  ;;  %7552 = vmatprep.mubr.msk.bf16.mxu1 %vm8523_vm0, %v11381_v39 }
 0x88c   : > { %7065 = vst.msk [vmem:[%s9480_s26 + $0xe0] sm:$0xff] %vm2173_vm2, %v4333_v34  ;;  %8254 = vrcp.f32 %v4298_v22  ;;  %7562 = vmatprep.subr.bf16.mxu1 %v11381_v39 }
 0x88d   : > { %v8245_v58 = vpop.eup %8244  ;;  %7064 = vst.msk [vmem:[%s9480_s26 + $0xa8] sm:$0xff] %vm2173_vm2, %v4332_v11  ;;  %v4362_v57 = vpack.c.bf16 %v4332_v11, %v4331_v21 }
 0x88e   : > { %v8247_v1 = vpop.eup %8246  ;;  %v4335_v48 = vmul.f32 %v8245_v58, %v10096_v26  ;;  %v4307_v45 = vpop.xlane.xlu0 %4306 }
 0x88f   : > { %v4304_v19 = vpop.xlane.xlu1 %4303  ;;  %v4334_v28 = vmul.f32 %v8247_v1, %v10093_v59  ;;  %8256 = vrcp.f32 %v4307_v45  ;;  %7547 = vmatmul.mubr.msk.bf16.vlgmr.msra.gmra.mrb[100].mxu0 %vm2173_vm2, %v4362_v57 }
 0x890   : > { %7067 = vst.msk [vmem:[%s9480_s26 + $0x120] sm:$0xff] %vm2173_vm2, %v4335_v48  ;;  %7557 = vmatpush3.bf16.msra.mxu0 %v11408_v40  ;;  %8258 = vrcp.f32 %v4304_v19  ;;  %7558 = vmatprep.mubr.msk.bf16.mxu0 %vm8523_vm0, %v11381_v39 }
 0x891   : > { %v8249_v50 = vpop.eup %8248  ;;  %7066 = vst.msk [vmem:[%s9480_s26 + $0xe8] sm:$0xff] %vm2173_vm2, %v4334_v28  ;;  %v4363_v26 = vpack.c.bf16 %v4334_v28, %v4333_v34  ;;  %7568 = vmatprep.subr.bf16.mxu0 %v11381_v39 }
 0x892   : > { %v8251_v59 = vpop.eup %8250  ;;  %v4337_v5 = vmul.f32 %v8249_v50, %v10104_v62  ;;  %v4725_v30 = vpop.permute.xlu0 %4724 }
 0x893   : > { %v4336_v15 = vmul.f32 %v8251_v59, %v10102_v0  ;;  %7553 = vmatmul.mubr.msk.bf16.vlgmr.msra.gmra.mrb[164].mxu1 %vm2173_vm2, %v4363_v26  ;;  %v4722_v44 = vpop.permute.xlu1 %4721 }
 0x894   : > { %7069 = vst.msk [vmem:[%s9480_s26 + $0x160] sm:$0xff] %vm2173_vm2, %v4337_v5  ;;  %7563 = vmatpush3.bf16.msra.mxu1 %v11409_v43  ;;  %7564 = vmatprep.mubr.msk.bf16.mxu1 %vm8523_vm0, %v11381_v39 }
 0x895   : > { %v8253_v63 = vpop.eup %8252  ;;  %7068 = vst.msk [vmem:[%s9480_s26 + $0x128] sm:$0xff] %vm2173_vm2, %v4336_v15  ;;  %v4364_v46 = vpack.c.bf16 %v4336_v15, %v4335_v48  ;;  %7574 = vmatprep.subr.bf16.mxu1 %v11381_v39 }
 0x896   : > { %v8255_v62 = vpop.eup %8254  ;;  %v4339_v0 = vmul.f32 %v8253_v63, %v10112_v27 }
 0x897   : > { %v4338_v10 = vmul.f32 %v8255_v62, %v10110_v24  ;;  %7559 = vmatmul.mubr.msk.bf16.vlgmr.msra.gmra.mrb[104].mxu0 %vm2173_vm2, %v4364_v46 }
 0x898   : > { %7071 = vst.msk [vmem:[%s9480_s26 + $0x1a0] sm:$0xff] %vm2173_vm2, %v4339_v0  ;;  %7569 = vmatpush3.bf16.msra.mxu0 %v11410_v36  ;;  %7570 = vmatprep.mubr.msk.bf16.mxu0 %vm8523_vm0, %v11381_v39 }
 0x899   : > { %v8257_v16 = vpop.eup %8256  ;;  %7070 = vst.msk [vmem:[%s9480_s26 + $0x168] sm:$0xff] %vm2173_vm2, %v4338_v10  ;;  %v4365_v29 = vpack.c.bf16 %v4338_v10, %v4337_v5  ;;  %7580 = vmatprep.subr.bf16.mxu0 %v11381_v39 }
 0x89a   : > { %v8259_v32 = vpop.eup %8258  ;;  %v4341_v27 = vmul.f32 %v8257_v16, %v10120_v18  ;;  %v4730_v18 = vsel %vm1780_vm1, %v4725_v30, 0 }
 0x89b   : > { %v4340_v24 = vmul.f32 %v8259_v32, %v10118_v31  ;;  %7565 = vmatmul.mubr.msk.bf16.vlgmr.msra.gmra.mrb[168].mxu1 %vm2173_vm2, %v4365_v29  ;;  %v4831_v31 = vpop.permute.xlu0 %4830 }
 0x89c   : > { %7073 = vst.msk [vmem:[%s9480_s26 + $0x1e0] sm:$0xff] %vm2173_vm2, %v4341_v27  ;;  %7575 = vmatpush3.bf16.msra.mxu1 %v11411_v8  ;;  %7576 = vmatprep.mubr.msk.bf16.mxu1 %vm8523_vm0, %v11381_v39  ;;  %v4836_v21 = vsel %vm1780_vm1, %v4831_v31, 0 }
 0x89d   : > { %7072 = vst.msk [vmem:[%s9480_s26 + $0x1a8] sm:$0xff] %vm2173_vm2, %v4340_v24  ;;  %v4366_v20 = vpack.c.bf16 %v4340_v24, %v4339_v0  ;;  %7586 = vmatprep.subr.bf16.mxu1 %v11381_v39 }
 0x89f   : > { %7571 = vmatmul.mubr.msk.bf16.vlgmr.msra.gmra.mrb[108].mxu0 %vm2173_vm2, %v4366_v20  ;;  %v4884_v41 = vpop.permute.xlu0 %4883 }
 0x8a0   : > { %7582 = vmatprep.mubr.msk.bf16.mxu0 %vm8523_vm0, %v11381_v39  ;;  %v4889_v19 = vsel %vm1780_vm1, %v4884_v41, 0 }
 0x8a1   : > { %7581 = vmatpush3.bf16.xpose.msra.mxu0 %v4730_v18 }
 0x8a2   : > { %7592 = vmatprep.subr.bf16.mxu0 %v11381_v39 }
 0x8a3   : > { %v4937_v53 = vpop.permute.xlu0 %4936 }
 0x8a4   : > { %v4942_v22 = vsel %vm1780_vm1, %v4937_v53, 0 }
 0x8a7   : > { %v4990_v49 = vpop.permute.xlu0 %4989 }
 0x8a8   : > { %7583 = vmatmul.mubr.msk.bf16.vlgmr.msra.gmra.mrb[112].mxu0 %vm1780_vm1, %v4722_v44  ;;  %v4995_v59 = vsel %vm1780_vm1, %v4990_v49, 0 }
 0x8a9   : > { %7593 = vmatpush3.bf16.xpose.msra.mxu0 %v4836_v21  ;;  %7594 = vmatprep.mubr.msk.bf16.mxu0 %vm8523_vm0, %v11381_v39 }
 0x8aa   : > { %7604 = vmatprep.subr.bf16.mxu0 %v11381_v39 }
 0x8c3   : > { %v4310_v42 = vpop.xlane.xlu1 %4309 }
 0x8c4   : > { %8260 = vrcp.f32 %v4310_v42 }
 0x8c7   : > { %v4778_v3 = vpop.permute.xlu1 %4777 }
 0x8c8   : > { %v4783_v58 = vsel %vm1780_vm1, %v4778_v3, 0 }
 0x8cb   : > { %v4775_v6 = vpop.permute.xlu1 %4774 }
 0x8ce   : > { %v8261_v2 = vpop.eup %8260 }
 0x8cf   : > { %v4342_v34 = vmul.f32 %v8261_v2, %v10143_v7  ;;  %v4828_v14 = vpop.permute.xlu1 %4827  ;;  %v5043_v7 = vpop.permute.xlu0 %5042 }
 0x8d0   : > { %7595 = vmatmul.mubr.msk.bf16.vlgmr.msra.gmra.mrb[116].mxu0 %vm1780_vm1, %v4828_v14  ;;  %v5048_v48 = vsel %vm1780_vm1, %v5043_v7, 0 }
 0x8d1   : > { %7074 = vst.msk [vmem:[%s9480_s26 + $0x1e8] sm:$0xff] %vm2173_vm2, %v4342_v34  ;;  %7605 = vmatpush3.bf16.xpose.msra.mxu0 %v4942_v22  ;;  %v4367_v11 = vpack.c.bf16 %v4342_v34, %v4341_v27  ;;  %7606 = vmatprep.mubr.msk.bf16.mxu0 %vm8523_vm0, %v11381_v39 }
 0x8d2   : > { %7616 = vmatprep.subr.bf16.mxu0 %v11381_v39 }
 0x8d3   : > { %7577 = vmatmul.mubr.msk.bf16.vlgmr.msra.gmra.mrb[172].mxu1 %vm2173_vm2, %v4367_v11  ;;  %v4881_v57 = vpop.permute.xlu1 %4880  ;;  %v5096_v45 = vpop.permute.xlu0 %5095 }
 0x8d4   : > { %7587 = vmatpush3.bf16.xpose.msra.mxu1 %v4783_v58  ;;  %7588 = vmatprep.mubr.msk.bf16.mxu1 %vm8523_vm0, %v11381_v39  ;;  %v5101_v5 = vsel %vm1780_vm1, %v5096_v45, 0 }
 0x8d5   : > { %7598 = vmatprep.subr.bf16.mxu1 %v11381_v39 }
 0x8d7   : > { %v4934_v1 = vpop.permute.xlu1 %4933  ;;  %v5363_v26 = vpop.permute.xlu0 %5362 }
 0x8d8   : > { %7607 = vmatmul.mubr.msk.bf16.vlgmr.msra.gmra.mrb[120].mxu0 %vm1780_vm1, %v4934_v1 }
 0x8d9   : > { %7617 = vmatpush3.bf16.xpose.msra.mxu0 %v5048_v48  ;;  %7618 = vmatprep.mubr.msk.bf16.mxu0 %vm8523_vm0, %v11381_v39 }
 0x8da   : > { %7628 = vmatprep.subr.bf16.mxu0 %v11381_v39 }
 0x8db   : > { %7589 = vmatmul.mubr.msk.bf16.vlgmr.msra.gmra.mrb[176].mxu1 %vm1780_vm1, %v4775_v6  ;;  %v4987_v28 = vpop.permute.xlu1 %4986 }
 0x8dc   : > { %7599 = vmatpush3.bf16.xpose.msra.mxu1 %v4889_v19  ;;  %7600 = vmatprep.mubr.msk.bf16.mxu1 %vm8523_vm0, %v11381_v39 }
 0x8dd   : > { %7610 = vmatprep.subr.bf16.mxu1 %v11381_v39 }
 0x8df   : > { %v5040_v50 = vpop.permute.xlu1 %5039 }
 0x8e0   : > { %7619 = vmatmul.mubr.msk.bf16.vlgmr.msra.gmra.mrb[124].mxu0 %vm1780_vm1, %v5040_v50 }
 0x8e1   : > { %7629 = vmatpush3.bf16.msra.mxu0 %v5363_v26  ;;  %7630 = vmatprep.mubr.msk.bf16.mxu0 %vm8523_vm0, %v11381_v39 }
 0x8e2   : > { %7640 = vmatprep.subr.bf16.mxu0 %v11381_v39 }
 0x8e3   : > { %7601 = vmatmul.mubr.msk.bf16.vlgmr.msra.gmra.mrb[180].mxu1 %vm1780_vm1, %v4881_v57  ;;  %v5093_v15 = vpop.permute.xlu1 %5092 }
 0x8e4   : > { %7611 = vmatpush3.bf16.xpose.msra.mxu1 %v4995_v59  ;;  %7612 = vmatprep.mubr.msk.bf16.mxu1 %vm8523_vm0, %v11381_v39 }
 0x8e5   : > { %7622 = vmatprep.subr.bf16.mxu1 %v11381_v39 }
 0x8eb   : > { %7613 = vmatmul.mubr.msk.bf16.vlgmr.msra.gmra.mrb[184].mxu1 %vm1780_vm1, %v4987_v28 }
 0x8ec   : > { %7623 = vmatpush3.bf16.xpose.msra.mxu1 %v5101_v5  ;;  %7624 = vmatprep.mubr.msk.bf16.mxu1 %vm8523_vm0, %v11381_v39 }
 0x8ed   : > { %7634 = vmatprep.subr.bf16.mxu1 %v11381_v39 }
 0x8f3   : > { %7625 = vmatmul.mubr.msk.bf16.vlgmr.msra.gmra.mrb[188].mxu1 %vm1780_vm1, %v5093_v15 }
 0x8f4   : > { %7636 = vmatprep.mubr.msk.bf16.mxu1 %vm8523_vm0, %v11381_v39 }
 0x94d   : > { %v10290_v63 = vpop.f32.mrb[96].mxu0 }
 0x94e   : > { %v7536_v46 = vpop.f32.mrb[97].mxu0 }
 0x94f   : > { %v10292_v62 = vpop.f32.mrb[98].mxu0 }
 0x950   : > { %v7537_v0 = vpop.f32.mrb[99].mxu0 }
 0x95d   : > { %v10294_v10 = vpop.f32.mrb[160].mxu1 }
 0x95e   : > { %v7542_v16 = vpop.f32.mrb[161].mxu1 }
 0x95f   : > { %v10296_v29 = vpop.f32.mrb[162].mxu1 }
 0x960   : > { %v7543_v32 = vpop.f32.mrb[163].mxu1 }
 0x962   : > { %v10298_v27 = vpop.f32.mrb[100].mxu0 }
 0x963   : > { %v7548_v24 = vpop.f32.mrb[101].mxu0 }
 0x964   : > { %v10300_v30 = vpop.f32.mrb[102].mxu0 }
 0x965   : > { %v7549_v20 = vpop.f32.mrb[103].mxu0 }
 0x966   : > { %v10302_v18 = vpop.f32.mrb[164].mxu1 }
 0x967   : > { %v7554_v31 = vpop.f32.mrb[165].mxu1 }
 0x968   : > { %v10304_v44 = vpop.f32.mrb[166].mxu1 }
 0x969   : > { %v7555_v21 = vpop.f32.mrb[167].mxu1 }
 0x96a   : > { %v10306_v41 = vpop.f32.mrb[104].mxu0 }
 0x96b   : > { %v7560_v42 = vpop.f32.mrb[105].mxu0 }
 0x96c   : > { %v10308_v3 = vpop.f32.mrb[106].mxu0 }
 0x96d   : > { %v7561_v53 = vpop.f32.mrb[107].mxu0 }
 0x96e   : > { %v10310_v6 = vpop.f32.mrb[168].mxu1 }
 0x96f   : > { %v7566_v2 = vpop.f32.mrb[169].mxu1 }
 0x970   : > { %v10312_v49 = vpop.f32.mrb[170].mxu1 }
 0x971   : > { %v7567_v34 = vpop.f32.mrb[171].mxu1 }
 0x972   : > { %v10314_v14 = vpop.f32.mrb[108].mxu0 }
 0x973   : > { %v7572_v22 = vpop.f32.mrb[109].mxu0 }
 0x974   : > { %v10316_v11 = vpop.f32.mrb[110].mxu0 }
 0x975   : > { %11412 = vst [vmem:[#allocation22_spill] sm:$0xff] %v10316_v11  ;;  %v7573_v58 = vpop.f32.mrb[111].mxu0 }
 0x97b   : > { %v4766_v57 = vpop.f32.mrb[112].mxu0 }
 0x97c   : > { %v10318_v7 = vmul.f32 0.25, %v4766_v57  ;;  %v7584_v1 = vpop.f32.mrb[113].mxu0 }
 0x97d   : > { %v4769_v48 = vpop.f32.mrb[114].mxu0 }
 0x97e   : > { %v10320_v45 = vmul.f32 0.25, %v4769_v48  ;;  %v7585_v19 = vpop.f32.mrb[115].mxu0  ;;  %v5160_v28 = vsel %vm2173_vm2, %v10318_v7, -inf }
 0x97f   : > { %5161 = vmax.xlane.f32.xlu0 %v5160_v28 }
 0x980   : > { %v5163_v50 = vsel %vm2173_vm2, %v10320_v45, -inf }
 0x981   : > { %5164 = vmax.xlane.f32.xlu1 %v5163_v50 }
 0x992   : > { %5410 = vrot.lane.b32.xlu1 %v11405_v54, %s8524_s29 }
 0x9a3   : > { %v4872_v26 = vpop.f32.mrb[116].mxu0 }
 0x9a4   : > { %v7596_v59 = vpop.f32.mrb[117].mxu0  ;;  %v10334_v54 = vmul.f32 0.25, %v4872_v26 }
 0x9a5   : > { %v4875_v5 = vpop.f32.mrb[118].mxu0 }
 0x9a6   : > { %v10328_v15 = vpop.f32.mrb[172].mxu1  ;;  %v7597_v46 = vpop.f32.mrb[119].mxu0  ;;  %v10336_v22 = vmul.f32 0.25, %v4875_v5  ;;  %v5172_v59 = vsel %vm2173_vm2, %v10334_v54, -inf }
 0x9a7   : > { %11413 = vst [vmem:[#allocation23_spill] sm:$0xff] %v10328_v15  ;;  %v7578_v0 = vpop.f32.mrb[173].mxu1 }
 0x9a8   : > { %v10330_v16 = vpop.f32.mrb[174].mxu1  ;;  %v5175_v28 = vsel %vm2173_vm2, %v10336_v22, -inf }
 0x9a9   : > { %11414 = vst [vmem:[#allocation25_spill] sm:$0xff] %v10330_v16  ;;  %v7579_v32 = vpop.f32.mrb[175].mxu1 }
 0x9ab   : > { %v4978_v24 = vpop.f32.mrb[120].mxu0 }
 0x9ac   : > { %v7608_v20 = vpop.f32.mrb[121].mxu0 }
 0x9ad   : > { %v4981_v31 = vpop.f32.mrb[122].mxu0 }
 0x9ae   : > { %v4819_v21 = vpop.f32.mrb[176].mxu1  ;;  %v7609_v42 = vpop.f32.mrb[123].mxu0 }
 0x9af   : > { %v10332_v53 = vmul.f32 0.25, %v4819_v21  ;;  %v7590_v2 = vpop.f32.mrb[177].mxu1 }
 0x9b0   : > { %v4822_v34 = vpop.f32.mrb[178].mxu1  ;;  %v10352_v2 = vmul.f32 0.25, %v4981_v31 }
 0x9b1   : > { %v7591_v58 = vpop.f32.mrb[179].mxu1  ;;  %v5166_v57 = vsel %vm2173_vm2, %v10332_v53, -inf  ;;  %v10340_v19 = vmul.f32 0.25, %v4822_v34 }
 0x9b2   : > { %5167 = vmax.xlane.f32.xlu0 %v5166_v57  ;;  %v10356_v58 = vmul.f32 0.25, %v4978_v24 }
 0x9b3   : > { %v5084_v1 = vpop.f32.mrb[124].mxu0  ;;  %v5169_v42 = vsel %vm2173_vm2, %v10340_v19, -inf }
 0x9b4   : > { %v7620_v48 = vpop.f32.mrb[125].mxu0  ;;  %v5184_v24 = vsel %vm2173_vm2, %v10356_v58, -inf }
 0x9b5   : > { %v5087_v50 = vpop.f32.mrb[126].mxu0 }
 0x9b6   : > { %5176 = vmax.xlane.f32.xlu1 %v5175_v28  ;;  %v7621_v26 = vpop.f32.mrb[127].mxu0  ;;  %5173 = vmax.xlane.f32.xlu0 %v5172_v59  ;;  %v4925_v5 = vpop.f32.mrb[180].mxu1  ;;  %v5187_v59 = vsel %vm2173_vm2, %v10352_v2, -inf }
 0x9b7   : > { %v7602_v46 = vpop.f32.mrb[181].mxu1  ;;  %v10346_v32 = vmul.f32 0.25, %v4925_v5 }
 0x9b8   : > { %v4928_v0 = vpop.f32.mrb[182].mxu1 }
 0x9b9   : > { %v10348_v20 = vmul.f32 0.25, %v4928_v0  ;;  %v7603_v21 = vpop.f32.mrb[183].mxu1  ;;  %v5178_v57 = vsel %vm2173_vm2, %v10346_v32, -inf  ;;  %v10368_v0 = vmul.f32 0.25, %v5087_v50 }
 0x9ba   : > { %5170 = vmax.xlane.f32.xlu0 %v5169_v42  ;;  %v10372_v42 = vmul.f32 0.25, %v5084_v1 }
 0x9bb   : > { %v5181_v34 = vsel %vm2173_vm2, %v10348_v20, -inf }
 0x9bc   : > { %5182 = vmax.xlane.f32.xlu1 %v5181_v34  ;;  %v5196_v1 = vsel %vm2173_vm2, %v10372_v42, -inf }
 0x9be   : > { %5179 = vmax.xlane.f32.xlu0 %v5178_v57  ;;  %v5031_v48 = vpop.f32.mrb[184].mxu1 }
 0x9bf   : > { %v7614_v28 = vpop.f32.mrb[185].mxu1  ;;  %v10362_v5 = vmul.f32 0.25, %v5031_v48 }
 0x9c0   : > { %5188 = vmax.xlane.f32.xlu1 %v5187_v59  ;;  %v5034_v26 = vpop.f32.mrb[186].mxu1  ;;  %v5199_v28 = vsel %vm2173_vm2, %v10368_v0, -inf }
 0x9c1   : > { %v10364_v31 = vmul.f32 0.25, %v5034_v26  ;;  %v7615_v46 = vpop.f32.mrb[187].mxu1  ;;  %v5190_v34 = vsel %vm2173_vm2, %v10362_v5, -inf }
 0x9c2   : > { %5185 = vmax.xlane.f32.xlu0 %v5184_v24 }
 0x9c3   : > { %v5193_v21 = vsel %vm2173_vm2, %v10364_v31, -inf }
 0x9c4   : > { %5194 = vmax.xlane.f32.xlu1 %v5193_v21 }
 0x9c6   : > { %5191 = vmax.xlane.f32.xlu0 %v5190_v34  ;;  %v5137_v57 = vpop.f32.mrb[188].mxu1 }
 0x9c7   : > { %v7626_v48 = vpop.f32.mrb[189].mxu1  ;;  %v10378_v26 = vmul.f32 0.25, %v5137_v57 }
 0x9c8   : > { %5200 = vmax.xlane.f32.xlu1 %v5199_v28  ;;  %v5140_v59 = vpop.f32.mrb[190].mxu1 }
 0x9c9   : > { %v10380_v50 = vmul.f32 0.25, %v5140_v59  ;;  %v7627_v46 = vpop.f32.mrb[191].mxu1  ;;  %v5202_v21 = vsel %vm2173_vm2, %v10378_v26, -inf }
 0x9ca   : > { %5197 = vmax.xlane.f32.xlu0 %v5196_v1 }
 0x9cb   : > { %v5205_v24 = vsel %vm2173_vm2, %v10380_v50, -inf }
 0x9cc   : > { %5206 = vmax.xlane.f32.xlu1 %v5205_v24 }
 0x9ce   : > { %5203 = vmax.xlane.f32.xlu0 %v5202_v21 }
 0x9dd   : > { %5506 = vrot.lane.b32.xlu1 %v11407_v37, %s8524_s29 }
 0x9e4   : > { %5458 = vrot.lane.b32.xlu0 %v11406_v17, %s8524_s29 }
 0xa0c   : > { %v5162_v34 = vpop.xlane.xlu0 %5161 }
 0xa0d   : > { %v5208_v57 = vsub.f32 %v10318_v7, %v5162_v34 }
 0xa0e   : > { %v5165_v48 = vpop.xlane.xlu1 %5164 }
 0xa0f   : > { %v5224_v28 = vmul.f32 1.442695, %v5208_v57  ;;  %v5209_v59 = vsub.f32 %v10320_v45, %v5165_v48 }
 0xa11   : > { %8262 = vpow2.f32 %v5224_v28  ;;  %v5226_v46 = vmul.f32 1.442695, %v5209_v59 }
 0xa12   : > { %v5411_v1 = vpop.permute.xlu1 %5410 }
 0xa13   : > { %8264 = vpow2.f32 %v5226_v46  ;;  %7635 = vmatpush3.bf16.msra.mxu1 %v5411_v1 }
 0xa14   : > { %7646 = vmatprep.subr.bf16.mxu1 %v11381_v39 }
 0xa1b   : > { %v10395_v24 = vpop.eup %8262 }
 0xa1c   : > { %v5256_v37 = vsel %vm2173_vm2, %v10395_v24, 0.0 }
 0xa1d   : > { %v10399_v17 = vpop.eup %8264  ;;  %5257 = vadd.xlane.f32.xlu0 %v5256_v37 }
 0xa1e   : > { %v5259_v7 = vsel %vm2173_vm2, %v10399_v17, 0.0 }
 0xa1f   : > { %5260 = vadd.xlane.f32.xlu1 %v5259_v7 }
 0xa3f   : > { %v5168_v45 = vpop.xlane.xlu0 %5167 }
 0xa40   : > { %v5210_v21 = vsub.f32 %v10332_v53, %v5168_v45 }
 0xa42   : > { %v5228_v34 = vmul.f32 1.442695, %v5210_v21 }
 0xa43   : > { %v5177_v57 = vpop.xlane.xlu1 %5176  ;;  %v5174_v48 = vpop.xlane.xlu0 %5173 }
 0xa44   : > { %8266 = vpow2.f32 %v5228_v34  ;;  %v5212_v28 = vsub.f32 %v10334_v54, %v5174_v48  ;;  %v5213_v59 = vsub.f32 %v10336_v22, %v5177_v57 }
 0xa46   : > { %v5232_v46 = vmul.f32 1.442695, %v5212_v28  ;;  %v5234_v15 = vmul.f32 1.442695, %v5213_v59 }
 0xa47   : > { %v5171_v1 = vpop.xlane.xlu0 %5170 }
 0xa48   : > { %v5211_v16 = vsub.f32 %v10340_v19, %v5171_v1  ;;  %8268 = vpow2.f32 %v5232_v46 }
 0xa49   : > { %v5183_v37 = vpop.xlane.xlu1 %5182 }
 0xa4a   : > { %v5230_v11 = vmul.f32 1.442695, %v5211_v16  ;;  %v5215_v54 = vsub.f32 %v10348_v20, %v5183_v37 }
 0xa4b   : > { %v5180_v7 = vpop.xlane.xlu0 %5179 }
 0xa4c   : > { %8270 = vpow2.f32 %v5230_v11  ;;  %v5214_v53 = vsub.f32 %v10346_v32, %v5180_v7  ;;  %v5238_v16 = vmul.f32 1.442695, %v5215_v54 }
 0xa4d   : > { %v5189_v45 = vpop.xlane.xlu1 %5188  ;;  %8272 = vpow2.f32 %v5234_v15 }
 0xa4e   : > { %v10408_v21 = vpop.eup %8266  ;;  %v5236_v34 = vmul.f32 1.442695, %v5214_v53  ;;  %v5217_v11 = vsub.f32 %v10352_v2, %v5189_v45 }
 0xa4f   : > { %v5186_v22 = vpop.xlane.xlu0 %5185  ;;  %v5262_v57 = vsel %vm2173_vm2, %v10408_v21, 0.0 }
 0xa50   : > { %8274 = vpow2.f32 %v5236_v34  ;;  %v5216_v19 = vsub.f32 %v10356_v58, %v5186_v22  ;;  %5263 = vadd.xlane.f32.xlu0 %v5262_v57  ;;  %v5242_v46 = vmul.f32 1.442695, %v5217_v11 }
 0xa51   : > { %v5195_v28 = vpop.xlane.xlu1 %5194 }
 0xa52   : > { %v5240_v48 = vmul.f32 1.442695, %v5216_v19  ;;  %v10415_v32 = vpop.eup %8268  ;;  %v5219_v45 = vsub.f32 %v10364_v31, %v5195_v28 }
 0xa53   : > { %v5192_v59 = vpop.xlane.xlu0 %5191  ;;  %v5268_v15 = vsel %vm2173_vm2, %v10415_v32, 0.0 }
 0xa54   : > { %8276 = vpow2.f32 %v5240_v48  ;;  %5269 = vadd.xlane.f32.xlu0 %v5268_v15  ;;  %v5246_v19 = vmul.f32 1.442695, %v5219_v45 }
 0xa55   : > { %8278 = vpow2.f32 %v5238_v16  ;;  %v5201_v7 = vpop.xlane.xlu1 %5200 }
 0xa56   : > { %v10419_v20 = vpop.eup %8270  ;;  %8280 = vpow2.f32 %v5242_v46 }
 0xa57   : > { %v5198_v1 = vpop.xlane.xlu0 %5197  ;;  %v5265_v58 = vsel %vm2173_vm2, %v10419_v20, 0.0  ;;  %v10423_v37 = vpop.eup %8272 }
 0xa58   : > { %v5220_v2 = vsub.f32 %v10372_v42, %v5198_v1  ;;  %5266 = vadd.xlane.f32.xlu1 %v5265_v58  ;;  %v5271_v22 = vsel %vm2173_vm2, %v10423_v37, 0.0  ;;  %v5221_v42 = vsub.f32 %v10368_v0, %v5201_v7 }
 0xa59   : > { %v5207_v16 = vpop.xlane.xlu1 %5206 }
 0xa5a   : > { %v10426_v53 = vpop.eup %8274  ;;  %v5248_v54 = vmul.f32 1.442695, %v5220_v2  ;;  %v5250_v48 = vmul.f32 1.442695, %v5221_v42  ;;  %v5223_v28 = vsub.f32 %v10380_v50, %v5207_v16 }
 0xa5b   : > { %v5274_v34 = vsel %vm2173_vm2, %v10426_v53, 0.0  ;;  %v5204_v42 = vpop.xlane.xlu0 %5203 }
 0xa5c   : > { %5275 = vadd.xlane.f32.xlu0 %v5274_v34  ;;  %5272 = vadd.xlane.f32.xlu1 %v5271_v22  ;;  %8282 = vpow2.f32 %v5248_v54  ;;  %v5254_v0 = vmul.f32 1.442695, %v5223_v28  ;;  %v11415_v28 = vpack.i.bf16 %v9941_v35, %v9939_v23  ;;  %v11417_v23 = vpack.i.bf16 %v9953_v4, %v9951_v60 }
 0xa5d   : > { %8284 = vpow2.f32 %v5246_v19  ;;  %v5218_v19 = vsub.f32 %v10362_v5, %v5192_v59  ;;  %v11418_v35 = vpack.i.bf16 %v9959_v25, %v9957_v13  ;;  %v5507_v4 = vpop.permute.xlu1 %5506  ;;  %v11422_v13 = vpack.i.bf16 %v9989_v55, %v9983_v47 }
 0xa5e   : > { %v10433_v57 = vpop.eup %8276  ;;  %8286 = vpow2.f32 %v5250_v48 }
 0xa5f   : > { %v5280_v11 = vsel %vm2173_vm2, %v10433_v57, 0.0  ;;  %v10438_v31 = vpop.eup %8278  ;;  %8288 = vpow2.f32 %v5254_v0  ;;  %v5244_v16 = vmul.f32 1.442695, %v5218_v19  ;;  %v5459_v60 = vpop.permute.xlu0 %5458 }
 0xa60   : > { %5281 = vadd.xlane.f32.xlu1 %v5280_v11  ;;  %v5277_v15 = vsel %vm2173_vm2, %v10438_v31, 0.0  ;;  %v10443_v46 = vpop.eup %8280  ;;  %v5222_v11 = vsub.f32 %v10378_v26, %v5204_v42  ;;  %v11416_v26 = vpack.i.bf16 %v9947_v9, %v9945_v12  ;;  %v11420_v12 = vpack.i.bf16 %v9971_v33, %v9969_v61 }
 0xa61   : > { %v5283_v1 = vsel %vm2173_vm2, %v10443_v46, 0.0  ;;  %8290 = vpow2.f32 %v5244_v16  ;;  %v11421_v9 = vpack.i.bf16 %v9977_v52, %v9975_v38 }
 0xa62   : > { %v5252_v48 = vmul.f32 1.442695, %v5222_v11 }
 0xa64   : > { %5278 = vadd.xlane.f32.xlu1 %v5277_v15  ;;  %8292 = vpow2.f32 %v5252_v48  ;;  %v11419_v15 = vpack.i.bf16 %v9965_v51, %v9963_v56 }
 0xa66   : > { %v10447_v58 = vpop.eup %8282 }
 0xa67   : > { %v5292_v2 = vsel %vm2173_vm2, %v10447_v58, 0.0  ;;  %v10451_v7 = vpop.eup %8284 }
 0xa68   : > { %5284 = vadd.xlane.f32.xlu1 %v5283_v1  ;;  %v5289_v50 = vsel %vm2173_vm2, %v10451_v7, 0.0  ;;  %v10455_v45 = vpop.eup %8286 }
 0xa69   : > { %v5295_v54 = vsel %vm2173_vm2, %v10455_v45, 0.0  ;;  %v10461_v34 = vpop.eup %8288 }
 0xa6a   : > { %v5301_v22 = vsel %vm2173_vm2, %v10461_v34, 0.0 }
 0xa6c   : > { %5293 = vadd.xlane.f32.xlu1 %v5292_v2 }
 0xa70   : > { %5290 = vadd.xlane.f32.xlu1 %v5289_v50 }
 0xa72   : > { %5554 = vrot.lane.b32.xlu0 %v11408_v40, %s8524_s29  ;;  %v10469_v40 = vpop.eup %8290 }
 0xa73   : > { %v5286_v5 = vsel %vm2173_vm2, %v10469_v40, 0.0  ;;  %v10477_v59 = vpop.eup %8292 }
 0xa74   : > { %5296 = vadd.xlane.f32.xlu1 %v5295_v54 }
 0xa78   : > { %5302 = vadd.xlane.f32.xlu1 %v5301_v22 }
 0xa89   : > { %5602 = vrot.lane.b32.xlu1 %v11409_v43, %s8524_s29  ;;  %v5298_v43 = vsel %vm2173_vm2, %v10477_v59, 0.0 }
 0xa8d   : > { %7756 = vrot.lane.b32.xlu1 %v11415_v28, %s8524_s29 }
 0xa91   : > { %5287 = vadd.xlane.f32.xlu0 %v5286_v5  ;;  %7766 = vrot.lane.b32.xlu1 %v11416_v26, %s8524_s29 }
 0xa95   : > { %5299 = vadd.xlane.f32.xlu0 %v5298_v43  ;;  %7776 = vrot.lane.b32.xlu1 %v11417_v23, %s8524_s29 }
 0xa99   : > { %7786 = vrot.lane.b32.xlu1 %v11418_v35, %s8524_s29 }
 0xa9d   : > { %7796 = vrot.lane.b32.xlu1 %v11419_v15, %s8524_s29 }
 0xaa1   : > { %7806 = vrot.lane.b32.xlu1 %v11420_v12, %s8524_s29 }
 0xaa5   : > { %7816 = vrot.lane.b32.xlu1 %v11421_v9, %s8524_s29 }
 0xaa9   : > { %7826 = vrot.lane.b32.xlu1 %v11422_v13, %s8524_s29 }
 0xaaa   : > { %v5258_v25 = vpop.xlane.xlu0 %5257 }
 0xaab   : > { %8294 = vrcp.f32 %v5258_v25  ;;  %5650 = vrot.lane.b32.xlu0 %v11410_v36, %s8524_s29 }
 0xaac   : > { %v5261_v56 = vpop.xlane.xlu1 %5260 }
 0xaad   : > { %8296 = vrcp.f32 %v5261_v56 }
 0xaaf   : > { %5698 = vrot.lane.b32.xlu0 %v11411_v8, %s8524_s29 }
 0xab5   : > { %v8295_v51 = vpop.eup %8294 }
 0xab6   : > { %v5320_v61 = vmul.f32 %v8295_v51, %v10395_v24 }
 0xab7   : > { %v8297_v33 = vpop.eup %8296 }
 0xab8   : > { %7091 = vst.msk [vmem:[%s9480_s26 + $0x30] sm:$0xff] %vm2173_vm2, %v5320_v61  ;;  %v5321_v38 = vmul.f32 %v8297_v33, %v10399_v17 }
 0xaba   : > { %7092 = vst.msk [vmem:[%s9480_s26 + $0x38] sm:$0xff] %vm2173_vm2, %v5321_v38  ;;  %v5353_v55 = vpack.c.bf16 %v5321_v38, %v5320_v61 }
 0xabc   : > { %7631 = vmatmul.mubr.msk.bf16.vlgmr.msra.gmra.mrb[128].mxu0 %vm2173_vm2, %v5353_v55  ;;  %v11423_v55 = vld [vmem:[#allocation37_spill] sm:$0xff] }
 0xabd   : > { %7641 = vmatpush3.bf16.msra.mxu0 %v5459_v60  ;;  %7642 = vmatprep.mubr.msk.bf16.mxu0 %vm8523_vm0, %v11381_v39 }
 0xabe   : > { %7652 = vmatprep.subr.bf16.mxu0 %v11381_v39 }
 0xadd   : > { %v5264_v52 = vpop.xlane.xlu0 %5263 }
 0xade   : > { %8298 = vrcp.f32 %v5264_v52  ;;  %v11424_v52 = vld [vmem:[#allocation36_spill] sm:$0xff] }
 0xae1   : > { %v5270_v47 = vpop.xlane.xlu0 %5269 }
 0xae2   : > { %8300 = vrcp.f32 %v5270_v47 }
 0xae5   : > { %v5267_v36 = vpop.xlane.xlu1 %5266 }
 0xae6   : > { %8302 = vrcp.f32 %v5267_v36 }
 0xae8   : > { %v8299_v8 = vpop.eup %8298 }
 0xae9   : > { %v5322_v24 = vmul.f32 %v8299_v8, %v10408_v21  ;;  %v5276_v17 = vpop.xlane.xlu0 %5275  ;;  %v5273_v0 = vpop.xlane.xlu1 %5272 }
 0xaea   : > { %8304 = vrcp.f32 %v5276_v17 }
 0xaeb   : > { %7093 = vst.msk [vmem:[%s9480_s26 + $0x70] sm:$0xff] %vm2173_vm2, %v5322_v24  ;;  %8306 = vrcp.f32 %v5273_v0  ;;  %v11425_v0 = vld [vmem:[#allocation38_spill] sm:$0xff] }
 0xaec   : > { %v8301_v1 = vpop.eup %8300 }
 0xaed   : > { %v5282_v2 = vpop.xlane.xlu1 %5281  ;;  %v5324_v50 = vmul.f32 %v8301_v1, %v10415_v32  ;;  %v5555_v26 = vpop.permute.xlu0 %5554 }
 0xaee   : > { %8308 = vrcp.f32 %v5282_v2  ;;  %v11426_v2 = vld [vmem:[#allocation39_spill] sm:$0xff] }
 0xaef   : > { %7095 = vst.msk [vmem:[%s9480_s26 + $0xb0] sm:$0xff] %vm2173_vm2, %v5324_v50 }
 0xaf0   : > { %v8303_v54 = vpop.eup %8302 }
 0xaf1   : > { %v5323_v22 = vmul.f32 %v8303_v54, %v10419_v20  ;;  %v5279_v19 = vpop.xlane.xlu1 %5278 }
 0xaf2   : > { %8310 = vrcp.f32 %v5279_v19 }
 0xaf3   : > { %7094 = vst.msk [vmem:[%s9480_s26 + $0x78] sm:$0xff] %vm2173_vm2, %v5323_v22  ;;  %v5354_v21 = vpack.c.bf16 %v5323_v22, %v5322_v24 }
 0xaf4   : > { %v8305_v42 = vpop.eup %8304 }
 0xaf5   : > { %v8307_v16 = vpop.eup %8306  ;;  %v5326_v11 = vmul.f32 %v8305_v42, %v10426_v53  ;;  %7637 = vmatmul.mubr.msk.bf16.vlgmr.msra.gmra.mrb[192].mxu1 %vm2173_vm2, %v5354_v21  ;;  %v5285_v32 = vpop.xlane.xlu1 %5284  ;;  %v11427_v21 = vld [vmem:[#allocation40_spill] sm:$0xff] }
 0xaf6   : > { %v5325_v48 = vmul.f32 %v8307_v16, %v10423_v37  ;;  %7647 = vmatpush3.bf16.msra.mxu1 %v5507_v4  ;;  %8312 = vrcp.f32 %v5285_v32  ;;  %7648 = vmatprep.mubr.msk.bf16.mxu1 %vm8523_vm0, %v11381_v39  ;;  %v11428_v16 = vld [vmem:[#allocation41_spill] sm:$0xff] }
 0xaf7   : > { %7097 = vst.msk [vmem:[%s9480_s26 + $0xf0] sm:$0xff] %vm2173_vm2, %v5326_v11  ;;  %7658 = vmatprep.subr.bf16.mxu1 %v11381_v39 }
 0xaf8   : > { %v8309_v20 = vpop.eup %8308  ;;  %7096 = vst.msk [vmem:[%s9480_s26 + $0xb8] sm:$0xff] %vm2173_vm2, %v5325_v48  ;;  %v5355_v53 = vpack.c.bf16 %v5325_v48, %v5324_v50 }
 0xaf9   : > { %v5328_v28 = vmul.f32 %v8309_v20, %v10433_v57  ;;  %v5294_v5 = vpop.xlane.xlu1 %5293 }
 0xafa   : > { %7643 = vmatmul.mubr.msk.bf16.vlgmr.msra.gmra.mrb[132].mxu0 %vm2173_vm2, %v5355_v53  ;;  %8314 = vrcp.f32 %v5294_v5 }
 0xafb   : > { %7099 = vst.msk [vmem:[%s9480_s26 + $0x130] sm:$0xff] %vm2173_vm2, %v5328_v28  ;;  %7653 = vmatpush3.bf16.msra.mxu0 %v5555_v26  ;;  %7654 = vmatprep.mubr.msk.bf16.mxu0 %vm8523_vm0, %v11381_v39  ;;  %v11430_v26 = vld [vmem:[#allocation43_spill] sm:$0xff] }
 0xafc   : > { %v8311_v37 = vpop.eup %8310  ;;  %7664 = vmatprep.subr.bf16.mxu0 %v11381_v39 }
 0xafd   : > { %v5327_v43 = vmul.f32 %v8311_v37, %v10438_v31  ;;  %v5291_v23 = vpop.xlane.xlu1 %5290 }
 0xafe   : > { %8316 = vrcp.f32 %v5291_v23 }
 0xaff   : > { %7098 = vst.msk [vmem:[%s9480_s26 + $0xf8] sm:$0xff] %vm2173_vm2, %v5327_v43  ;;  %v5356_v57 = vpack.c.bf16 %v5327_v43, %v5326_v11 }
 0xb00   : > { %v8313_v35 = vpop.eup %8312 }
 0xb01   : > { %v5329_v15 = vmul.f32 %v8313_v35, %v10443_v46  ;;  %7649 = vmatmul.mubr.msk.bf16.vlgmr.msra.gmra.mrb[196].mxu1 %vm2173_vm2, %v5356_v57  ;;  %v5297_v12 = vpop.xlane.xlu1 %5296 }
 0xb02   : > { %8318 = vrcp.f32 %v5297_v12  ;;  %7660 = vmatprep.mubr.msk.bf16.mxu1 %vm8523_vm0, %v11381_v39  ;;  %v11431_v12 = vld [vmem:[#allocation44_spill] sm:$0xff] }
 0xb03   : > { %7100 = vst.msk [vmem:[%s9480_s26 + $0x138] sm:$0xff] %vm2173_vm2, %v5329_v15  ;;  %v5357_v31 = vpack.c.bf16 %v5329_v15, %v5328_v28  ;;  %v11429_v28 = vld [vmem:[#allocation42_spill] sm:$0xff] }
 0xb04   : > { %v8315_v9 = vpop.eup %8314 }
 0xb05   : > { %v10559_v60 = vmul.f32 %v8315_v9, %v10447_v58  ;;  %7655 = vmatmul.mubr.msk.bf16.vlgmr.msra.gmra.mrb[136].mxu0 %vm2173_vm2, %v5357_v31  ;;  %v5303_v4 = vpop.xlane.xlu1 %5302  ;;  %v11432_v9 = vld [vmem:[#allocation45_spill] sm:$0xff] }
 0xb06   : > { %8320 = vrcp.f32 %v5303_v4  ;;  %7666 = vmatprep.mubr.msk.bf16.mxu0 %vm8523_vm0, %v11381_v39 }
 0xb07   : > { %7103 = vst.msk [vmem:[%s9480_s26 + $0x1b0] sm:$0xff] %vm2173_vm2, %v10559_v60 }
 0xb08   : > { %v8317_v46 = vpop.eup %8316 }
 0xb09   : > { %v10568_v13 = vmul.f32 %v8317_v46, %v10451_v7  ;;  %v5603_v25 = vpop.permute.xlu1 %5602 }
 0xb0a   : > { %7659 = vmatpush3.bf16.msra.mxu1 %v5603_v25 }
 0xb0b   : > { %7102 = vst.msk [vmem:[%s9480_s26 + $0x178] sm:$0xff] %vm2173_vm2, %v10568_v13  ;;  %7670 = vmatprep.subr.bf16.mxu1 %v11381_v39 }
 0xb0c   : > { %v8319_v58 = vpop.eup %8318 }
 0xb0d   : > { %v5333_v56 = vmul.f32 %v8319_v58, %v10455_v45  ;;  %v7757_v51 = vpop.permute.xlu1 %7756 }
 0xb0e   : > { %v7759_v61 = vunpack.i.h.bf16 %v7757_v51  ;;  %v7758_v33 = vunpack.i.l.bf16 %v7757_v51 }
 0xb0f   : > { %7104 = vst.msk [vmem:[%s9480_s26 + $0x1b8] sm:$0xff] %vm2173_vm2, %v5333_v56 }
 0xb10   : > { %v8321_v38 = vpop.eup %8320  ;;  %v10579_v7 = vsel %vm1780_vm1, %v11423_v55, %v7759_v61  ;;  %v10583_v47 = vsel %vm1780_vm1, %v11424_v52, %v7758_v33  ;;  %v11433_v33 = vld [vmem:[#allocation46_spill] sm:$0xff]  ;;  %v11434_v55 = vld [vmem:[#allocation47_spill] sm:$0xff] }
 0xb11   : > { %v10586_v36 = vmul.f32 %v8321_v38, %v10461_v34  ;;  %v5905_v45 = vpack.c.bf16 %v10579_v7, %v10583_v47  ;;  %v7767_v8 = vpop.permute.xlu1 %7766 }
 0xb12   : > { %v7769_v24 = vunpack.i.h.bf16 %v7767_v8  ;;  %v7768_v17 = vunpack.i.l.bf16 %v7767_v8 }
 0xb13   : > { %7106 = vst.msk [vmem:[%s9480_s26 + $0x1f8] sm:$0xff] %vm2173_vm2, %v10586_v36 }
 0xb14   : > { %v10595_v1 = vsel %vm1780_vm1, %v11425_v0, %v7768_v17  ;;  %v10599_v50 = vsel %vm1780_vm1, %v11426_v2, %v7769_v24 }
 0xb15   : > { %v7777_v54 = vpop.permute.xlu1 %7776  ;;  %v5907_v34 = vpack.c.bf16 %v10599_v50, %v10595_v1 }
 0xb16   : > { %v7779_v22 = vunpack.i.h.bf16 %v7777_v54  ;;  %v7778_v19 = vunpack.i.l.bf16 %v7777_v54  ;;  %v5359_v54 = vpack.c.bf16 %v5333_v56, %v10559_v60  ;;  %v11437_v56 = vld [vmem:[#allocation50_spill] sm:$0xff] }
 0xb18   : > { %v10605_v42 = vsel %vm1780_vm1, %v11427_v21, %v7778_v19  ;;  %v10609_v11 = vsel %vm1780_vm1, %v11428_v16, %v7779_v22  ;;  %v11435_v22 = vld [vmem:[#allocation48_spill] sm:$0xff]  ;;  %v11436_v21 = vld [vmem:[#allocation49_spill] sm:$0xff] }
 0xb19   : > { %v7787_v32 = vpop.permute.xlu1 %7786  ;;  %v5909_v48 = vpack.c.bf16 %v10609_v11, %v10605_v42 }
 0xb1a   : > { %v7789_v20 = vunpack.i.h.bf16 %v7787_v32  ;;  %v7788_v53 = vunpack.i.l.bf16 %v7787_v32 }
 0xb1c   : > { %v10615_v5 = vsel %vm1780_vm1, %v11429_v28, %v7788_v53  ;;  %v10619_v37 = vsel %vm1780_vm1, %v11430_v26, %v7789_v20 }
 0xb1d   : > { %v7797_v43 = vpop.permute.xlu1 %7796  ;;  %v5911_v23 = vpack.c.bf16 %v10619_v37, %v10615_v5  ;;  %v11439_v37 = vld [vmem:[#allocation22_spill] sm:$0xff] }
 0xb1e   : > { %v7799_v57 = vunpack.i.h.bf16 %v7797_v43  ;;  %v7798_v35 = vunpack.i.l.bf16 %v7797_v43  ;;  %v5288_v15 = vpop.xlane.xlu0 %5287 }
 0xb1f   : > { %8322 = vrcp.f32 %v5288_v15 }
 0xb20   : > { %v10625_v31 = vsel %vm1780_vm1, %v11431_v12, %v7798_v35  ;;  %v10629_v4 = vsel %vm1780_vm1, %v11432_v9, %v7799_v57  ;;  %v11438_v35 = vld [vmem:[#allocation51_spill] sm:$0xff] }
 0xb21   : > { %v7807_v46 = vpop.permute.xlu1 %7806  ;;  %v5913_v25 = vpack.c.bf16 %v10629_v4, %v10625_v31 }
 0xb22   : > { %v7809_v58 = vunpack.i.h.bf16 %v7807_v46  ;;  %v7808_v51 = vunpack.i.l.bf16 %v7807_v46  ;;  %v5300_v61 = vpop.xlane.xlu0 %5299 }
 0xb23   : > { %8324 = vrcp.f32 %v5300_v61  ;;  %v8025_v61 = vld [vmem:[#allocation5 + $0x10] ss:$8 sps:$4 sm:$0xff]  }
 0xb24   : > { %v10635_v38 = vsel %vm1780_vm1, %v11433_v33, %v7808_v51  ;;  %v10639_v52 = vsel %vm1780_vm1, %v11434_v55, %v7809_v58  ;;  %v8022_v58 = vld [vmem:[#allocation5] ss:$8 sps:$4 sm:$0xff]   ;;  %v8024_v51 = vld [vmem:[#allocation5 + $0x4] ss:$8 sps:$4 sm:$0xff]   ;;  %v8027_v33 = vld [vmem:[#allocation5 + $0x14] ss:$8 sps:$4 sm:$0xff]  }
 0xb25   : > { %v7817_v8 = vpop.permute.xlu1 %7816  ;;  %v5915_v24 = vpack.c.bf16 %v10639_v52, %v10635_v38  ;;  %v8028_v55 = vld [vmem:[#allocation5 + $0x20] ss:$8 sps:$4 sm:$0xff]  }
 0xb26   : > { %v7819_v17 = vunpack.i.h.bf16 %v7817_v8  ;;  %v7818_v0 = vunpack.i.l.bf16 %v7817_v8  ;;  %v5651_v2 = vpop.permute.xlu0 %5650  ;;  %v8031_v8 = vld [vmem:[#allocation5 + $0x30] ss:$8 sps:$4 sm:$0xff]  }
 0xb27   : > { %7665 = vmatpush3.bf16.msra.mxu0 %v5651_v2  ;;  %v8037_v2 = vld [vmem:[#allocation5 + $0x50] ss:$8 sps:$4 sm:$0xff]  }
 0xb28   : > { %v10646_v19 = vsel %vm1780_vm1, %v11435_v22, %v7818_v0  ;;  %v10650_v16 = vsel %vm1780_vm1, %v11436_v21, %v7819_v17  ;;  %6125 = vmatprep.subr.bf16.mxu0 %v8024_v51  ;;  %v8034_v17 = vld [vmem:[#allocation5 + $0x40] ss:$8 sps:$4 sm:$0xff]   ;;  %v8039_v0 = vld [vmem:[#allocation5 + $0x54] ss:$8 sps:$4 sm:$0xff]  }
 0xb29   : > { %v8323_v32 = vpop.eup %8322  ;;  %v7827_v20 = vpop.permute.xlu1 %7826  ;;  %v5917_v53 = vpack.c.bf16 %v10650_v16, %v10646_v19  ;;  %v8040_v22 = vld [vmem:[#allocation5 + $0x60] ss:$8 sps:$4 sm:$0xff]   ;;  %v8045_v21 = vld [vmem:[#allocation5 + $0x74] ss:$8 sps:$4 sm:$0xff]  }
 0xb2a   : > { %v5330_v28 = vmul.f32 %v8323_v32, %v10469_v40  ;;  %v7829_v26 = vunpack.i.h.bf16 %v7827_v20  ;;  %v7828_v43 = vunpack.i.l.bf16 %v7827_v20  ;;  %7667 = vmatmul.mubr.msk.bf16.vlgmr.msra.gmra.mrb[140].mxu0 %vm2173_vm2, %v5359_v54  ;;  %v5699_v46 = vpop.permute.xlu0 %5698  ;;  %v8042_v54 = vld [vmem:[#allocation5 + $0x64] ss:$8 sps:$4 sm:$0xff]   ;;  %v8043_v32 = vld [vmem:[#allocation5 + $0x70] ss:$8 sps:$4 sm:$0xff]   ;;  %v8064_v51 = vld [vmem:[#allocation5 + $0xe0] ss:$8 sps:$4 sm:$0xff]  }
 0xb2b   : > { %6126 = vmatpush1.bf16.msra.mxu0 %v8022_v58  ;;  %v8048_v20 = vld [vmem:[#allocation5 + $0x84] ss:$8 sps:$4 sm:$0xff]   ;;  %v8063_v58 = vld [vmem:[#allocation5 + $0xd4] ss:$8 sps:$4 sm:$0xff]  }
 0xb2c   : > { %7101 = vst.msk [vmem:[%s9480_s26 + $0x170] sm:$0xff] %vm2173_vm2, %v5330_v28  ;;  %v5358_v60 = vpack.c.bf16 %v10568_v13, %v5330_v28  ;;  %v10661_v57 = vsel %vm1780_vm1, %v11437_v56, %v7828_v43  ;;  %v10665_v15 = vsel %vm1780_vm1, %v11438_v35, %v7829_v26  ;;  %6127 = vmatprep.subr.bf16.mxu0 %v8027_v33  ;;  %v8046_v28 = vld [vmem:[#allocation5 + $0x80] ss:$8 sps:$4 sm:$0xff]   ;;  %v8051_v26 = vld [vmem:[#allocation5 + $0x94] ss:$8 sps:$4 sm:$0xff]  }
 0xb2d   : > { %v8325_v12 = vpop.eup %8324  ;;  %v5919_v40 = vpack.c.bf16 %v10665_v15, %v10661_v57  ;;  %v8049_v43 = vld [vmem:[#allocation5 + $0x90] ss:$8 sps:$4 sm:$0xff]   ;;  %v8052_v56 = vld [vmem:[#allocation5 + $0xa0] ss:$8 sps:$4 sm:$0xff]   ;;  %v8057_v35 = vld [vmem:[#allocation5 + $0xb4] ss:$8 sps:$4 sm:$0xff]  }
 0xb2e   : > { %v5334_v9 = vmul.f32 %v8325_v12, %v10477_v59  ;;  %7661 = vmatmul.mubr.msk.bf16.vlgmr.msra.gmra.mrb[200].mxu1 %vm2173_vm2, %v5358_v60  ;;  %v8030_v59 = vld [vmem:[#allocation5 + $0x24] ss:$8 sps:$4 sm:$0xff]   ;;  %v8055_v12 = vld [vmem:[#allocation5 + $0xb0] ss:$8 sps:$4 sm:$0xff]  }
 0xb2f   : > { %7671 = vmatpush3.bf16.msra.mxu1 %v5699_v46  ;;  %7672 = vmatprep.mubr.msk.bf16.mxu1 %vm8523_vm0, %v11381_v39  ;;  %v8033_v39 = vld [vmem:[#allocation5 + $0x34] ss:$8 sps:$4 sm:$0xff]   ;;  %v8054_v60 = vld [vmem:[#allocation5 + $0xa4] ss:$8 sps:$4 sm:$0xff]   ;;  %v8058_v46 = vld [vmem:[#allocation5 + $0xc0] ss:$8 sps:$4 sm:$0xff]  }
 0xb30   : > { %7105 = vst.msk [vmem:[%s9480_s26 + $0x1f0] sm:$0xff] %vm2173_vm2, %v5334_v9  ;;  %v5360_v13 = vpack.c.bf16 %v10586_v36, %v5334_v9  ;;  %6128 = vmatpush1.bf16.msra.mxu0 %v8025_v61  ;;  %v8036_v36 = vld [vmem:[#allocation5 + $0x44] ss:$8 sps:$4 sm:$0xff]   ;;  %v8067_v33 = vld [vmem:[#allocation5 + $0xf0] ss:$8 sps:$4 sm:$0xff]   ;;  %s8420_s26 = scalar_lea.vmem %s8419_s18, 16384 }
 0xb31   : > { %6129 = vmatprep.subr.bf16.mxu0 %v8030_v59  ;;  %v8060_v9 = vld [vmem:[#allocation5 + $0xc4] ss:$8 sps:$4 sm:$0xff]   ;;  %v8069_v59 = vld [vmem:[#allocation5 + $0xf4] ss:$8 sps:$4 sm:$0xff]  }
 0xb32   : > { %v8066_v61 = vld [vmem:[#allocation5 + $0xe4] ss:$8 sps:$4 sm:$0xff]  }
 0xb34   : > { %6130 = vmatpush1.bf16.msra.mxu0 %v8028_v55 }
 0xb35   : > { %6131 = vmatprep.subr.bf16.mxu0 %v8033_v39 }
 0xb36   : > { %7673 = vmatmul.mubr.msk.bf16.vlgmr.msra.gmra.mrb[204].mxu1 %vm2173_vm2, %v5360_v13  ;;  %v8061_v13 = vld [vmem:[#allocation5 + $0xd0] ss:$8 sps:$4 sm:$0xff]  }
 0xb38   : > { %6132 = vmatpush1.bf16.msra.mxu0 %v8031_v8 }
 0xb39   : > { %6133 = vmatprep.subr.bf16.mxu0 %v8036_v36 }
 0xb3c   : > { %6134 = vmatpush1.bf16.msra.mxu0 %v8034_v17 }
 0xb3d   : > { %6135 = vmatprep.subr.bf16.mxu0 %v8039_v0 }
 0xb40   : > { %6136 = vmatpush1.bf16.msra.mxu0 %v8037_v2 }
 0xb41   : > { %6137 = vmatprep.subr.bf16.mxu0 %v8042_v54 }
 0xb44   : > { %6138 = vmatpush1.bf16.msra.mxu0 %v8040_v22 }
 0xb45   : > { %6139 = vmatprep.subr.bf16.mxu0 %v8045_v21 }
 0xb48   : > { %6140 = vmatpush1.bf16.msra.mxu0 %v8043_v32 }
 0xb49   : > { %6141 = vmatprep.subr.bf16.mxu0 %v8048_v20 }
 0xb4c   : > { %6142 = vmatpush1.bf16.msra.mxu0 %v8046_v28 }
 0xb4d   : > { %6143 = vmatprep.subr.bf16.mxu0 %v8051_v26 }
 0xb50   : > { %6144 = vmatpush1.bf16.msra.mxu0 %v8049_v43 }
 0xb51   : > { %6145 = vmatprep.subr.bf16.mxu0 %v8054_v60 }
 0xb54   : > { %6146 = vmatpush1.bf16.msra.mxu0 %v8052_v56 }
 0xb55   : > { %6147 = vmatprep.subr.bf16.mxu0 %v8057_v35 }
 0xb58   : > { %6148 = vmatpush1.bf16.msra.mxu0 %v8055_v12 }
 0xb59   : > { %6149 = vmatprep.subr.bf16.mxu0 %v8060_v9 }
 0xb5c   : > { %6150 = vmatpush1.bf16.msra.mxu0 %v8058_v46 }
 0xb5d   : > { %6151 = vmatprep.subr.bf16.mxu0 %v8063_v58 }
 0xb60   : > { %6152 = vmatpush1.bf16.msra.mxu0 %v8061_v13 }
 0xb61   : > { %6153 = vmatprep.subr.bf16.mxu0 %v8066_v61 }
 0xb64   : > { %6154 = vmatpush1.bf16.msra.mxu0 %v8064_v51 }
 0xb65   : > { %6155 = vmatprep.subr.bf16.mxu0 %v8069_v59 }
 0xb68   : > { %6156 = vmatpush1.bf16.msra.mxu0 %v8067_v33 }
 0xb8f   : > { %v5402_v55 = vpop.f32.mrb[128].mxu0 }
 0xb90   : > { %v7632_v8 = vpop.f32.mrb[129].mxu0 }
 0xb91   : > { %v5405_v39 = vpop.f32.mrb[130].mxu0 }
 0xb92   : > { %v7750_v17 = vpack.i.bf16 %v5405_v39, %v5402_v55  ;;  %v7633_v36 = vpop.f32.mrb[131].mxu0 }
 0xb94   : > { %7751 = vrot.lane.b32.xlu0 %v7750_v17, %s8524_s29 }
 0xbc8   : > { %v5450_v0 = vpop.f32.mrb[192].mxu1 }
 0xbc9   : > { %v7638_v2 = vpop.f32.mrb[193].mxu1 }
 0xbca   : > { %v5453_v54 = vpop.f32.mrb[194].mxu1 }
 0xbcb   : > { %v7760_v22 = vpack.i.bf16 %v5453_v54, %v5450_v0  ;;  %v7639_v21 = vpop.f32.mrb[195].mxu1 }
 0xbcd   : > { %v5498_v32 = vpop.f32.mrb[132].mxu0  ;;  %7761 = vrot.lane.b32.xlu0 %v7760_v22, %s8524_s29 }
 0xbce   : > { %v7644_v20 = vpop.f32.mrb[133].mxu0 }
 0xbcf   : > { %v5501_v28 = vpop.f32.mrb[134].mxu0 }
 0xbd0   : > { %v7770_v26 = vpack.i.bf16 %v5501_v28, %v5498_v32  ;;  %v7645_v43 = vpop.f32.mrb[135].mxu0 }
 0xbd2   : > { %7771 = vrot.lane.b32.xlu0 %v7770_v26, %s8524_s29 }
 0xbd4   : > { %v5546_v60 = vpop.f32.mrb[196].mxu1 }
 0xbd5   : > { %v7650_v56 = vpop.f32.mrb[197].mxu1 }
 0xbd6   : > { %v5549_v35 = vpop.f32.mrb[198].mxu1 }
 0xbd7   : > { %v7780_v12 = vpack.i.bf16 %v5549_v35, %v5546_v60  ;;  %v7651_v9 = vpop.f32.mrb[199].mxu1 }
 0xbd8   : > { %v5594_v46 = vpop.f32.mrb[136].mxu0 }
 0xbd9   : > { %v7656_v13 = vpop.f32.mrb[137].mxu0  ;;  %7781 = vrot.lane.b32.xlu0 %v7780_v12, %s8524_s29 }
 0xbda   : > { %v5597_v58 = vpop.f32.mrb[138].mxu0 }
 0xbdb   : > { %v7790_v51 = vpack.i.bf16 %v5597_v58, %v5594_v46  ;;  %v7657_v61 = vpop.f32.mrb[139].mxu0 }
 0xbdd   : > { %7791 = vrot.lane.b32.xlu0 %v7790_v51, %s8524_s29 }
 0xbfd   : > { %v5690_v33 = vpop.f32.mrb[140].mxu0 }
 0xbfe   : > { %v7668_v59 = vpop.f32.mrb[141].mxu0 }
 0xbff   : > { %v5693_v55 = vpop.f32.mrb[142].mxu0 }
 0xc00   : > { %v7810_v8 = vpack.i.bf16 %v5693_v55, %v5690_v33  ;;  %v7669_v39 = vpop.f32.mrb[143].mxu0 }
 0xc01   : > { %v5642_v17 = vpop.f32.mrb[200].mxu1 }
 0xc02   : > { %v7662_v36 = vpop.f32.mrb[201].mxu1 }
 0xc03   : > { %v5645_v0 = vpop.f32.mrb[202].mxu1 }
 0xc04   : > { %v7800_v2 = vpack.i.bf16 %v5645_v0, %v5642_v17  ;;  %v7663_v54 = vpop.f32.mrb[203].mxu1 }
 0xc05   : > { %v11441_v54 = vld [vmem:[#allocation25_spill] sm:$0xff] }
 0xc06   : > { %v7752_v22 = vpop.permute.xlu0 %7751  ;;  %7801 = vrot.lane.b32.xlu0 %v7800_v2, %s8524_s29 }
 0xc07   : > { %v7754_v21 = vunpack.i.h.bf16 %v7752_v22  ;;  %v7753_v32 = vunpack.i.l.bf16 %v7752_v22 }
 0xc09   : > { %v5738_v20 = vpop.f32.mrb[204].mxu1  ;;  %v5889_v28 = vsel %vm1780_vm1, %v10290_v63, %v7753_v32  ;;  %v5890_v26 = vsel %vm1780_vm1, %v10292_v62, %v7754_v21  ;;  %v11443_v21 = vld [vmem:[#allocation20_spill] sm:$0xff] }
 0xc0a   : > { %v5906_v43 = vpack.c.bf16 %v5890_v26, %v5889_v28  ;;  %7811 = vrot.lane.b32.xlu0 %v7810_v8, %s8524_s29  ;;  %v7674_v60 = vpop.f32.mrb[205].mxu1  ;;  %v6238_v28 = vld [vmem:[%s8814_s14] sm:$0xff] }
 0xc0b   : > { %v5741_v56 = vpop.f32.mrb[206].mxu1 }
 0xc0c   : > { %6157 = vmatprep.mubr.bf16.mxu0 %v5906_v43  ;;  %v7820_v35 = vpack.i.bf16 %v5741_v56, %v5738_v20  ;;  %v7675_v12 = vpop.f32.mrb[207].mxu1  ;;  %v6241_v56 = vld [vmem:[%s8814_s14 + $0x18] sm:$0xff] }
 0xc0d   : > { %6158 = vmatmul.mubr.bf16.vlgmr.msra.gmra.mrb[144].mxu0 %v5905_v45 }
 0xc0e   : > { %7821 = vrot.lane.b32.xlu0 %v7820_v35, %s8524_s29 }
 0xc3f   : > { %v7762_v9 = vpop.permute.xlu0 %7761 }
 0xc40   : > { %v7764_v46 = vunpack.i.h.bf16 %v7762_v9  ;;  %v7763_v63 = vunpack.i.l.bf16 %v7762_v9 }
 0xc42   : > { %v5891_v62 = vsel %vm1780_vm1, %v10294_v10, %v7763_v63  ;;  %v5892_v13 = vsel %vm1780_vm1, %v10296_v29, %v7764_v46 }
 0xc43   : > { %v5908_v58 = vpack.c.bf16 %v5892_v13, %v5891_v62 }
 0xc44   : > { %v7772_v51 = vpop.permute.xlu0 %7771 }
 0xc45   : > { %v7774_v61 = vunpack.i.h.bf16 %v7772_v51  ;;  %v7773_v33 = vunpack.i.l.bf16 %v7772_v51  ;;  %6167 = vmatprep.mubr.bf16.mxu0 %v5908_v58  ;;  %v6242_v58 = vld [vmem:[%s8814_s14 + $0x20] sm:$0xff] }
 0xc46   : > { %6168 = vmatmul.mubr.bf16.gmra.mrb[148].mxu0 %v5907_v34 }
 0xc47   : > { %v5893_v7 = vsel %vm1780_vm1, %v10298_v27, %v7773_v33  ;;  %v5894_v47 = vsel %vm1780_vm1, %v10300_v30, %v7774_v61  ;;  %v6243_v33 = vld [vmem:[%s8814_s14 + $0x28] sm:$0xff] }
 0xc48   : > { %v5910_v45 = vpack.c.bf16 %v5894_v47, %v5893_v7 }
 0xc4a   : > { %6177 = vmatprep.mubr.bf16.mxu0 %v5910_v45 }
 0xc4b   : > { %v7782_v10 = vpop.permute.xlu0 %7781 }
 0xc4c   : > { %v7784_v59 = vunpack.i.h.bf16 %v7782_v10  ;;  %v7783_v29 = vunpack.i.l.bf16 %v7782_v10 }
 0xc4e   : > { %6178 = vmatmul.mubr.bf16.gmra.mrb[152].mxu0 %v5909_v48  ;;  %v5895_v55 = vsel %vm1780_vm1, %v10302_v18, %v7783_v29  ;;  %v5896_v1 = vsel %vm1780_vm1, %v10304_v44, %v7784_v59  ;;  %v6244_v59 = vld [vmem:[%s8814_s14 + $0x30] sm:$0xff] }
 0xc4f   : > { %v7792_v50 = vpop.permute.xlu0 %7791  ;;  %v5912_v27 = vpack.c.bf16 %v5896_v1, %v5895_v55  ;;  %v6245_v55 = vld [vmem:[%s8814_s14 + $0x38] sm:$0xff] }
 0xc50   : > { %v7794_v34 = vunpack.i.h.bf16 %v7792_v50  ;;  %v7793_v8 = vunpack.i.l.bf16 %v7792_v50 }
 0xc51   : > { %6187 = vmatprep.mubr.bf16.mxu0 %v5912_v27 }
 0xc52   : > { %v5897_v30 = vsel %vm1780_vm1, %v10306_v41, %v7793_v8  ;;  %v5898_v39 = vsel %vm1780_vm1, %v10308_v3, %v7794_v34 }
 0xc53   : > { %v5914_v17 = vpack.c.bf16 %v5898_v39, %v5897_v30  ;;  %v6246_v39 = vld [vmem:[%s8814_s14 + $0x40] sm:$0xff] }
 0xc56   : > { %6188 = vmatmul.mubr.bf16.gmra.mrb[156].mxu0 %v5911_v23 }
 0xc57   : > { %6197 = vmatprep.mubr.bf16.mxu0 %v5914_v17 }
 0xc5e   : > { %6198 = vmatmul.mubr.bf16.gmra.mrb[160].mxu0 %v5913_v25  ;;  %v11440_v25 = vld [vmem:[#allocation23_spill] sm:$0xff] }
 0xc78   : > { %v7802_v18 = vpop.permute.xlu0 %7801 }
 0xc79   : > { %v7804_v44 = vunpack.i.h.bf16 %v7802_v18  ;;  %v7803_v42 = vunpack.i.l.bf16 %v7802_v18 }
 0xc7b   : > { %v5899_v11 = vsel %vm1780_vm1, %v10310_v6, %v7803_v42  ;;  %v5900_v41 = vsel %vm1780_vm1, %v10312_v49, %v7804_v44  ;;  %v6247_v44 = vld [vmem:[%s8814_s14 + $0x48] sm:$0xff] }
 0xc7c   : > { %v7812_v3 = vpop.permute.xlu0 %7811  ;;  %v5916_v48 = vpack.c.bf16 %v5900_v41, %v5899_v11  ;;  %v6248_v41 = vld [vmem:[%s8814_s14 + $0x50] sm:$0xff] }
 0xc7d   : > { %v7814_v36 = vunpack.i.h.bf16 %v7812_v3  ;;  %v7813_v0 = vunpack.i.l.bf16 %v7812_v3 }
 0xc7e   : > { %6207 = vmatprep.mubr.bf16.mxu0 %v5916_v48 }
 0xc7f   : > { %6208 = vmatmul.mubr.bf16.gmra.mrb[164].mxu0 %v5915_v24  ;;  %v5901_v5 = vsel %vm1780_vm1, %v10314_v14, %v7813_v0  ;;  %v5902_v23 = vsel %vm1780_vm1, %v11439_v37, %v7814_v36  ;;  %v5953_v14 = vld [vmem:[%s11312_s10] sm:$0x3]  ;;  %v11442_v24 = vld [vmem:[#allocation21_spill] sm:$0xff] }
 0xc80   : > { %v7822_v6 = vpop.permute.xlu0 %7821  ;;  %v5918_v31 = vpack.c.bf16 %v5902_v23, %v5901_v5  ;;  %v10745_v22 = vrot.slane %v5953_v14, %v11442_v24  ;;  %v10748_v32 = vrot.slane %v5953_v14, %v11443_v21  ;;  %v6249_v5 = vld [vmem:[%s8814_s14 + $0x58] sm:$0xff] }
 0xc81   : > { %v7824_v4 = vunpack.i.h.bf16 %v7822_v6  ;;  %v7823_v49 = vunpack.i.l.bf16 %v7822_v6 }
 0xc82   : > { %6217 = vmatprep.mubr.bf16.mxu0 %v5918_v31 }
 0xc83   : > { %v5903_v2 = vsel %vm1780_vm1, %v11440_v25, %v7823_v49  ;;  %v5904_v38 = vsel %vm1780_vm1, %v11441_v54, %v7824_v4  ;;  %v6250_v25 = vld [vmem:[%s8814_s14 + $0x60] sm:$0xff] }
 0xc84   : > { %v5920_v52 = vpack.c.bf16 %v5904_v38, %v5903_v2 }
 0xc87   : > { %6218 = vmatmul.mubr.bf16.gmra.mrb[168].mxu0 %v5917_v53  ;;  %v6239_v53 = vld [vmem:[%s8814_s14 + $0x8] sm:$0xff] }
 0xc88   : > { %6227 = vmatprep.mubr.bf16.mxu0 %v5920_v52  ;;  %v6251_v52 = vld [vmem:[%s8814_s14 + $0x68] sm:$0xff] }
 0xc8f   : > { %6228 = vmatmul.mubr.bf16.gmra.mrb[172].mxu0 %v5919_v40  ;;  %v6240_v40 = vld [vmem:[%s8814_s14 + $0x10] sm:$0xff] }
 0xce0   : > { %v6159_v20 = vpop.f32.mrb[144].mxu0 }
 0xce1   : > { %v6160_v19 = vadd.f32 %v6159_v20, %v10745_v22  ;;  %v6161_v16 = vpop.f32.mrb[145].mxu0 }
 0xce2   : > { %v6162_v57 = vadd.f32 %v6161_v16, %v10748_v32  ;;  %v6163_v15 = vpop.f32.mrb[146].mxu0 }
 0xce3   : > { %v10755_v26 = vadd.f32 %v6238_v28, %v6160_v19  ;;  %v6164_v43 = vadd.f32 %v6163_v15, %v10745_v22  ;;  %v6165_v60 = vpop.f32.mrb[147].mxu0  ;;  %v6252_v28 = vld [vmem:[%s8814_s14 + $0x70] sm:$0xff] }
 0xce4   : > { %v10759_v35 = vadd.f32 %v6239_v53, %v6162_v57  ;;  %v6166_v12 = vadd.f32 %v6165_v60, %v10748_v32  ;;  %v6253_v57 = vld [vmem:[%s8814_s14 + $0x78] sm:$0xff] }
 0xce5   : > { %v10762_v9 = vadd.f32 %v6240_v40, %v6164_v43 }
 0xce6   : > { %v10764_v46 = vadd.f32 %v6241_v56, %v6166_v12  ;;  %v6302_v63 = vadd.f32 %v10759_v35, %v10755_v26 }
 0xce8   : > { %6303 = vadd.xlane.f32.xlu0 %v6302_v63  ;;  %v6305_v62 = vadd.f32 %v10764_v46, %v10762_v9  ;;  %v6254_v63 = vld [vmem:[%s8814_s14 + $0x80] sm:$0xff] }
 0xcea   : > { %6306 = vadd.xlane.f32.xlu1 %v6305_v62 }
 0xd19   : > { %v6169_v13 = vpop.f32.mrb[148].mxu0 }
 0xd1a   : > { %v6170_v51 = vadd.f32 %v6169_v13, %v10745_v22  ;;  %v6171_v61 = vpop.f32.mrb[149].mxu0 }
 0xd1b   : > { %v6172_v7 = vadd.f32 %v6171_v61, %v10748_v32  ;;  %v6173_v47 = vpop.f32.mrb[150].mxu0 }
 0xd1c   : > { %v10774_v45 = vadd.f32 %v6242_v58, %v6170_v51  ;;  %v6174_v10 = vadd.f32 %v6173_v47, %v10745_v22  ;;  %v6175_v29 = vpop.f32.mrb[151].mxu0  ;;  %v6255_v51 = vld [vmem:[%s8814_s14 + $0x88] sm:$0xff] }
 0xd1d   : > { %v10779_v1 = vadd.f32 %v6243_v33, %v6172_v7  ;;  %v6176_v50 = vadd.f32 %v6175_v29, %v10748_v32  ;;  %v6256_v7 = vld [vmem:[%s8814_s14 + $0x90] sm:$0xff]  ;;  %v6257_v29 = vld [vmem:[%s8814_s14 + $0x98] sm:$0xff] }
 0xd1e   : > { %v10782_v27 = vadd.f32 %v6244_v59, %v6174_v10 }
 0xd1f   : > { %v10784_v34 = vadd.f32 %v6245_v55, %v6176_v50  ;;  %v6308_v8 = vadd.f32 %v10779_v1, %v10774_v45 }
 0xd21   : > { %v6179_v30 = vpop.f32.mrb[152].mxu0  ;;  %6309 = vadd.xlane.f32.xlu0 %v6308_v8  ;;  %v6311_v3 = vadd.f32 %v10784_v34, %v10782_v27 }
 0xd22   : > { %v6180_v17 = vadd.f32 %v6179_v30, %v10745_v22  ;;  %v6181_v18 = vpop.f32.mrb[153].mxu0 }
 0xd23   : > { %v6182_v42 = vadd.f32 %v6181_v18, %v10748_v32  ;;  %v6183_v11 = vpop.f32.mrb[154].mxu0 }
 0xd24   : > { %v10795_v48 = vadd.f32 %v6246_v39, %v6180_v17  ;;  %v6184_v36 = vadd.f32 %v6183_v11, %v10745_v22  ;;  %v6185_v0 = vpop.f32.mrb[155].mxu0 }
 0xd25   : > { %v10799_v37 = vadd.f32 %v6247_v44, %v6182_v42  ;;  %v6186_v23 = vadd.f32 %v6185_v0, %v10748_v32  ;;  %6312 = vadd.xlane.f32.xlu0 %v6311_v3  ;;  %v6258_v44 = vld [vmem:[%s8814_s14 + $0xa0] sm:$0xff]  ;;  %v6260_v0 = vld [vmem:[%s8814_s14 + $0xb0] sm:$0xff] }
 0xd26   : > { %v10802_v6 = vadd.f32 %v6248_v41, %v6184_v36  ;;  %v6259_v41 = vld [vmem:[%s8814_s14 + $0xa8] sm:$0xff] }
 0xd27   : > { %v10804_v31 = vadd.f32 %v6249_v5, %v6186_v23  ;;  %v6314_v4 = vadd.f32 %v10799_v37, %v10795_v48 }
 0xd29   : > { %v6189_v49 = vpop.f32.mrb[156].mxu0  ;;  %6315 = vadd.xlane.f32.xlu0 %v6314_v4  ;;  %v6317_v2 = vadd.f32 %v10804_v31, %v10802_v6 }
 0xd2a   : > { %v6190_v54 = vadd.f32 %v6189_v49, %v10745_v22  ;;  %v6191_v38 = vpop.f32.mrb[157].mxu0  ;;  %v6261_v49 = vld [vmem:[%s8814_s14 + $0xb8] sm:$0xff] }
 0xd2b   : > { %v6192_v14 = vadd.f32 %v6191_v38, %v10748_v32  ;;  %6318 = vadd.xlane.f32.xlu1 %v6317_v2  ;;  %v6193_v20 = vpop.f32.mrb[158].mxu0 }
 0xd2c   : > { %v10815_v19 = vadd.f32 %v6250_v25, %v6190_v54  ;;  %v6194_v16 = vadd.f32 %v6193_v20, %v10745_v22  ;;  %v6195_v53 = vpop.f32.mrb[159].mxu0  ;;  %v6262_v20 = vld [vmem:[%s8814_s14 + $0xc0] sm:$0xff] }
 0xd2d   : > { %v10819_v15 = vadd.f32 %v6251_v52, %v6192_v14  ;;  %v6196_v40 = vadd.f32 %v6195_v53, %v10748_v32 }
 0xd2e   : > { %v10822_v43 = vadd.f32 %v6252_v28, %v6194_v16 }
 0xd2f   : > { %v10824_v60 = vadd.f32 %v6253_v57, %v6196_v40  ;;  %v6320_v56 = vadd.f32 %v10819_v15, %v10815_v19  ;;  %v6263_v57 = vld [vmem:[%s8814_s14 + $0xc8] sm:$0xff] }
 0xd31   : > { %v6199_v12 = vpop.f32.mrb[160].mxu0  ;;  %6321 = vadd.xlane.f32.xlu0 %v6320_v56  ;;  %v6323_v62 = vadd.f32 %v10824_v60, %v10822_v43 }
 0xd32   : > { %v6200_v13 = vadd.f32 %v6199_v12, %v10745_v22  ;;  %v6201_v58 = vpop.f32.mrb[161].mxu0  ;;  %v6264_v12 = vld [vmem:[%s8814_s14 + $0xd0] sm:$0xff] }
 0xd33   : > { %v6202_v61 = vadd.f32 %v6201_v58, %v10748_v32  ;;  %v6203_v33 = vpop.f32.mrb[162].mxu0  ;;  %6324 = vadd.xlane.f32.xlu1 %v6323_v62  ;;  %v6265_v58 = vld [vmem:[%s8814_s14 + $0xd8] sm:$0xff] }
 0xd34   : > { %v10835_v47 = vadd.f32 %v6254_v63, %v6200_v13  ;;  %v6204_v10 = vadd.f32 %v6203_v33, %v10745_v22  ;;  %v6205_v59 = vpop.f32.mrb[163].mxu0 }
 0xd35   : > { %v10839_v55 = vadd.f32 %v6255_v51, %v6202_v61  ;;  %v6206_v50 = vadd.f32 %v6205_v59, %v10748_v32 }
 0xd36   : > { %v10842_v8 = vadd.f32 %v6256_v7, %v6204_v10 }
 0xd37   : > { %v10844_v30 = vadd.f32 %v6257_v29, %v6206_v50  ;;  %v6326_v39 = vadd.f32 %v10839_v55, %v10835_v47  ;;  %v6266_v29 = vld [vmem:[%s8814_s14 + $0xe0] sm:$0xff] }
 0xd39   : > { %6327 = vadd.xlane.f32.xlu0 %v6326_v39  ;;  %v6329_v17 = vadd.f32 %v10844_v30, %v10842_v8 }
 0xd3b   : > { %6330 = vadd.xlane.f32.xlu1 %v6329_v17 }
 0xd52   : > { %v6209_v18 = vpop.f32.mrb[164].mxu0 }
 0xd53   : > { %v6210_v42 = vadd.f32 %v6209_v18, %v10745_v22  ;;  %v6211_v11 = vpop.f32.mrb[165].mxu0  ;;  %v6267_v18 = vld [vmem:[%s8814_s14 + $0xe8] sm:$0xff] }
 0xd54   : > { %v6212_v3 = vadd.f32 %v6211_v11, %v10748_v32  ;;  %v6213_v36 = vpop.f32.mrb[166].mxu0  ;;  %v6268_v11 = vld [vmem:[%s8814_s14 + $0xf0] sm:$0xff] }
 0xd55   : > { %v10855_v5 = vadd.f32 %v6258_v44, %v6210_v42  ;;  %v6214_v23 = vadd.f32 %v6213_v36, %v10745_v22  ;;  %v6215_v4 = vpop.f32.mrb[167].mxu0 }
 0xd56   : > { %v10859_v25 = vadd.f32 %v6259_v41, %v6212_v3  ;;  %v6216_v2 = vadd.f32 %v6215_v4, %v10748_v32 }
 0xd57   : > { %v10862_v54 = vadd.f32 %v6260_v0, %v6214_v23  ;;  %v6269_v0 = vld [vmem:[%s8814_s14 + $0xf8] sm:$0xff]  ;;  %s8414_s14 = scalar_lea.vmem %s11114_s24, 8192 }
 0xd58   : > { %v10864_v38 = vadd.f32 %v6261_v49, %v6216_v2  ;;  %v6332_v52 = vadd.f32 %v10859_v25, %v10855_v5  ;;  %p8415_p10 = scmp.ne.s32.totalorder %s11114_s24, %s8414_s14  ;;  %p8422_p7 = scmp.lt.s32.totalorder %s8420_s26, %s8414_s14 }
 0xd5a   : > { %v6219_v14 = vpop.f32.mrb[168].mxu0  ;;  %6333 = vadd.xlane.f32.xlu0 %v6332_v52  ;;  %v6335_v28 = vadd.f32 %v10864_v38, %v10862_v54  ;;  %p8416_p2 = pnand %p8415_p10, %p11445_p1  ;;  %p8423_p8 = por %p8422_p7, %p8421_p4 }
 0xd5b   : > { %v6220_v16 = vadd.f32 %v6219_v14, %v10745_v22  ;;  %v6221_v53 = vpop.f32.mrb[169].mxu0 }
 0xd5c   : > { %v6222_v40 = vadd.f32 %v6221_v53, %v10748_v32  ;;  %v6223_v56 = vpop.f32.mrb[170].mxu0  ;;  %6336 = vadd.xlane.f32.xlu1 %v6335_v28  ;;  %p8417_p3 = pneg %p8416_p2 }
 0xd5d   : > { %v10875_v63 = vadd.f32 %v6262_v20, %v6220_v16  ;;  %v6224_v62 = vadd.f32 %v6223_v56, %v10745_v22  ;;  %v6225_v13 = vpop.f32.mrb[171].mxu0 }
 0xd5e   : > { %v10879_v51 = vadd.f32 %v6263_v57, %v6222_v40  ;;  %v6226_v61 = vadd.f32 %v6225_v13, %v10748_v32  ;;  %p8424_p11 = pnand %p8423_p8, %p8417_p3 }
 0xd5f   : > { %v10882_v33 = vadd.f32 %v6264_v12, %v6224_v62 }
 0xd60   : > { %v10884_v7 = vadd.f32 %v6265_v58, %v6226_v61  ;;  %v6338_v10 = vadd.f32 %v10879_v51, %v10875_v63 }
 0xd62   : > { %6339 = vadd.xlane.f32.xlu0 %v6338_v10  ;;  %v6229_v59 = vpop.f32.mrb[172].mxu0  ;;  %v6341_v50 = vadd.f32 %v10884_v7, %v10882_v33 }
 0xd63   : > { %v6230_v39 = vadd.f32 %v6229_v59, %v10745_v22  ;;  %v6231_v17 = vpop.f32.mrb[173].mxu0 }
 0xd64   : > { %v6232_v44 = vadd.f32 %v6231_v17, %v10748_v32  ;;  %6342 = vadd.xlane.f32.xlu1 %v6341_v50  ;;  %v6233_v42 = vpop.f32.mrb[174].mxu0 }
 0xd65   : > { %v10895_v41 = vadd.f32 %v6266_v29, %v6230_v39  ;;  %v6234_v3 = vadd.f32 %v6233_v42, %v10745_v22  ;;  %v6235_v36 = vpop.f32.mrb[175].mxu0 }
 0xd66   : > { %v10899_v23 = vadd.f32 %v6267_v18, %v6232_v44  ;;  %v6236_v4 = vadd.f32 %v6235_v36, %v10748_v32 }
 0xd67   : > { %v10902_v49 = vadd.f32 %v6268_v11, %v6234_v3 }
 0xd68   : > { %v10904_v2 = vadd.f32 %v6269_v0, %v6236_v4  ;;  %v6344_v52 = vadd.f32 %v10899_v23, %v10895_v41 }
 0xd6a   : > { %6345 = vadd.xlane.f32.xlu0 %v6344_v52  ;;  %v6347_v14 = vadd.f32 %v10904_v2, %v10902_v49 }
 0xd6c   : > { %6348 = vadd.xlane.f32.xlu1 %v6347_v14 }
 0xd75   : > { %v6304_v20 = vpop.xlane.xlu0 %6303 }
 0xd76   : > { %v6351_v22 = vmul.f32 0.00390625, %v6304_v20 }
 0xd77   : > { %v6307_v28 = vpop.xlane.xlu1 %6306 }
 0xd78   : > { %v10911_v16 = vsub.f32 %v10755_v26, %v6351_v22  ;;  %v10914_v32 = vsub.f32 %v10759_v35, %v6351_v22  ;;  %v6352_v53 = vmul.f32 0.00390625, %v6307_v28 }
 0xd7a   : > { %v6399_v57 = vmul.f32 %v10911_v16, %v10911_v16  ;;  %v6400_v40 = vmul.f32 %v10914_v32, %v10914_v32  ;;  %v10921_v56 = vsub.f32 %v10762_v9, %v6352_v53  ;;  %v10924_v12 = vsub.f32 %v10764_v46, %v6352_v53 }
 0xd7c   : > { %v6401_v26 = vmul.f32 %v10921_v56, %v10921_v56  ;;  %v6402_v35 = vmul.f32 %v10924_v12, %v10924_v12  ;;  %v6431_v62 = vadd.f32 %v6400_v40, %v6399_v57 }
 0xd7e   : > { %6432 = vadd.xlane.f32.xlu0 %v6431_v62  ;;  %v6434_v13 = vadd.f32 %v6402_v35, %v6401_v26 }
 0xd80   : > { %6435 = vadd.xlane.f32.xlu1 %v6434_v13 }
 0xdae   : > { %v6310_v58 = vpop.xlane.xlu0 %6309 }
 0xdaf   : > { %v6353_v61 = vmul.f32 0.00390625, %v6310_v58 }
 0xdb1   : > { %v10931_v10 = vsub.f32 %v10774_v45, %v6353_v61  ;;  %v10934_v9 = vsub.f32 %v10779_v1, %v6353_v61 }
 0xdb2   : > { %v6313_v46 = vpop.xlane.xlu0 %6312 }
 0xdb3   : > { %v6403_v59 = vmul.f32 %v10931_v10, %v10931_v10  ;;  %v6404_v29 = vmul.f32 %v10934_v9, %v10934_v9  ;;  %v6354_v50 = vmul.f32 0.00390625, %v6313_v46 }
 0xdb5   : > { %v10941_v39 = vsub.f32 %v10782_v27, %v6354_v50  ;;  %v10944_v17 = vsub.f32 %v10784_v34, %v6354_v50  ;;  %v6437_v18 = vadd.f32 %v6404_v29, %v6403_v59 }
 0xdb6   : > { %v6316_v45 = vpop.xlane.xlu0 %6315 }
 0xdb7   : > { %v6405_v1 = vmul.f32 %v10941_v39, %v10941_v39  ;;  %v6406_v44 = vmul.f32 %v10944_v17, %v10944_v17  ;;  %v6355_v42 = vmul.f32 0.00390625, %v6316_v45  ;;  %6438 = vadd.xlane.f32.xlu0 %v6437_v18 }
 0xdb8   : > { %v6319_v11 = vpop.xlane.xlu1 %6318 }
 0xdb9   : > { %v10951_v3 = vsub.f32 %v10795_v48, %v6355_v42  ;;  %v10954_v27 = vsub.f32 %v10799_v37, %v6355_v42  ;;  %v6356_v36 = vmul.f32 0.00390625, %v6319_v11  ;;  %v6440_v34 = vadd.f32 %v6406_v44, %v6405_v1 }
 0xdbb   : > { %v6407_v0 = vmul.f32 %v10951_v3, %v10951_v3  ;;  %v6408_v4 = vmul.f32 %v10954_v27, %v10954_v27  ;;  %v10961_v52 = vsub.f32 %v10802_v6, %v6356_v36  ;;  %v10964_v14 = vsub.f32 %v10804_v31, %v6356_v36  ;;  %6441 = vadd.xlane.f32.xlu1 %v6440_v34 }
 0xdbd   : > { %v6409_v48 = vmul.f32 %v10961_v52, %v10961_v52  ;;  %v6410_v37 = vmul.f32 %v10964_v14, %v10964_v14  ;;  %v6443_v20 = vadd.f32 %v6408_v4, %v6407_v0 }
 0xdbe   : > { %v6322_v22 = vpop.xlane.xlu0 %6321 }
 0xdbf   : > { %v6357_v28 = vmul.f32 0.00390625, %v6322_v22  ;;  %6444 = vadd.xlane.f32.xlu0 %v6443_v20  ;;  %v6446_v53 = vadd.f32 %v6410_v37, %v6409_v48 }
 0xdc0   : > { %v6325_v57 = vpop.xlane.xlu1 %6324 }
 0xdc1   : > { %v10971_v40 = vsub.f32 %v10815_v19, %v6357_v28  ;;  %v10974_v6 = vsub.f32 %v10819_v15, %v6357_v28  ;;  %v6358_v31 = vmul.f32 0.00390625, %v6325_v57  ;;  %6447 = vadd.xlane.f32.xlu1 %v6446_v53 }
 0xdc3   : > { %v6411_v26 = vmul.f32 %v10971_v40, %v10971_v40  ;;  %v6412_v35 = vmul.f32 %v10974_v6, %v10974_v6  ;;  %v10981_v62 = vsub.f32 %v10822_v43, %v6358_v31  ;;  %v10984_v13 = vsub.f32 %v10824_v60, %v6358_v31 }
 0xdc5   : > { %v6413_v19 = vmul.f32 %v10981_v62, %v10981_v62  ;;  %v6414_v15 = vmul.f32 %v10984_v13, %v10984_v13  ;;  %v6449_v58 = vadd.f32 %v6412_v35, %v6411_v26 }
 0xdc6   : > { %v6328_v61 = vpop.xlane.xlu0 %6327 }
 0xdc7   : > { %v6359_v46 = vmul.f32 0.00390625, %v6328_v61  ;;  %6450 = vadd.xlane.f32.xlu0 %v6449_v58  ;;  %v6452_v59 = vadd.f32 %v6414_v15, %v6413_v19 }
 0xdc8   : > { %v6331_v29 = vpop.xlane.xlu1 %6330 }
 0xdc9   : > { %v10991_v50 = vsub.f32 %v10835_v47, %v6359_v46  ;;  %v10994_v43 = vsub.f32 %v10839_v55, %v6359_v46  ;;  %v6360_v60 = vmul.f32 0.00390625, %v6331_v29  ;;  %6453 = vadd.xlane.f32.xlu1 %v6452_v59 }
 0xdcb   : > { %v6415_v18 = vmul.f32 %v10991_v50, %v10991_v50  ;;  %v6416_v45 = vmul.f32 %v10994_v43, %v10994_v43  ;;  %v11001_v1 = vsub.f32 %v10842_v8, %v6360_v60  ;;  %v11004_v44 = vsub.f32 %v10844_v30, %v6360_v60 }
 0xdcd   : > { %v6417_v47 = vmul.f32 %v11001_v1, %v11001_v1  ;;  %v6418_v55 = vmul.f32 %v11004_v44, %v11004_v44  ;;  %v6455_v42 = vadd.f32 %v6416_v45, %v6415_v18 }
 0xdcf   : > { %6456 = vadd.xlane.f32.xlu0 %v6455_v42  ;;  %v6458_v11 = vadd.f32 %v6418_v55, %v6417_v47 }
 0xdd1   : > { %6459 = vadd.xlane.f32.xlu1 %v6458_v11 }
 0xde7   : > { %v6334_v36 = vpop.xlane.xlu0 %6333 }
 0xde8   : > { %v6361_v34 = vmul.f32 0.00390625, %v6334_v36 }
 0xde9   : > { %v6337_v0 = vpop.xlane.xlu1 %6336 }
 0xdea   : > { %v11011_v4 = vsub.f32 %v10855_v5, %v6361_v34  ;;  %v11014_v8 = vsub.f32 %v10859_v25, %v6361_v34  ;;  %v6362_v30 = vmul.f32 0.00390625, %v6337_v0 }
 0xdec   : > { %v6419_v48 = vmul.f32 %v11011_v4, %v11011_v4  ;;  %v6420_v37 = vmul.f32 %v11014_v8, %v11014_v8  ;;  %v11021_v20 = vsub.f32 %v10862_v54, %v6362_v30  ;;  %v11024_v22 = vsub.f32 %v10864_v38, %v6362_v30 }
 0xdee   : > { %v6421_v5 = vmul.f32 %v11021_v20, %v11021_v20  ;;  %v6422_v25 = vmul.f32 %v11024_v22, %v11024_v22  ;;  %v6461_v28 = vadd.f32 %v6420_v37, %v6419_v48 }
 0xdef   : > { %v6340_v53 = vpop.xlane.xlu0 %6339 }
 0xdf0   : > { %v6363_v57 = vmul.f32 0.00390625, %v6340_v53  ;;  %6462 = vadd.xlane.f32.xlu0 %v6461_v28  ;;  %v6464_v31 = vadd.f32 %v6422_v25, %v6421_v5  ;;  %v6603_v25 = vld [vmem:[%s11314_s12] sm:$0x3] }
 0xdf1   : > { %v6343_v26 = vpop.xlane.xlu1 %6342 }
 0xdf2   : > { %v11031_v35 = vsub.f32 %v10875_v63, %v6363_v57  ;;  %v11034_v54 = vsub.f32 %v10879_v51, %v6363_v57  ;;  %v6364_v38 = vmul.f32 0.00390625, %v6343_v26  ;;  %6465 = vadd.xlane.f32.xlu1 %v6464_v31  ;;  %v11084_v31 = vrot.slane %v6603_v25, %v11442_v24 }
 0xdf3   : > { %v11087_v26 = vrot.slane %v6603_v25, %v11443_v21 }
 0xdf4   : > { %v6423_v19 = vmul.f32 %v11031_v35, %v11031_v35  ;;  %v6424_v15 = vmul.f32 %v11034_v54, %v11034_v54  ;;  %v11041_v58 = vsub.f32 %v10882_v33, %v6364_v38  ;;  %v11044_v61 = vsub.f32 %v10884_v7, %v6364_v38 }
 0xdf6   : > { %v6425_v63 = vmul.f32 %v11041_v58, %v11041_v58  ;;  %v6426_v51 = vmul.f32 %v11044_v61, %v11044_v61  ;;  %v6467_v46 = vadd.f32 %v6424_v15, %v6423_v19 }
 0xdf7   : > { %v6346_v59 = vpop.xlane.xlu0 %6345 }
 0xdf8   : > { %v6365_v29 = vmul.f32 0.00390625, %v6346_v59  ;;  %6468 = vadd.xlane.f32.xlu0 %v6467_v46  ;;  %v6470_v60 = vadd.f32 %v6426_v51, %v6425_v63 }
 0xdf9   : > { %v6349_v18 = vpop.xlane.xlu1 %6348 }
 0xdfa   : > { %v11051_v45 = vsub.f32 %v10895_v41, %v6365_v29  ;;  %v11054_v33 = vsub.f32 %v10899_v23, %v6365_v29  ;;  %v6366_v7 = vmul.f32 0.00390625, %v6349_v18  ;;  %6471 = vadd.xlane.f32.xlu1 %v6470_v60 }
 0xdfc   : > { %v6427_v47 = vmul.f32 %v11051_v45, %v11051_v45  ;;  %v6428_v55 = vmul.f32 %v11054_v33, %v11054_v33  ;;  %v11061_v42 = vsub.f32 %v10902_v49, %v6366_v7  ;;  %v11064_v11 = vsub.f32 %v10904_v2, %v6366_v7  ;;  %v6559_v2 = vld [vmem:[%s11313_s11] sm:$0x3] }
 0xdfd   : > { %v11077_v28 = vrot.slane %v6559_v2, %v11442_v24  ;;  %v11080_v53 = vrot.slane %v6559_v2, %v11443_v21 }
 0xdfe   : > { %v6429_v41 = vmul.f32 %v11061_v42, %v11061_v42  ;;  %v6430_v23 = vmul.f32 %v11064_v11, %v11064_v11  ;;  %v6473_v36 = vadd.f32 %v6428_v55, %v6427_v47 }
 0xe00   : > { %6474 = vadd.xlane.f32.xlu0 %v6473_v36  ;;  %v6476_v34 = vadd.f32 %v6430_v23, %v6429_v41 }
 0xe02   : > { %6477 = vadd.xlane.f32.xlu1 %v6476_v34 }
 0xe0b   : > { %v6433_v0 = vpop.xlane.xlu0 %6432 }
 0xe0c   : > { %v6479_v30 = vmul.f32 0.00390625, %v6433_v0 }
 0xe0d   : > { %v6436_v48 = vpop.xlane.xlu1 %6435 }
 0xe0e   : > { %v6495_v37 = vadd.f32 1e-05, %v6479_v30  ;;  %v6480_v49 = vmul.f32 0.00390625, %v6436_v48 }
 0xe10   : > { %8326 = vrsqrt.f32 %v6495_v37  ;;  %v6496_v5 = vadd.f32 1e-05, %v6480_v49 }
 0xe12   : > { %8328 = vrsqrt.f32 %v6496_v5 }
 0xe1a   : > { %v8327_v57 = vpop.eup %8326 }
 0xe1b   : > { %v6527_v38 = vmul.f32 %v8327_v57, %v10911_v16  ;;  %v6528_v19 = vmul.f32 %v8327_v57, %v10914_v32 }
 0xe1c   : > { %v8329_v15 = vpop.eup %8328 }
 0xe1d   : > { %v6571_v63 = vmul.f32 %v11077_v28, %v6527_v38  ;;  %v6572_v51 = vmul.f32 %v11080_v53, %v6528_v19  ;;  %v6529_v46 = vmul.f32 %v8329_v15, %v10921_v56  ;;  %v6530_v59 = vmul.f32 %v8329_v15, %v10924_v12 }
 0xe1f   : > { %v6615_v24 = vadd.f32 %v11084_v31, %v6571_v63  ;;  %v6616_v21 = vadd.f32 %v11087_v26, %v6572_v51  ;;  %v6573_v16 = vmul.f32 %v11077_v28, %v6529_v46  ;;  %v6574_v32 = vmul.f32 %v11080_v53, %v6530_v59 }
 0xe21   : > { %6647 = vst [vmem:[%s11099_s25] sm:$0xff] %v6615_v24  ;;  %6648 = vst [vmem:[%s11099_s25 + $0x8] sm:$0xff] %v6616_v21  ;;  %v6617_v56 = vadd.f32 %v11084_v31, %v6573_v16  ;;  %v6618_v12 = vadd.f32 %v11087_v26, %v6574_v32 }
 0xe23   : > { %6649 = vst [vmem:[%s11099_s25 + $0x10] sm:$0xff] %v6617_v56  ;;  %6650 = vst [vmem:[%s11099_s25 + $0x18] sm:$0xff] %v6618_v12 }
 0xe24   : > { %8427 = shalt.err (!%p8424_p11)
}
 0xe25   : > { %s8428_s27 = scalar_lea.hbm %s11112_s20, 8192  ;;  %s8432_s22 = scalar_lea.hbm %s11444_s21, 16384 }
 0xe26   : > { %p8429_p13 = scmp.ne.s32.totalorder %s11112_s20, %s8428_s27  ;;  %p8433_p6 = scmp.lt.u32.totalorder %s11112_s20, %s11444_s21 }
 0xe27   : > { %p8434_p9 = scmp.lt.u32.totalorder %s8432_s22, %s8428_s27  ;;  %p8436_p10 = scmp.lt.u32.totalorder %s8428_s27, %s11112_s20 }
 0xe28   : > { %p8430_p5 = pnand %p8429_p13, %p11445_p1 }
 0xe29   : > { %p8435_p12 = por %p8434_p9, %p8433_p6 }
 0xe2a   : > { %p8431_p0 = pneg %p8430_p5 }
 0xe2b   : > { %p8437_p2 = por %p8436_p10, %p8435_p12 }
 0xe2d   : > { %p8438_p3 = pnand %p8437_p2, %p8431_p0 }
 0xe2f   : > { %8441 = shalt.err (!%p8438_p3)
}
 0xe30   : > { %s8526_s14 = smov 128   ;;  %s8527_s18 = smov 8  }
 0xe31   : > { %7685 = dma.vmem_to_hbm [thread:$0]  (%p11445_p1), %s11114_s24, 8192, %s11112_s20, %s6685_s13, %s8526_s14, %s8526_s14, %s8527_s18  }
 0xe32   : > { %s7161_s24 = sshll.u32 %s8627_s17, 12  ;;  %s6699_s20 = sshll.u32 %s11099_s25, 4  ;;  %s11253_s20 = int_to_ptr.vmem [resolvable:$true] %s6699_s20 }
 0xe33   : > { %s11446_s27 = sld [smem:[#allocation52_spill]]  ;;  %s6680_s17 = scalar_lea.sflag [#allocation4], %s9472_s15 }
 0xe34   : > { %s8442_s19 = scalar_lea.vmem %s11253_s20, 4096  ;;  %s8528_s22 = smov [#allocation7]  }
 0xe35   : > { %p8443_p4 = scmp.ne.s32.totalorder %s11253_s20, %s8442_s19  ;;  %s8446_s29 = sshll.u32 %s8528_s22, 4  ;;  %s8447_s29 = int_to_ptr.vmem [resolvable:$false] %s8446_s29 }
 0xe36   : > { %s8448_s16 = scalar_lea.vmem %s8447_s29, 8192  ;;  %p8449_p11 = scmp.lt.s32.totalorder %s11253_s20, %s8447_s29 }
 0xe37   : > { %p8444_p7 = pnand %p8443_p4, %p11445_p1  ;;  %p8450_p13 = scmp.lt.s32.totalorder %s8448_s16, %s8442_s19 }
 0xe39   : > { %s11251_s28 = scalar_lea.hbm %s11446_s27, %s7161_s24  ;;  %p8445_p8 = pneg %p8444_p7 }
 0xe3a   : > { %p8451_p5 = por %p8450_p13, %p8449_p11 }
 0xe3c   : > { %p8452_p0 = pnand %p8451_p5, %p8445_p8 }
 0xe44   : > { %v6439_v29 = vpop.xlane.xlu0 %6438 }
 0xe45   : > { %v6481_v60 = vmul.f32 0.00390625, %v6439_v29 }
 0xe47   : > { %v6497_v18 = vadd.f32 1e-05, %v6481_v60 }
 0xe48   : > { %v6442_v7 = vpop.xlane.xlu1 %6441 }
 0xe49   : > { %8330 = vrsqrt.f32 %v6497_v18  ;;  %v6482_v47 = vmul.f32 0.00390625, %v6442_v7 }
 0xe4b   : > { %v6498_v55 = vadd.f32 1e-05, %v6482_v47 }
 0xe4c   : > { %v6445_v41 = vpop.xlane.xlu0 %6444 }
 0xe4d   : > { %8332 = vrsqrt.f32 %v6498_v55  ;;  %v6483_v23 = vmul.f32 0.00390625, %v6445_v41 }
 0xe4e   : > { %v6448_v36 = vpop.xlane.xlu1 %6447 }
 0xe4f   : > { %v6499_v34 = vadd.f32 1e-05, %v6483_v23  ;;  %v6484_v0 = vmul.f32 0.00390625, %v6448_v36 }
 0xe51   : > { %8334 = vrsqrt.f32 %v6499_v34  ;;  %v6500_v30 = vadd.f32 1e-05, %v6484_v0 }
 0xe53   : > { %v8331_v48 = vpop.eup %8330  ;;  %8336 = vrsqrt.f32 %v6500_v30 }
 0xe54   : > { %v6531_v37 = vmul.f32 %v8331_v48, %v10931_v10  ;;  %v6532_v49 = vmul.f32 %v8331_v48, %v10934_v9  ;;  %v6451_v5 = vpop.xlane.xlu0 %6450 }
 0xe55   : > { %v6485_v2 = vmul.f32 0.00390625, %v6451_v5 }
 0xe56   : > { %v6575_v25 = vmul.f32 %v11077_v28, %v6531_v37  ;;  %v6576_v57 = vmul.f32 %v11080_v53, %v6532_v49  ;;  %v6454_v38 = vpop.xlane.xlu1 %6453 }
 0xe57   : > { %v8333_v19 = vpop.eup %8332  ;;  %v6501_v15 = vadd.f32 1e-05, %v6485_v2  ;;  %v6486_v63 = vmul.f32 0.00390625, %v6454_v38 }
 0xe58   : > { %v6619_v51 = vadd.f32 %v11084_v31, %v6575_v25  ;;  %v6620_v46 = vadd.f32 %v11087_v26, %v6576_v57  ;;  %v6533_v10 = vmul.f32 %v8333_v19, %v10941_v39  ;;  %v6534_v59 = vmul.f32 %v8333_v19, %v10944_v17 }
 0xe59   : > { %8338 = vrsqrt.f32 %v6501_v15  ;;  %v6502_v9 = vadd.f32 1e-05, %v6486_v63 }
 0xe5a   : > { %6651 = vst [vmem:[%s11099_s25 + $0x20] sm:$0xff] %v6619_v51  ;;  %6652 = vst [vmem:[%s11099_s25 + $0x28] sm:$0xff] %v6620_v46  ;;  %v6577_v24 = vmul.f32 %v11077_v28, %v6533_v10  ;;  %v6578_v21 = vmul.f32 %v11080_v53, %v6534_v59 }
 0xe5b   : > { %v8335_v16 = vpop.eup %8334  ;;  %8340 = vrsqrt.f32 %v6502_v9 }
 0xe5c   : > { %v6621_v32 = vadd.f32 %v11084_v31, %v6577_v24  ;;  %v6622_v56 = vadd.f32 %v11087_v26, %v6578_v21  ;;  %v6535_v39 = vmul.f32 %v8335_v16, %v10951_v3  ;;  %v6536_v17 = vmul.f32 %v8335_v16, %v10954_v27  ;;  %v6457_v12 = vpop.xlane.xlu0 %6456 }
 0xe5d   : > { %v8337_v29 = vpop.eup %8336  ;;  %v6487_v60 = vmul.f32 0.00390625, %v6457_v12 }
 0xe5e   : > { %6653 = vst [vmem:[%s11099_s25 + $0x30] sm:$0xff] %v6621_v32  ;;  %6654 = vst [vmem:[%s11099_s25 + $0x38] sm:$0xff] %v6622_v56  ;;  %v6579_v18 = vmul.f32 %v11077_v28, %v6535_v39  ;;  %v6580_v7 = vmul.f32 %v11080_v53, %v6536_v17  ;;  %v6537_v47 = vmul.f32 %v8337_v29, %v10961_v52  ;;  %v6460_v41 = vpop.xlane.xlu1 %6459 }
 0xe5f   : > { %v6538_v55 = vmul.f32 %v8337_v29, %v10964_v14  ;;  %v6503_v3 = vadd.f32 1e-05, %v6487_v60  ;;  %v6488_v27 = vmul.f32 0.00390625, %v6460_v41 }
 0xe60   : > { %v6623_v23 = vadd.f32 %v11084_v31, %v6579_v18  ;;  %v6624_v36 = vadd.f32 %v11087_v26, %v6580_v7  ;;  %v6581_v34 = vmul.f32 %v11077_v28, %v6537_v47 }
 0xe61   : > { %v6582_v0 = vmul.f32 %v11080_v53, %v6538_v55  ;;  %8342 = vrsqrt.f32 %v6503_v3  ;;  %v6504_v30 = vadd.f32 1e-05, %v6488_v27 }
 0xe62   : > { %6655 = vst [vmem:[%s11099_s25 + $0x40] sm:$0xff] %v6623_v23  ;;  %6656 = vst [vmem:[%s11099_s25 + $0x48] sm:$0xff] %v6624_v36  ;;  %v6625_v52 = vadd.f32 %v11084_v31, %v6581_v34 }
 0xe63   : > { %v6626_v14 = vadd.f32 %v11087_v26, %v6582_v0  ;;  %v8339_v48 = vpop.eup %8338  ;;  %8344 = vrsqrt.f32 %v6504_v30 }
 0xe64   : > { %6657 = vst [vmem:[%s11099_s25 + $0x50] sm:$0xff] %v6625_v52  ;;  %v6539_v37 = vmul.f32 %v8339_v48, %v10971_v40  ;;  %v6540_v49 = vmul.f32 %v8339_v48, %v10974_v6 }
 0xe65   : > { %6658 = vst [vmem:[%s11099_s25 + $0x58] sm:$0xff] %v6626_v14  ;;  %v8341_v5 = vpop.eup %8340 }
 0xe66   : > { %v6583_v2 = vmul.f32 %v11077_v28, %v6539_v37  ;;  %v6584_v25 = vmul.f32 %v11080_v53, %v6540_v49  ;;  %v6541_v57 = vmul.f32 %v8341_v5, %v10981_v62  ;;  %v6542_v38 = vmul.f32 %v8341_v5, %v10984_v13 }
 0xe68   : > { %v6627_v19 = vadd.f32 %v11084_v31, %v6583_v2  ;;  %v6628_v15 = vadd.f32 %v11087_v26, %v6584_v25  ;;  %v6585_v63 = vmul.f32 %v11077_v28, %v6541_v57  ;;  %v6586_v40 = vmul.f32 %v11080_v53, %v6542_v38 }
 0xe6a   : > { %6659 = vst [vmem:[%s11099_s25 + $0x60] sm:$0xff] %v6627_v19  ;;  %6660 = vst [vmem:[%s11099_s25 + $0x68] sm:$0xff] %v6628_v15  ;;  %v6629_v6 = vadd.f32 %v11084_v31, %v6585_v63  ;;  %v6630_v51 = vadd.f32 %v11087_v26, %v6586_v40 }
 0xe6b   : > { %v8343_v46 = vpop.eup %8342 }
 0xe6c   : > { %6661 = vst [vmem:[%s11099_s25 + $0x70] sm:$0xff] %v6629_v6  ;;  %6662 = vst [vmem:[%s11099_s25 + $0x78] sm:$0xff] %v6630_v51  ;;  %v6543_v62 = vmul.f32 %v8343_v46, %v10991_v50  ;;  %v6544_v13 = vmul.f32 %v8343_v46, %v10994_v43 }
 0xe6d   : > { %v8345_v10 = vpop.eup %8344 }
 0xe6e   : > { %v6587_v59 = vmul.f32 %v11077_v28, %v6543_v62  ;;  %v6588_v9 = vmul.f32 %v11080_v53, %v6544_v13  ;;  %v6545_v24 = vmul.f32 %v8345_v10, %v11001_v1  ;;  %v6546_v21 = vmul.f32 %v8345_v10, %v11004_v44 }
 0xe70   : > { %v6631_v16 = vadd.f32 %v11084_v31, %v6587_v59  ;;  %v6632_v32 = vadd.f32 %v11087_v26, %v6588_v9  ;;  %v6589_v56 = vmul.f32 %v11077_v28, %v6545_v24  ;;  %v6590_v50 = vmul.f32 %v11080_v53, %v6546_v21 }
 0xe72   : > { %6663 = vst [vmem:[%s11099_s25 + $0x80] sm:$0xff] %v6631_v16  ;;  %6664 = vst [vmem:[%s11099_s25 + $0x88] sm:$0xff] %v6632_v32  ;;  %v6633_v43 = vadd.f32 %v11084_v31, %v6589_v56  ;;  %v6634_v39 = vadd.f32 %v11087_v26, %v6590_v50 }
 0xe74   : > { %6665 = vst [vmem:[%s11099_s25 + $0x90] sm:$0xff] %v6633_v43  ;;  %6666 = vst [vmem:[%s11099_s25 + $0x98] sm:$0xff] %v6634_v39 }
 0xe7d   : > { %v6463_v17 = vpop.xlane.xlu0 %6462 }
 0xe7e   : > { %v6489_v1 = vmul.f32 0.00390625, %v6463_v17 }
 0xe7f   : > { %v6466_v12 = vpop.xlane.xlu1 %6465 }
 0xe80   : > { %v6505_v44 = vadd.f32 1e-05, %v6489_v1  ;;  %v6490_v29 = vmul.f32 0.00390625, %v6466_v12 }
 0xe82   : > { %8346 = vrsqrt.f32 %v6505_v44  ;;  %v6506_v60 = vadd.f32 1e-05, %v6490_v29 }
 0xe84   : > { %8348 = vrsqrt.f32 %v6506_v60 }
 0xe85   : > { %v6469_v18 = vpop.xlane.xlu0 %6468 }
 0xe86   : > { %v6491_v7 = vmul.f32 0.00390625, %v6469_v18 }
 0xe87   : > { %v6472_v47 = vpop.xlane.xlu1 %6471 }
 0xe88   : > { %v6507_v55 = vadd.f32 1e-05, %v6491_v7  ;;  %v6492_v41 = vmul.f32 0.00390625, %v6472_v47 }
 0xe8a   : > { %8350 = vrsqrt.f32 %v6507_v55  ;;  %v6508_v3 = vadd.f32 1e-05, %v6492_v41 }
 0xe8c   : > { %v8347_v27 = vpop.eup %8346  ;;  %8352 = vrsqrt.f32 %v6508_v3 }
 0xe8d   : > { %v6547_v23 = vmul.f32 %v8347_v27, %v11011_v4  ;;  %v6548_v36 = vmul.f32 %v8347_v27, %v11014_v8  ;;  %v6475_v34 = vpop.xlane.xlu0 %6474 }
 0xe8e   : > { %v8349_v0 = vpop.eup %8348  ;;  %v6493_v30 = vmul.f32 0.00390625, %v6475_v34 }
 0xe8f   : > { %v6591_v52 = vmul.f32 %v11077_v28, %v6547_v23  ;;  %v6592_v14 = vmul.f32 %v11080_v53, %v6548_v36  ;;  %v6549_v48 = vmul.f32 %v8349_v0, %v11021_v20  ;;  %v6550_v37 = vmul.f32 %v8349_v0, %v11024_v22  ;;  %v6478_v49 = vpop.xlane.xlu1 %6477 }
 0xe90   : > { %v6509_v5 = vadd.f32 1e-05, %v6493_v30  ;;  %v6494_v4 = vmul.f32 0.00390625, %v6478_v49 }
 0xe91   : > { %v6635_v8 = vadd.f32 %v11084_v31, %v6591_v52  ;;  %v6636_v2 = vadd.f32 %v11087_v26, %v6592_v14  ;;  %v6593_v25 = vmul.f32 %v11077_v28, %v6549_v48  ;;  %v6594_v57 = vmul.f32 %v11080_v53, %v6550_v37 }
 0xe92   : > { %8354 = vrsqrt.f32 %v6509_v5  ;;  %v6510_v38 = vadd.f32 1e-05, %v6494_v4 }
 0xe93   : > { %6667 = vst [vmem:[%s11099_s25 + $0xa0] sm:$0xff] %v6635_v8  ;;  %6668 = vst [vmem:[%s11099_s25 + $0xa8] sm:$0xff] %v6636_v2  ;;  %v6637_v20 = vadd.f32 %v11084_v31, %v6593_v25  ;;  %v6638_v22 = vadd.f32 %v11087_v26, %v6594_v57 }
 0xe94   : > { %v8351_v19 = vpop.eup %8350  ;;  %8356 = vrsqrt.f32 %v6510_v38 }
 0xe95   : > { %6669 = vst [vmem:[%s11099_s25 + $0xb0] sm:$0xff] %v6637_v20  ;;  %6670 = vst [vmem:[%s11099_s25 + $0xb8] sm:$0xff] %v6638_v22  ;;  %v6551_v15 = vmul.f32 %v8351_v19, %v11031_v35  ;;  %v6552_v63 = vmul.f32 %v8351_v19, %v11034_v54 }
 0xe96   : > { %v8353_v40 = vpop.eup %8352 }
 0xe97   : > { %v6595_v6 = vmul.f32 %v11077_v28, %v6551_v15  ;;  %v6596_v51 = vmul.f32 %v11080_v53, %v6552_v63  ;;  %v6553_v46 = vmul.f32 %v8353_v40, %v11041_v58  ;;  %v6554_v62 = vmul.f32 %v8353_v40, %v11044_v61 }
 0xe99   : > { %v6639_v13 = vadd.f32 %v11084_v31, %v6595_v6  ;;  %v6640_v10 = vadd.f32 %v11087_v26, %v6596_v51  ;;  %v6597_v59 = vmul.f32 %v11077_v28, %v6553_v46  ;;  %v6598_v35 = vmul.f32 %v11080_v53, %v6554_v62 }
 0xe9b   : > { %6671 = vst [vmem:[%s11099_s25 + $0xc0] sm:$0xff] %v6639_v13  ;;  %6672 = vst [vmem:[%s11099_s25 + $0xc8] sm:$0xff] %v6640_v10  ;;  %v6641_v54 = vadd.f32 %v11084_v31, %v6597_v59  ;;  %v6642_v9 = vadd.f32 %v11087_v26, %v6598_v35 }
 0xe9c   : > { %v8355_v24 = vpop.eup %8354 }
 0xe9d   : > { %6673 = vst [vmem:[%s11099_s25 + $0xd0] sm:$0xff] %v6641_v54  ;;  %6674 = vst [vmem:[%s11099_s25 + $0xd8] sm:$0xff] %v6642_v9  ;;  %v6555_v58 = vmul.f32 %v8355_v24, %v11051_v45  ;;  %v6556_v61 = vmul.f32 %v8355_v24, %v11054_v33 }
 0xe9e   : > { %v8357_v21 = vpop.eup %8356 }
 0xe9f   : > { %v6599_v16 = vmul.f32 %v11077_v28, %v6555_v58  ;;  %v6600_v32 = vmul.f32 %v11080_v53, %v6556_v61  ;;  %v6557_v56 = vmul.f32 %v8357_v21, %v11061_v42  ;;  %v6558_v50 = vmul.f32 %v8357_v21, %v11064_v11 }
 0xea1   : > { %v6643_v45 = vadd.f32 %v11084_v31, %v6599_v16  ;;  %v6644_v43 = vadd.f32 %v11087_v26, %v6600_v32  ;;  %v6601_v33 = vmul.f32 %v11077_v28, %v6557_v56  ;;  %v6602_v39 = vmul.f32 %v11080_v53, %v6558_v50 }
 0xea3   : > { %6675 = vst [vmem:[%s11099_s25 + $0xe0] sm:$0xff] %v6643_v45  ;;  %6676 = vst [vmem:[%s11099_s25 + $0xe8] sm:$0xff] %v6644_v43  ;;  %v6645_v42 = vadd.f32 %v11084_v31, %v6601_v33  ;;  %v6646_v11 = vadd.f32 %v11087_v26, %v6602_v39 }
 0xea5   : > { %6677 = vst [vmem:[%s11099_s25 + $0xf0] sm:$0xff] %v6645_v42  ;;  %6678 = vst [vmem:[%s11099_s25 + $0xf8] sm:$0xff] %v6646_v11 }
 0xea6   : > { %8455 = shalt.err (!%p8452_p0)
}
 0xea7   : > { %s8456_s25 = scalar_lea.hbm %s11251_s28, 4096  ;;  %s8460_s24 = scalar_lea.hbm %s11446_s27, 8192 }
 0xea8   : > { %p8457_p6 = scmp.ne.s32.totalorder %s11251_s28, %s8456_s25  ;;  %p8461_p10 = scmp.lt.u32.totalorder %s11251_s28, %s11446_s27 }
 0xea9   : > { %p8462_p2 = scmp.lt.u32.totalorder %s8460_s24, %s8456_s25  ;;  %p8464_p4 = scmp.lt.u32.totalorder %s8456_s25, %s11251_s28 }
 0xeaa   : > { %p8458_p9 = pnand %p8457_p6, %p11445_p1 }
 0xeab   : > { %p8463_p3 = por %p8462_p2, %p8461_p10 }
 0xeac   : > { %p8459_p12 = pneg %p8458_p9 }
 0xead   : > { %p8465_p7 = por %p8464_p4, %p8463_p3 }
 0xeaf   : > { %p8466_p8 = pnand %p8465_p7, %p8459_p12 }
 0xeb1   : > { %8469 = shalt.err (!%p8466_p8)
}
 0xeb2   : > { %s8529_s19 = smov 256   ;;  %s8530_s22 = smov 16  }
 0xeb3   : > { %7684 = dma.vmem_to_hbm [thread:$0]  (%p11445_p1), %s11253_s20, 4096, %s11251_s28, %s6680_s17, %s8529_s19, %s8529_s19, %s8530_s22  }
 0xeb4 PF: > { %s11447_s29 = sld [smem:[#allocation16_spill]]  ;;  %s11448_s16 = sld [smem:[#allocation14_spill]] }
 0xeb5   : > { %s11449_s14 = sld [smem:[#allocation19_spill]] }
 0xeba   : > { %p7706_p11 = scmp.ge.s32.totalorder %s11447_s29, 2  ;;  %s6731_s18 = sand.u32 1, %s11448_s16  }
 0xebb   : > { %p11450_p13 = scmp.ne.s32.totalorder %s11449_s14, 0  ;;  %s6732_s25 = scalar_lea.sflag [#allocation4], %s6731_s18 }
 0xebd   : > { %p7696_p5 = pnand %p7706_p11, %p11450_p13 }
 0xebf   : > { %8495 = dma.done.wait (!%p7696_p5), %s6732_s25, 4096  }
 0xec0   : > { %8497 = vsyncadd (!%p7696_p5), %s6732_s25, 4294963200  ;;  %s6741_s24 = scalar_lea.sflag [#allocation9], %s6731_s18 }
 0xec1   : > { %8499 = dma.done.wait (!%p7696_p5), %s6741_s24, 8192  }
 0xec2   : > { %8501 = vsyncadd (!%p7696_p5), %s6741_s24, 4294959104  ;;  %s11451_s16 = sld [smem:[#allocation17_spill]]  ;;  %s11452_s13 = sld [smem:[#allocation15_spill]] }
 0xec3   : > { %s11453_s15 = sld [smem:[#allocation18_spill]]  ;;  %s11454_s29 = smov %s8508_s30 }
 0xec8   : > { %p30_p1 = scmp.ge.s32.totalorder %s11451_s16, 4   ;;  %s11455_s30 = smov %s11452_s13 }
 0xeca   :  { %32 = sbr.rel (!%p30_p1) target bundleno = 10 (0xa), region = 142 }
 0xed1   :  { %6746 = vsyncpa [#allocation3], 1 }
 0xed2   :  { %6748 = vsyncpa [#allocation3 + $0x1], 1 }
 0xed3   :  { %6749 = vsyncpa [#allocation6], 1 }
 0xed4   :  { %6750 = vsyncpa [#allocation4], 1 }
 0xed5   :  { %6752 = vsyncpa [#allocation4 + $0x1], 1 }
 0xed6   :  { %6753 = vsyncpa [#allocation9], 1 }
 0xed7   :  { %6755 = vsyncpa [#allocation9 + $0x1], 1 }

</bundles_post_ra>
